<compile_context>
chip_gen: v6e
topology: v6e:2x2x1
jax: 0.10.0
libtpu: 0.0.40
codegen_flags: <defaults>
</compile_context>

<pallas_src>
import functools

import jax
import jax.numpy as jnp
from jax.experimental import pallas as pl
from jax.experimental.pallas import tpu as pltpu

_LANES = 128


def _round_up(x, m):
    return (x + m - 1) // m * m


def _make_kernel(*, window_size_y, f_exp, f_window, has_elapsed, step_base,
                 time_block, total_steps):
    wy = float(window_size_y)
    base = float(step_base)
    rem = total_steps % time_block

    def kernel(*refs):
        if has_elapsed:
            (x_ref, tau1_in, tau2_in, ec_in, ac_in, el_ref,
             pred_ref, tau1_o, tau2_o, ec_o, ac_o) = refs
        else:
            (x_ref, tau1_in, tau2_in, ec_in, ac_in,
             pred_ref, tau1_o, tau2_o, ec_o, ac_o) = refs
            el_ref = None

        tb = pl.program_id(1)          # time-block index (innermost, sequential)
        n_tb = pl.num_programs(1)

        # First time-block of each spatial tile: seed the VMEM-resident state
        # (accumulator outputs, index_map constant over tb) from the inputs.
        @pl.when(tb == 0)
        def _():
            tau1_o[...] = tau1_in[...]
            tau2_o[...] = tau2_in[...]
            ec_o[...] = ec_in[...]
            ac_o[...] = ac_in[...]

        def step(s):
            # step_idx starts from `step_base` (== 1 in the PyTorch module).
            step_idx = base + (tb * time_block + s).astype(jnp.float32)
            x = x_ref[s].astype(jnp.float32)            # 0/1 event indicators
            if has_elapsed:
                elapsed = jnp.maximum(el_ref[s].astype(jnp.float32), 0.0)
            else:
                elapsed = jnp.float32(0.0)              # wy == 1 or no elapsed

            tau1 = tau1_o[...]
            tau2 = tau2_o[...]
            ec = ec_o[...]
            ac = ac_o[...]

            ac_n = ac + x
            tau2_n = jnp.maximum(tau2, x * tau1)                   # OLD tau1
            tau1_n = jnp.maximum(tau1, x * (step_idx * wy - elapsed))
            ri = jnp.where(ac_n > 1.0, jnp.maximum(tau1_n - tau2_n, 0.0), 0.0)
            # Folded select chain (valid because x is a 0/1 indicator).
            ec_n = jnp.where(ac_n > 0.0,
                             jnp.where(x == 0.0, ec + wy, elapsed), 0.0)

            if f_exp:
                pred = jnp.where(ri > 0.0,
                                 jnp.exp(-jnp.abs(ri - (ec_n + 1.0))), 0.0)
            elif f_window:
                pred = ((ri > 0.0) & (ri >= ec_n)
                        & (ri <= ec_n + wy)).astype(jnp.float32)
            else:
                # Exact float equality, as in the PyTorch reference (f32).
                pred = ((ri > 0.0) & (ri == ec_n + wy)).astype(jnp.float32)

            pred_ref[s] = pred.astype(pred_ref.dtype)
            tau1_o[...] = tau1_n
            tau2_o[...] = tau2_n
            ec_o[...] = ec_n
            ac_o[...] = ac_n

        # Unrolled time block; only the sub-steps that can run past T (last,
        # ragged time block) get a pl.when guard.
        for s in range(time_block):
            if rem == 0 or s < rem:
                step(s)
            else:
                pl.when(tb < n_tb - 1)(functools.partial(step, s))

    return kernel


def _vmem_limit_bytes():
    try:
        kind = jax.devices()[0].device_kind.lower()
    except Exception:
        kind = ""
    if "v7" in kind:                    # 64 MiB VMEM per TC -> stay <= ~48 MiB
        return 48 * 1024 * 1024
    return 64 * 1024 * 1024             # v5e / v6e: 128 MiB physical VMEM


@functools.partial(
    jax.jit,
    static_argnames=("window_size_y", "f_exp", "f_window", "step_base",
                     "pred_dtype", "time_block", "max_rows_per_block"))
def periodic_predictor_forward(inputs, tau1, tau2, ec, ac, elapsed=None, *,
                               window_size_y=1, f_exp=False, f_window=False,
                               step_base=1, pred_dtype=jnp.float32,
                               time_block=8, max_rows_per_block=1024):
    """Fused multi-step PeriodicPredictor forward.

    inputs : (T, B, E) 0/1 event indicators; pass int8/uint8 to halve streamed
             HBM bytes (any dtype accepted, cast to f32 in-kernel).
    tau1, tau2, ec, ac : (B, E) initial state (cast to f32).
    elapsed: optional (T, B, E) elapsed times (ignored when window_size_y==1).
    Returns (pred (T,B,E) in `pred_dtype`, tau1', tau2', ec', ac'), identical to
    calling the PyTorch module T times with step_idx = step_base, step_base+1,...
    """
    T, B, E = inputs.shape
    has_elapsed = (window_size_y != 1) and (elapsed is not None)

    # ---- layout: flatten (B, E) -> lane-dense (rows, 128) -------------------
    n = B * E
    n_pad = _round_up(n, _LANES)
    rows = n_pad // _LANES

    def prep_seq(a):
        a = a.reshape(T, n)
        if n_pad != n:
            a = jnp.pad(a, ((0, 0), (0, n_pad - n)))
        return a.reshape(T, rows, _LANES)

    def prep_state(a):
        a = a.reshape(n).astype(jnp.float32)
        if n_pad != n:
            a = jnp.pad(a, (0, n_pad - n))
        return a.reshape(rows, _LANES)

    x3 = prep_seq(inputs)
    t1, t2, e0, a0 = (prep_state(v) for v in (tau1, tau2, ec, ac))

    # ---- tiling --------------------------------------------------------------
    tT = max(1, min(time_block, T))                 # time blocking (amortize DMA)
    cap = max(8, (max_rows_per_block // 8) * 8)     # <= ~0.5 MiB f32 / array / step
    b_rows = rows if rows <= cap else cap
    # Guarantee >= 2 blocks along the 'parallel' axis whenever possible so both
    # TensorCores on a v7x chip get work (harmless no-op cost on v5e/v6e).
    if b_rows == rows and rows >= 16:
        b_rows = _round_up(pl.cdiv(rows, 2), 8)

    grid = (pl.cdiv(rows, b_rows), pl.cdiv(T, tT))

    seq_spec = pl.BlockSpec((tT, b_rows, _LANES), lambda i, tb: (tb, i, 0))
    st_spec = pl.BlockSpec((b_rows, _LANES), lambda i, tb: (i, 0))  # resident

    in_specs = [seq_spec, st_spec, st_spec, st_spec, st_spec]
    args = [x3, t1, t2, e0, a0]
    if has_elapsed:
        in_specs.append(seq_spec)
        args.append(prep_seq(elapsed))

    state_sds = jax.ShapeDtypeStruct((rows, _LANES), jnp.float32)
    out_shape = (jax.ShapeDtypeStruct((T, rows, _LANES), pred_dtype),
                 state_sds, state_sds, state_sds, state_sds)
    out_specs = (seq_spec, st_spec, st_spec, st_spec, st_spec)

    kernel = _make_kernel(window_size_y=window_size_y, f_exp=f_exp,
                          f_window=f_window, has_elapsed=has_elapsed,
                          step_base=step_base, time_block=tT, total_steps=T)

    pred3, t1o, t2o, eco, aco = pl.pallas_call(
        kernel,
        grid=grid,
        in_specs=in_specs,
        out_specs=out_specs,
        out_shape=out_shape,
        compiler_params=pltpu.CompilerParams(
            dimension_semantics=("parallel", "arbitrary"),
            vmem_limit_bytes=_vmem_limit_bytes(),
        ),
    )(*args)

    def unprep_seq(a):
        return a.reshape(T, n_pad)[:, :n].reshape(T, B, E)

    def unprep_state(a):
        return a.reshape(n_pad)[:n].reshape(B, E)

    return (unprep_seq(pred3), unprep_state(t1o), unprep_state(t2o),
            unprep_state(eco), unprep_state(aco))


def periodic_predictor_step_ref(x, step_idx, tau1, tau2, ec, ac,
                                elapsed_time_step=None, *,
                                window_size_y=1, f_exp=False, f_window=False):
    """Pure-JAX single-step transcription of the PyTorch forward()."""
    wy = jnp.float32(window_size_y)
    x = x.astype(jnp.float32)
    if elapsed_time_step is None or window_size_y == 1:
        elapsed = jnp.zeros_like(x)
    else:
        elapsed = jnp.maximum(elapsed_time_step.astype(jnp.float32), 0.0)
    ac_n = ac + x
    tau2_n = jnp.maximum(tau2, x * tau1)
    tau1_n = jnp.maximum(tau1, x * (step_idx * wy - elapsed))
    ri = (ac_n > 1.0).astype(jnp.float32) * jnp.maximum(tau1_n - tau2_n, 0.0)
    ec_n = (ac_n > 0.0).astype(jnp.float32) * (
        (ec + wy) * (x == 0.0).astype(jnp.float32)
        + (x == 1.0).astype(jnp.float32) * elapsed)
    if f_exp:
        pred = (ri > 0.0).astype(jnp.float32) * jnp.exp(-jnp.abs(ri - (ec_n + 1.0)))
    elif f_window:
        pred = ((ri > 0.0) & (ri >= ec_n) & (ri <= ec_n + wy)).astype(jnp.float32)
    else:
        pred = ((ri > 0.0) & (ri == ec_n + wy)).astype(jnp.float32)
    return pred, tau1_n, tau2_n, ec_n, ac_n


if __name__ == "__main__":
    def run_and_check(seed, B, E, T, *, wy, f_exp, f_window, in_dtype,
                      pred_dtype, max_rows_per_block=1024):
        key = jax.random.fold_in(jax.random.PRNGKey(0), seed)
        k_inp, k_el = jax.random.split(key)
        inputs = jax.random.bernoulli(k_inp, 0.5, (T, B, E)).astype(in_dtype)
        elapsed = jax.random.uniform(k_el, (T, B, E), jnp.float32,
                                     minval=-1.0, maxval=1.0)

        # initialize_batch: all-zero state buffers of shape (batch, events).
        z = jnp.zeros((B, E), jnp.float32)
        pred, t1, t2, ec_, ac_ = periodic_predictor_forward(
            inputs, z, z, z, z, elapsed,
            window_size_y=wy, f_exp=f_exp, f_window=f_window,
            pred_dtype=pred_dtype, max_rows_per_block=max_rows_per_block)
        jax.block_until_ready(pred)

        # Pure-JAX per-step reference (step_idx starts from 1).
        x_f32 = inputs.astype(jnp.float32)
        r_t1 = r_t2 = r_ec = r_ac = z
        r_preds = []
        for t in range(T):
            rp, r_t1, r_t2, r_ec, r_ac = periodic_predictor_step_ref(
                x_f32[t], float(t + 1), r_t1, r_t2, r_ec, r_ac, elapsed[t],
                window_size_y=wy, f_exp=f_exp, f_window=f_window)
            r_preds.append(rp)
        r_pred = jnp.stack(r_preds)

        got = (pred.astype(jnp.float32), t1, t2, ec_, ac_)
        want = (r_pred, r_t1, r_t2, r_ec, r_ac)
        for name, a, b in zip(("pred", "tau1", "tau2", "ec", "ac"), got, want):
            assert jnp.allclose(a, b, atol=1e-6), f"{name} mismatch vs reference"

    # Default (exact-match) path: int8 inputs, two spatial tiles, ragged T.
    run_and_check(0, 32, 256, 10, wy=2, f_exp=False, f_window=False,
                  in_dtype=jnp.int8, pred_dtype=jnp.float32)
    # f_exp path with window_size_y == 1 (elapsed dropped from the operands).
    run_and_check(1, 4, 128, 7, wy=1, f_exp=True, f_window=False,
                  in_dtype=jnp.float32, pred_dtype=jnp.float32)
    # f_window path: E not a multiple of 128 (lane padding), small row blocks
    # (ragged spatial tile), bf16 predictions.
    run_and_check(2, 48, 100, 9, wy=3, f_exp=False, f_window=True,
                  in_dtype=jnp.int8, pred_dtype=jnp.bfloat16,
                  max_rows_per_block=32)
    print("KERNEL_OK")
</pallas_src>

<mosaic_0001>
module attributes {stable_mosaic.version = 11 : i64} {
  func.func @kernel(%arg0: i32, %arg1: i32, %arg2: memref<8x32x128xi8, #tpu.memory_space<vmem>>, %arg3: memref<32x128xf32, #tpu.memory_space<vmem>>, %arg4: memref<32x128xf32, #tpu.memory_space<vmem>>, %arg5: memref<32x128xf32, #tpu.memory_space<vmem>>, %arg6: memref<32x128xf32, #tpu.memory_space<vmem>>, %arg7: memref<8x32x128xf32, #tpu.memory_space<vmem>>, %arg8: memref<8x32x128xf32, #tpu.memory_space<vmem>>, %arg9: memref<32x128xf32, #tpu.memory_space<vmem>>, %arg10: memref<32x128xf32, #tpu.memory_space<vmem>>, %arg11: memref<32x128xf32, #tpu.memory_space<vmem>>, %arg12: memref<32x128xf32, #tpu.memory_space<vmem>>) attributes {dimension_semantics = [#tpu.dimension_semantics<parallel>, #tpu.dimension_semantics<arbitrary>], iteration_bounds = array<i64: 2, 2>, scalar_prefetch = 0 : i64, scratch_operands = 0 : i64, tpu.core_type = #tpu.core_type<tc>, window_params = [{transform_indices = @transform_0, window_bounds = array<i64: 8, 32, 128>}, {transform_indices = @transform_1, window_bounds = array<i64: 32, 128>}, {transform_indices = @transform_2, window_bounds = array<i64: 32, 128>}, {transform_indices = @transform_3, window_bounds = array<i64: 32, 128>}, {transform_indices = @transform_4, window_bounds = array<i64: 32, 128>}, {transform_indices = @transform_5, window_bounds = array<i64: 8, 32, 128>}, {transform_indices = @transform_6, window_bounds = array<i64: 8, 32, 128>}, {transform_indices = @transform_7, window_bounds = array<i64: 32, 128>}, {transform_indices = @transform_8, window_bounds = array<i64: 32, 128>}, {transform_indices = @transform_9, window_bounds = array<i64: 32, 128>}, {transform_indices = @transform_10, window_bounds = array<i64: 32, 128>}]} {
    %c0_i32 = arith.constant 0 : i32
    %0 = arith.cmpi eq, %arg1, %c0_i32 : i32
    %1 = arith.extui %0 : i1 to i32
    %c0_i32_0 = arith.constant 0 : i32
    %2 = arith.cmpi ne, %1, %c0_i32_0 : i32
    scf.if %2 {
      %c0_86 = arith.constant 0 : index
      %c0_87 = arith.constant 0 : index
      %129 = vector.load %arg3[%c0_86, %c0_87] : memref<32x128xf32, #tpu.memory_space<vmem>>, vector<32x128xf32>
      %c0_88 = arith.constant 0 : index
      %c0_89 = arith.constant 0 : index
      %130 = vector.load %arg9[%c0_88, %c0_89] : memref<32x128xf32, #tpu.memory_space<vmem>>, vector<32x128xf32>
      tpu.vector_store %arg9[%c0_88, %c0_89], %129 {strides = array<i32>} : memref<32x128xf32, #tpu.memory_space<vmem>>, vector<32x128xf32>,
      %c0_90 = arith.constant 0 : index
      %c0_91 = arith.constant 0 : index
      %131 = vector.load %arg4[%c0_90, %c0_91] : memref<32x128xf32, #tpu.memory_space<vmem>>, vector<32x128xf32>
      %c0_92 = arith.constant 0 : index
      %c0_93 = arith.constant 0 : index
      %132 = vector.load %arg10[%c0_92, %c0_93] : memref<32x128xf32, #tpu.memory_space<vmem>>, vector<32x128xf32>
      tpu.vector_store %arg10[%c0_92, %c0_93], %131 {strides = array<i32>} : memref<32x128xf32, #tpu.memory_space<vmem>>, vector<32x128xf32>,
      %c0_94 = arith.constant 0 : index
      %c0_95 = arith.constant 0 : index
      %133 = vector.load %arg5[%c0_94, %c0_95] : memref<32x128xf32, #tpu.memory_space<vmem>>, vector<32x128xf32>
      %c0_96 = arith.constant 0 : index
      %c0_97 = arith.constant 0 : index
      %134 = vector.load %arg11[%c0_96, %c0_97] : memref<32x128xf32, #tpu.memory_space<vmem>>, vector<32x128xf32>
      tpu.vector_store %arg11[%c0_96, %c0_97], %133 {strides = array<i32>} : memref<32x128xf32, #tpu.memory_space<vmem>>, vector<32x128xf32>,
      %c0_98 = arith.constant 0 : index
      %c0_99 = arith.constant 0 : index
      %135 = vector.load %arg6[%c0_98, %c0_99] : memref<32x128xf32, #tpu.memory_space<vmem>>, vector<32x128xf32>
      %c0_100 = arith.constant 0 : index
      %c0_101 = arith.constant 0 : index
      %136 = vector.load %arg12[%c0_100, %c0_101] : memref<32x128xf32, #tpu.memory_space<vmem>>, vector<32x128xf32>
      tpu.vector_store %arg12[%c0_100, %c0_101], %135 {strides = array<i32>} : memref<32x128xf32, #tpu.memory_space<vmem>>, vector<32x128xf32>,
    } else {
    }
    %c8_i32 = arith.constant 8 : i32
    %3 = arith.muli %arg1, %c8_i32 : i32
    %c0_i32_1 = arith.constant 0 : i32
    %4 = arith.addi %3, %c0_i32_1 : i32
    %5 = arith.sitofp %4 : i32 to f32
    %cst = arith.constant 1.000000e+00 : f32
    %6 = arith.addf %cst, %5 : f32
    %c0 = arith.constant 0 : index
    %c0_2 = arith.constant 0 : index
    %c0_3 = arith.constant 0 : index
    %7 = vector.load %arg2[%c0, %c0_2, %c0_3] : memref<8x32x128xi8, #tpu.memory_space<vmem>>, vector<1x32x128xi8>
    %8 = vector.shape_cast %7 : vector<1x32x128xi8> to vector<32x128xi8>
    %9 = arith.sitofp %8 : vector<32x128xi8> to vector<32x128xf32>
    %c0_4 = arith.constant 0 : index
    %c0_5 = arith.constant 0 : index
    %c0_6 = arith.constant 0 : index
    %10 = vector.load %arg7[%c0_4, %c0_5, %c0_6] : memref<8x32x128xf32, #tpu.memory_space<vmem>>, vector<1x32x128xf32>
    %11 = vector.shape_cast %10 : vector<1x32x128xf32> to vector<32x128xf32>
    %cst_7 = arith.constant 0.000000e+00 : f32
    %12 = vector.broadcast %cst_7 : f32 to vector<32x128xf32>
    %13 = arith.maximumf %11, %12 : vector<32x128xf32>
    %c0_8 = arith.constant 0 : index
    %c0_9 = arith.constant 0 : index
    %14 = vector.load %arg9[%c0_8, %c0_9] : memref<32x128xf32, #tpu.memory_space<vmem>>, vector<32x128xf32>
    %c0_10 = arith.constant 0 : index
    %c0_11 = arith.constant 0 : index
    %15 = vector.load %arg10[%c0_10, %c0_11] : memref<32x128xf32, #tpu.memory_space<vmem>>, vector<32x128xf32>
    %c0_12 = arith.constant 0 : index
    %c0_13 = arith.constant 0 : index
    %16 = vector.load %arg11[%c0_12, %c0_13] : memref<32x128xf32, #tpu.memory_space<vmem>>, vector<32x128xf32>
    %c0_14 = arith.constant 0 : index
    %c0_15 = arith.constant 0 : index
    %17 = vector.load %arg12[%c0_14, %c0_15] : memref<32x128xf32, #tpu.memory_space<vmem>>, vector<32x128xf32>
    %18 = arith.addf %17, %9 : vector<32x128xf32>
    %19 = arith.mulf %9, %14 : vector<32x128xf32>
    %20 = arith.maximumf %15, %19 : vector<32x128xf32>
    %cst_16 = arith.constant 2.000000e+00 : f32
    %21 = arith.mulf %6, %cst_16 : f32
    %22 = vector.broadcast %21 : f32 to vector<32x128xf32>
    %23 = arith.subf %22, %13 : vector<32x128xf32>
    %24 = arith.mulf %9, %23 : vector<32x128xf32>
    %25 = arith.maximumf %14, %24 : vector<32x128xf32>
    %cst_17 = arith.constant 1.000000e+00 : f32
    %26 = vector.broadcast %cst_17 : f32 to vector<32x128xf32>
    %27 = arith.cmpf ogt, %18, %26 : vector<32x128xf32>
    %28 = arith.subf %25, %20 : vector<32x128xf32>
    %cst_18 = arith.constant 0.000000e+00 : f32
    %29 = vector.broadcast %cst_18 : f32 to vector<32x128xf32>
    %30 = arith.maximumf %28, %29 : vector<32x128xf32>
    %cst_19 = arith.constant 0.000000e+00 : f32
    %31 = vector.broadcast %cst_19 : f32 to vector<32x128xf32>
    %32 = arith.select %27, %30, %31 : vector<32x128xi1>, vector<32x128xf32>
    %cst_20 = arith.constant 0.000000e+00 : f32
    %33 = vector.broadcast %cst_20 : f32 to vector<32x128xf32>
    %34 = arith.cmpf ogt, %18, %33 : vector<32x128xf32>
    %cst_21 = arith.constant 0.000000e+00 : f32
    %35 = vector.broadcast %cst_21 : f32 to vector<32x128xf32>
    %36 = arith.cmpf oeq, %9, %35 : vector<32x128xf32>
    %cst_22 = arith.constant 2.000000e+00 : f32
    %37 = vector.broadcast %cst_22 : f32 to vector<32x128xf32>
    %38 = arith.addf %16, %37 : vector<32x128xf32>
    %39 = arith.select %36, %38, %13 : vector<32x128xi1>, vector<32x128xf32>
    %cst_23 = arith.constant 0.000000e+00 : f32
    %40 = vector.broadcast %cst_23 : f32 to vector<32x128xf32>
    %41 = arith.select %34, %39, %40 : vector<32x128xi1>, vector<32x128xf32>
    %cst_24 = arith.constant 0.000000e+00 : f32
    %42 = vector.broadcast %cst_24 : f32 to vector<32x128xf32>
    %43 = arith.cmpf ogt, %32, %42 : vector<32x128xf32>
    %cst_25 = arith.constant 2.000000e+00 : f32
    %44 = vector.broadcast %cst_25 : f32 to vector<32x128xf32>
    %45 = arith.addf %41, %44 : vector<32x128xf32>
    %46 = arith.cmpf oeq, %32, %45 : vector<32x128xf32>
    %47 = arith.andi %43, %46 : vector<32x128xi1>
    %48 = arith.extui %47 : vector<32x128xi1> to vector<32x128xi32>
    %49 = arith.sitofp %48 : vector<32x128xi32> to vector<32x128xf32>
    %c0_26 = arith.constant 0 : index
    %c0_27 = arith.constant 0 : index
    %c0_28 = arith.constant 0 : index
    %50 = vector.load %arg8[%c0_26, %c0_27, %c0_28] : memref<8x32x128xf32, #tpu.memory_space<vmem>>, vector<1x32x128xf32>
    %51 = vector.shape_cast %50 : vector<1x32x128xf32> to vector<32x128xf32>
    %52 = vector.shape_cast %49 : vector<32x128xf32> to vector<1x32x128xf32>
    tpu.vector_store %arg8[%c0_26, %c0_27, %c0_28], %52 {strides = array<i32>} : memref<8x32x128xf32, #tpu.memory_space<vmem>>, vector<1x32x128xf32>,
    %c0_29 = arith.constant 0 : index
    %c0_30 = arith.constant 0 : index
    %53 = vector.load %arg9[%c0_29, %c0_30] : memref<32x128xf32, #tpu.memory_space<vmem>>, vector<32x128xf32>
    tpu.vector_store %arg9[%c0_29, %c0_30], %25 {strides = array<i32>} : memref<32x128xf32, #tpu.memory_space<vmem>>, vector<32x128xf32>,
    %c0_31 = arith.constant 0 : index
    %c0_32 = arith.constant 0 : index
    %54 = vector.load %arg10[%c0_31, %c0_32] : memref<32x128xf32, #tpu.memory_space<vmem>>, vector<32x128xf32>
    tpu.vector_store %arg10[%c0_31, %c0_32], %20 {strides = array<i32>} : memref<32x128xf32, #tpu.memory_space<vmem>>, vector<32x128xf32>,
    %c0_33 = arith.constant 0 : index
    %c0_34 = arith.constant 0 : index
    %55 = vector.load %arg11[%c0_33, %c0_34] : memref<32x128xf32, #tpu.memory_space<vmem>>, vector<32x128xf32>
    tpu.vector_store %arg11[%c0_33, %c0_34], %41 {strides = array<i32>} : memref<32x128xf32, #tpu.memory_space<vmem>>, vector<32x128xf32>,
    %c0_35 = arith.constant 0 : index
    %c0_36 = arith.constant 0 : index
    %56 = vector.load %arg12[%c0_35, %c0_36] : memref<32x128xf32, #tpu.memory_space<vmem>>, vector<32x128xf32>
    tpu.vector_store %arg12[%c0_35, %c0_36], %18 {strides = array<i32>} : memref<32x128xf32, #tpu.memory_space<vmem>>, vector<32x128xf32>,
    %c8_i32_37 = arith.constant 8 : i32
    %57 = arith.muli %arg1, %c8_i32_37 : i32
    %c1_i32 = arith.constant 1 : i32
    %58 = arith.addi %57, %c1_i32 : i32
    %59 = arith.sitofp %58 : i32 to f32
    %cst_38 = arith.constant 1.000000e+00 : f32
    %60 = arith.addf %cst_38, %59 : f32
    %c1 = arith.constant 1 : index
    %c0_39 = arith.constant 0 : index
    %c0_40 = arith.constant 0 : index
    %61 = vector.load %arg2[%c1, %c0_39, %c0_40] : memref<8x32x128xi8, #tpu.memory_space<vmem>>, vector<1x32x128xi8>
    %62 = vector.shape_cast %61 : vector<1x32x128xi8> to vector<32x128xi8>
    %63 = arith.sitofp %62 : vector<32x128xi8> to vector<32x128xf32>
    %c1_41 = arith.constant 1 : index
    %c0_42 = arith.constant 0 : index
    %c0_43 = arith.constant 0 : index
    %64 = vector.load %arg7[%c1_41, %c0_42, %c0_43] : memref<8x32x128xf32, #tpu.memory_space<vmem>>, vector<1x32x128xf32>
    %65 = vector.shape_cast %64 : vector<1x32x128xf32> to vector<32x128xf32>
    %cst_44 = arith.constant 0.000000e+00 : f32
    %66 = vector.broadcast %cst_44 : f32 to vector<32x128xf32>
    %67 = arith.maximumf %65, %66 : vector<32x128xf32>
    %c0_45 = arith.constant 0 : index
    %c0_46 = arith.constant 0 : index
    %68 = vector.load %arg9[%c0_45, %c0_46] : memref<32x128xf32, #tpu.memory_space<vmem>>, vector<32x128xf32>
    %c0_47 = arith.constant 0 : index
    %c0_48 = arith.constant 0 : index
    %69 = vector.load %arg10[%c0_47, %c0_48] : memref<32x128xf32, #tpu.memory_space<vmem>>, vector<32x128xf32>
    %c0_49 = arith.constant 0 : index
    %c0_50 = arith.constant 0 : index
    %70 = vector.load %arg11[%c0_49, %c0_50] : memref<32x128xf32, #tpu.memory_space<vmem>>, vector<32x128xf32>
    %c0_51 = arith.constant 0 : index
    %c0_52 = arith.constant 0 : index
    %71 = vector.load %arg12[%c0_51, %c0_52] : memref<32x128xf32, #tpu.memory_space<vmem>>, vector<32x128xf32>
    %72 = arith.addf %71, %63 : vector<32x128xf32>
    %73 = arith.mulf %63, %68 : vector<32x128xf32>
    %74 = arith.maximumf %69, %73 : vector<32x128xf32>
    %cst_53 = arith.constant 2.000000e+00 : f32
    %75 = arith.mulf %60, %cst_53 : f32
    %76 = vector.broadcast %75 : f32 to vector<32x128xf32>
    %77 = arith.subf %76, %67 : vector<32x128xf32>
    %78 = arith.mulf %63, %77 : vector<32x128xf32>
    %79 = arith.maximumf %68, %78 : vector<32x128xf32>
    %cst_54 = arith.constant 1.000000e+00 : f32
    %80 = vector.broadcast %cst_54 : f32 to vector<32x128xf32>
    %81 = arith.cmpf ogt, %72, %80 : vector<32x128xf32>
    %82 = arith.subf %79, %74 : vector<32x128xf32>
    %cst_55 = arith.constant 0.000000e+00 : f32
    %83 = vector.broadcast %cst_55 : f32 to vector<32x128xf32>
    %84 = arith.maximumf %82, %83 : vector<32x128xf32>
    %cst_56 = arith.constant 0.000000e+00 : f32
    %85 = vector.broadcast %cst_56 : f32 to vector<32x128xf32>
    %86 = arith.select %81, %84, %85 : vector<32x128xi1>, vector<32x128xf32>
    %cst_57 = arith.constant 0.000000e+00 : f32
    %87 = vector.broadcast %cst_57 : f32 to vector<32x128xf32>
    %88 = arith.cmpf ogt, %72, %87 : vector<32x128xf32>
    %cst_58 = arith.constant 0.000000e+00 : f32
    %89 = vector.broadcast %cst_58 : f32 to vector<32x128xf32>
    %90 = arith.cmpf oeq, %63, %89 : vector<32x128xf32>
    %cst_59 = arith.constant 2.000000e+00 : f32
    %91 = vector.broadcast %cst_59 : f32 to vector<32x128xf32>
    %92 = arith.addf %70, %91 : vector<32x128xf32>
    %93 = arith.select %90, %92, %67 : vector<32x128xi1>, vector<32x128xf32>
    %cst_60 = arith.constant 0.000000e+00 : f32
    %94 = vector.broadcast %cst_60 : f32 to vector<32x128xf32>
    %95 = arith.select %88, %93, %94 : vector<32x128xi1>, vector<32x128xf32>
    %cst_61 = arith.constant 0.000000e+00 : f32
    %96 = vector.broadcast %cst_61 : f32 to vector<32x128xf32>
    %97 = arith.cmpf ogt, %86, %96 : vector<32x128xf32>
    %cst_62 = arith.constant 2.000000e+00 : f32
    %98 = vector.broadcast %cst_62 : f32 to vector<32x128xf32>
    %99 = arith.addf %95, %98 : vector<32x128xf32>
    %100 = arith.cmpf oeq, %86, %99 : vector<32x128xf32>
    %101 = arith.andi %97, %100 : vector<32x128xi1>
    %102 = arith.extui %101 : vector<32x128xi1> to vector<32x128xi32>
    %103 = arith.sitofp %102 : vector<32x128xi32> to vector<32x128xf32>
    %c1_63 = arith.constant 1 : index
    %c0_64 = arith.constant 0 : index
    %c0_65 = arith.constant 0 : index
    %104 = vector.load %arg8[%c1_63, %c0_64, %c0_65] : memref<8x32x128xf32, #tpu.memory_space<vmem>>, vector<1x32x128xf32>
    %105 = vector.shape_cast %104 : vector<1x32x128xf32> to vector<32x128xf32>
    %106 = vector.shape_cast %103 : vector<32x128xf32> to vector<1x32x128xf32>
    tpu.vector_store %arg8[%c1_63, %c0_64, %c0_65], %106 {strides = array<i32>} : memref<8x32x128xf32, #tpu.memory_space<vmem>>, vector<1x32x128xf32>,
    %c0_66 = arith.constant 0 : index
    %c0_67 = arith.constant 0 : index
    %107 = vector.load %arg9[%c0_66, %c0_67] : memref<32x128xf32, #tpu.memory_space<vmem>>, vector<32x128xf32>
    tpu.vector_store %arg9[%c0_66, %c0_67], %79 {strides = array<i32>} : memref<32x128xf32, #tpu.memory_space<vmem>>, vector<32x128xf32>,
    %c0_68 = arith.constant 0 : index
    %c0_69 = arith.constant 0 : index
    %108 = vector.load %arg10[%c0_68, %c0_69] : memref<32x128xf32, #tpu.memory_space<vmem>>, vector<32x128xf32>
    tpu.vector_store %arg10[%c0_68, %c0_69], %74 {strides = array<i32>} : memref<32x128xf32, #tpu.memory_space<vmem>>, vector<32x128xf32>,
    %c0_70 = arith.constant 0 : index
    %c0_71 = arith.constant 0 : index
    %109 = vector.load %arg11[%c0_70, %c0_71] : memref<32x128xf32, #tpu.memory_space<vmem>>, vector<32x128xf32>
    tpu.vector_store %arg11[%c0_70, %c0_71], %95 {strides = array<i32>} : memref<32x128xf32, #tpu.memory_space<vmem>>, vector<32x128xf32>,
    %c0_72 = arith.constant 0 : index
    %c0_73 = arith.constant 0 : index
    %110 = vector.load %arg12[%c0_72, %c0_73] : memref<32x128xf32, #tpu.memory_space<vmem>>, vector<32x128xf32>
    tpu.vector_store %arg12[%c0_72, %c0_73], %72 {strides = array<i32>} : memref<32x128xf32, #tpu.memory_space<vmem>>, vector<32x128xf32>,
    %c1_i32_74 = arith.constant 1 : i32
    %111 = arith.cmpi slt, %arg1, %c1_i32_74 : i32
    %112 = arith.extui %111 : i1 to i32
    %c0_i32_75 = arith.constant 0 : i32
    %113 = arith.cmpi ne, %112, %c0_i32_75 : i32
    scf.if %113 {
      %c8_i32_86 = arith.constant 8 : i32
      %129 = arith.muli %arg1, %c8_i32_86 : i32
      %c2_i32 = arith.constant 2 : i32
      %130 = arith.addi %129, %c2_i32 : i32
      %131 = arith.sitofp %130 : i32 to f32
      %cst_87 = arith.constant 1.000000e+00 : f32
      %132 = arith.addf %cst_87, %131 : f32
      %c2 = arith.constant 2 : index
      %c0_88 = arith.constant 0 : index
      %c0_89 = arith.constant 0 : index
      %133 = vector.load %arg2[%c2, %c0_88, %c0_89] : memref<8x32x128xi8, #tpu.memory_space<vmem>>, vector<1x32x128xi8>
      %134 = vector.shape_cast %133 : vector<1x32x128xi8> to vector<32x128xi8>
      %135 = arith.sitofp %134 : vector<32x128xi8> to vector<32x128xf32>
      %c2_90 = arith.constant 2 : index
      %c0_91 = arith.constant 0 : index
      %c0_92 = arith.constant 0 : index
      %136 = vector.load %arg7[%c2_90, %c0_91, %c0_92] : memref<8x32x128xf32, #tpu.memory_space<vmem>>, vector<1x32x128xf32>
      %137 = vector.shape_cast %136 : vector<1x32x128xf32> to vector<32x128xf32>
      %cst_93 = arith.constant 0.000000e+00 : f32
      %138 = vector.broadcast %cst_93 : f32 to vector<32x128xf32>
      %139 = arith.maximumf %137, %138 : vector<32x128xf32>
      %c0_94 = arith.constant 0 : index
      %c0_95 = arith.constant 0 : index
      %140 = vector.load %arg9[%c0_94, %c0_95] : memref<32x128xf32, #tpu.memory_space<vmem>>, vector<32x128xf32>
      %c0_96 = arith.constant 0 : index
      %c0_97 = arith.constant 0 : index
      %141 = vector.load %arg10[%c0_96, %c0_97] : memref<32x128xf32, #tpu.memory_space<vmem>>, vector<32x128xf32>
      %c0_98 = arith.constant 0 : index
      %c0_99 = arith.constant 0 : index
      %142 = vector.load %arg11[%c0_98, %c0_99] : memref<32x128xf32, #tpu.memory_space<vmem>>, vector<32x128xf32>
      %c0_100 = arith.constant 0 : index
      %c0_101 = arith.constant 0 : index
      %143 = vector.load %arg12[%c0_100, %c0_101] : memref<32x128xf32, #tpu.memory_space<vmem>>, vector<32x128xf32>
      %144 = arith.addf %143, %135 : vector<32x128xf32>
      %145 = arith.mulf %135, %140 : vector<32x128xf32>
      %146 = arith.maximumf %141, %145 : vector<32x128xf32>
      %cst_102 = arith.constant 2.000000e+00 : f32
      %147 = arith.mulf %132, %cst_102 : f32
      %148 = vector.broadcast %147 : f32 to vector<32x128xf32>
      %149 = arith.subf %148, %139 : vector<32x128xf32>
      %150 = arith.mulf %135, %149 : vector<32x128xf32>
      %151 = arith.maximumf %140, %150 : vector<32x128xf32>
      %cst_103 = arith.constant 1.000000e+00 : f32
      %152 = vector.broadcast %cst_103 : f32 to vector<32x128xf32>
      %153 = arith.cmpf ogt, %144, %152 : vector<32x128xf32>
      %154 = arith.subf %151, %146 : vector<32x128xf32>
      %cst_104 = arith.constant 0.000000e+00 : f32
      %155 = vector.broadcast %cst_104 : f32 to vector<32x128xf32>
      %156 = arith.maximumf %154, %155 : vector<32x128xf32>
      %cst_105 = arith.constant 0.000000e+00 : f32
      %157 = vector.broadcast %cst_105 : f32 to vector<32x128xf32>
      %158 = arith.select %153, %156, %157 : vector<32x128xi1>, vector<32x128xf32>
      %cst_106 = arith.constant 0.000000e+00 : f32
      %159 = vector.broadcast %cst_106 : f32 to vector<32x128xf32>
      %160 = arith.cmpf ogt, %144, %159 : vector<32x128xf32>
      %cst_107 = arith.constant 0.000000e+00 : f32
      %161 = vector.broadcast %cst_107 : f32 to vector<32x128xf32>
      %162 = arith.cmpf oeq, %135, %161 : vector<32x128xf32>
      %cst_108 = arith.constant 2.000000e+00 : f32
      %163 = vector.broadcast %cst_108 : f32 to vector<32x128xf32>
      %164 = arith.addf %142, %163 : vector<32x128xf32>
      %165 = arith.select %162, %164, %139 : vector<32x128xi1>, vector<32x128xf32>
      %cst_109 = arith.constant 0.000000e+00 : f32
      %166 = vector.broadcast %cst_109 : f32 to vector<32x128xf32>
      %167 = arith.select %160, %165, %166 : vector<32x128xi1>, vector<32x128xf32>
      %cst_110 = arith.constant 0.000000e+00 : f32
      %168 = vector.broadcast %cst_110 : f32 to vector<32x128xf32>
      %169 = arith.cmpf ogt, %158, %168 : vector<32x128xf32>
      %cst_111 = arith.constant 2.000000e+00 : f32
      %170 = vector.broadcast %cst_111 : f32 to vector<32x128xf32>
      %171 = arith.addf %167, %170 : vector<32x128xf32>
      %172 = arith.cmpf oeq, %158, %171 : vector<32x128xf32>
      %173 = arith.andi %169, %172 : vector<32x128xi1>
      %174 = arith.extui %173 : vector<32x128xi1> to vector<32x128xi32>
      %175 = arith.sitofp %174 : vector<32x128xi32> to vector<32x128xf32>
      %c2_112 = arith.constant 2 : index
      %c0_113 = arith.constant 0 : index
      %c0_114 = arith.constant 0 : index
      %176 = vector.load %arg8[%c2_112, %c0_113, %c0_114] : memref<8x32x128xf32, #tpu.memory_space<vmem>>, vector<1x32x128xf32>
      %177 = vector.shape_cast %176 : vector<1x32x128xf32> to vector<32x128xf32>
      %178 = vector.shape_cast %175 : vector<32x128xf32> to vector<1x32x128xf32>
      tpu.vector_store %arg8[%c2_112, %c0_113, %c0_114], %178 {strides = array<i32>} : memref<8x32x128xf32, #tpu.memory_space<vmem>>, vector<1x32x128xf32>,
      %c0_115 = arith.constant 0 : index
      %c0_116 = arith.constant 0 : index
      %179 = vector.load %arg9[%c0_115, %c0_116] : memref<32x128xf32, #tpu.memory_space<vmem>>, vector<32x128xf32>
      tpu.vector_store %arg9[%c0_115, %c0_116], %151 {strides = array<i32>} : memref<32x128xf32, #tpu.memory_space<vmem>>, vector<32x128xf32>,
      %c0_117 = arith.constant 0 : index
      %c0_118 = arith.constant 0 : index
      %180 = vector.load %arg10[%c0_117, %c0_118] : memref<32x128xf32, #tpu.memory_space<vmem>>, vector<32x128xf32>
      tpu.vector_store %arg10[%c0_117, %c0_118], %146 {strides = array<i32>} : memref<32x128xf32, #tpu.memory_space<vmem>>, vector<32x128xf32>,
      %c0_119 = arith.constant 0 : index
      %c0_120 = arith.constant 0 : index
      %181 = vector.load %arg11[%c0_119, %c0_120] : memref<32x128xf32, #tpu.memory_space<vmem>>, vector<32x128xf32>
      tpu.vector_store %arg11[%c0_119, %c0_120], %167 {strides = array<i32>} : memref<32x128xf32, #tpu.memory_space<vmem>>, vector<32x128xf32>,
      %c0_121 = arith.constant 0 : index
      %c0_122 = arith.constant 0 : index
      %182 = vector.load %arg12[%c0_121, %c0_122] : memref<32x128xf32, #tpu.memory_space<vmem>>, vector<32x128xf32>
      tpu.vector_store %arg12[%c0_121, %c0_122], %144 {strides = array<i32>} : memref<32x128xf32, #tpu.memory_space<vmem>>, vector<32x128xf32>,
    } else {
    }
    %c1_i32_76 = arith.constant 1 : i32
    %114 = arith.cmpi slt, %arg1, %c1_i32_76 : i32
    %115 = arith.extui %114 : i1 to i32
    %c0_i32_77 = arith.constant 0 : i32
    %116 = arith.cmpi ne, %115, %c0_i32_77 : i32
    scf.if %116 {
      %c8_i32_86 = arith.constant 8 : i32
      %129 = arith.muli %arg1, %c8_i32_86 : i32
      %c3_i32 = arith.constant 3 : i32
      %130 = arith.addi %129, %c3_i32 : i32
      %131 = arith.sitofp %130 : i32 to f32
      %cst_87 = arith.constant 1.000000e+00 : f32
      %132 = arith.addf %cst_87, %131 : f32
      %c3 = arith.constant 3 : index
      %c0_88 = arith.constant 0 : index
      %c0_89 = arith.constant 0 : index
      %133 = vector.load %arg2[%c3, %c0_88, %c0_89] : memref<8x32x128xi8, #tpu.memory_space<vmem>>, vector<1x32x128xi8>
      %134 = vector.shape_cast %133 : vector<1x32x128xi8> to vector<32x128xi8>
      %135 = arith.sitofp %134 : vector<32x128xi8> to vector<32x128xf32>
      %c3_90 = arith.constant 3 : index
      %c0_91 = arith.constant 0 : index
      %c0_92 = arith.constant 0 : index
      %136 = vector.load %arg7[%c3_90, %c0_91, %c0_92] : memref<8x32x128xf32, #tpu.memory_space<vmem>>, vector<1x32x128xf32>
      %137 = vector.shape_cast %136 : vector<1x32x128xf32> to vector<32x128xf32>
      %cst_93 = arith.constant 0.000000e+00 : f32
      %138 = vector.broadcast %cst_93 : f32 to vector<32x128xf32>
      %139 = arith.maximumf %137, %138 : vector<32x128xf32>
      %c0_94 = arith.constant 0 : index
      %c0_95 = arith.constant 0 : index
      %140 = vector.load %arg9[%c0_94, %c0_95] : memref<32x128xf32, #tpu.memory_space<vmem>>, vector<32x128xf32>
      %c0_96 = arith.constant 0 : index
      %c0_97 = arith.constant 0 : index
      %141 = vector.load %arg10[%c0_96, %c0_97] : memref<32x128xf32, #tpu.memory_space<vmem>>, vector<32x128xf32>
      %c0_98 = arith.constant 0 : index
      %c0_99 = arith.constant 0 : index
      %142 = vector.load %arg11[%c0_98, %c0_99] : memref<32x128xf32, #tpu.memory_space<vmem>>, vector<32x128xf32>
      %c0_100 = arith.constant 0 : index
      %c0_101 = arith.constant 0 : index
      %143 = vector.load %arg12[%c0_100, %c0_101] : memref<32x128xf32, #tpu.memory_space<vmem>>, vector<32x128xf32>
      %144 = arith.addf %143, %135 : vector<32x128xf32>
      %145 = arith.mulf %135, %140 : vector<32x128xf32>
      %146 = arith.maximumf %141, %145 : vector<32x128xf32>
      %cst_102 = arith.constant 2.000000e+00 : f32
      %147 = arith.mulf %132, %cst_102 : f32
      %148 = vector.broadcast %147 : f32 to vector<32x128xf32>
      %149 = arith.subf %148, %139 : vector<32x128xf32>
      %150 = arith.mulf %135, %149 : vector<32x128xf32>
      %151 = arith.maximumf %140, %150 : vector<32x128xf32>
      %cst_103 = arith.constant 1.000000e+00 : f32
      %152 = vector.broadcast %cst_103 : f32 to vector<32x128xf32>
      %153 = arith.cmpf ogt, %144, %152 : vector<32x128xf32>
      %154 = arith.subf %151, %146 : vector<32x128xf32>
      %cst_104 = arith.constant 0.000000e+00 : f32
      %155 = vector.broadcast %cst_104 : f32 to vector<32x128xf32>
      %156 = arith.maximumf %154, %155 : vector<32x128xf32>
      %cst_105 = arith.constant 0.000000e+00 : f32
      %157 = vector.broadcast %cst_105 : f32 to vector<32x128xf32>
      %158 = arith.select %153, %156, %157 : vector<32x128xi1>, vector<32x128xf32>
      %cst_106 = arith.constant 0.000000e+00 : f32
      %159 = vector.broadcast %cst_106 : f32 to vector<32x128xf32>
      %160 = arith.cmpf ogt, %144, %159 : vector<32x128xf32>
      %cst_107 = arith.constant 0.000000e+00 : f32
      %161 = vector.broadcast %cst_107 : f32 to vector<32x128xf32>
      %162 = arith.cmpf oeq, %135, %161 : vector<32x128xf32>
      %cst_108 = arith.constant 2.000000e+00 : f32
      %163 = vector.broadcast %cst_108 : f32 to vector<32x128xf32>
      %164 = arith.addf %142, %163 : vector<32x128xf32>
      %165 = arith.select %162, %164, %139 : vector<32x128xi1>, vector<32x128xf32>
      %cst_109 = arith.constant 0.000000e+00 : f32
      %166 = vector.broadcast %cst_109 : f32 to vector<32x128xf32>
      %167 = arith.select %160, %165, %166 : vector<32x128xi1>, vector<32x128xf32>
      %cst_110 = arith.constant 0.000000e+00 : f32
      %168 = vector.broadcast %cst_110 : f32 to vector<32x128xf32>
      %169 = arith.cmpf ogt, %158, %168 : vector<32x128xf32>
      %cst_111 = arith.constant 2.000000e+00 : f32
      %170 = vector.broadcast %cst_111 : f32 to vector<32x128xf32>
      %171 = arith.addf %167, %170 : vector<32x128xf32>
      %172 = arith.cmpf oeq, %158, %171 : vector<32x128xf32>
      %173 = arith.andi %169, %172 : vector<32x128xi1>
      %174 = arith.extui %173 : vector<32x128xi1> to vector<32x128xi32>
      %175 = arith.sitofp %174 : vector<32x128xi32> to vector<32x128xf32>
      %c3_112 = arith.constant 3 : index
      %c0_113 = arith.constant 0 : index
      %c0_114 = arith.constant 0 : index
      %176 = vector.load %arg8[%c3_112, %c0_113, %c0_114] : memref<8x32x128xf32, #tpu.memory_space<vmem>>, vector<1x32x128xf32>
      %177 = vector.shape_cast %176 : vector<1x32x128xf32> to vector<32x128xf32>
      %178 = vector.shape_cast %175 : vector<32x128xf32> to vector<1x32x128xf32>
      tpu.vector_store %arg8[%c3_112, %c0_113, %c0_114], %178 {strides = array<i32>} : memref<8x32x128xf32, #tpu.memory_space<vmem>>, vector<1x32x128xf32>,
      %c0_115 = arith.constant 0 : index
      %c0_116 = arith.constant 0 : index
      %179 = vector.load %arg9[%c0_115, %c0_116] : memref<32x128xf32, #tpu.memory_space<vmem>>, vector<32x128xf32>
      tpu.vector_store %arg9[%c0_115, %c0_116], %151 {strides = array<i32>} : memref<32x128xf32, #tpu.memory_space<vmem>>, vector<32x128xf32>,
      %c0_117 = arith.constant 0 : index
      %c0_118 = arith.constant 0 : index
      %180 = vector.load %arg10[%c0_117, %c0_118] : memref<32x128xf32, #tpu.memory_space<vmem>>, vector<32x128xf32>
      tpu.vector_store %arg10[%c0_117, %c0_118], %146 {strides = array<i32>} : memref<32x128xf32, #tpu.memory_space<vmem>>, vector<32x128xf32>,
      %c0_119 = arith.constant 0 : index
      %c0_120 = arith.constant 0 : index
      %181 = vector.load %arg11[%c0_119, %c0_120] : memref<32x128xf32, #tpu.memory_space<vmem>>, vector<32x128xf32>
      tpu.vector_store %arg11[%c0_119, %c0_120], %167 {strides = array<i32>} : memref<32x128xf32, #tpu.memory_space<vmem>>, vector<32x128xf32>,
      %c0_121 = arith.constant 0 : index
      %c0_122 = arith.constant 0 : index
      %182 = vector.load %arg12[%c0_121, %c0_122] : memref<32x128xf32, #tpu.memory_space<vmem>>, vector<32x128xf32>
      tpu.vector_store %arg12[%c0_121, %c0_122], %144 {strides = array<i32>} : memref<32x128xf32, #tpu.memory_space<vmem>>, vector<32x128xf32>,
    } else {
    }
    %c1_i32_78 = arith.constant 1 : i32
    %117 = arith.cmpi slt, %arg1, %c1_i32_78 : i32
    %118 = arith.extui %117 : i1 to i32
    %c0_i32_79 = arith.constant 0 : i32
    %119 = arith.cmpi ne, %118, %c0_i32_79 : i32
    scf.if %119 {
      %c8_i32_86 = arith.constant 8 : i32
      %129 = arith.muli %arg1, %c8_i32_86 : i32
      %c4_i32 = arith.constant 4 : i32
      %130 = arith.addi %129, %c4_i32 : i32
      %131 = arith.sitofp %130 : i32 to f32
      %cst_87 = arith.constant 1.000000e+00 : f32
      %132 = arith.addf %cst_87, %131 : f32
      %c4 = arith.constant 4 : index
      %c0_88 = arith.constant 0 : index
      %c0_89 = arith.constant 0 : index
      %133 = vector.load %arg2[%c4, %c0_88, %c0_89] : memref<8x32x128xi8, #tpu.memory_space<vmem>>, vector<1x32x128xi8>
      %134 = vector.shape_cast %133 : vector<1x32x128xi8> to vector<32x128xi8>
      %135 = arith.sitofp %134 : vector<32x128xi8> to vector<32x128xf32>
      %c4_90 = arith.constant 4 : index
      %c0_91 = arith.constant 0 : index
      %c0_92 = arith.constant 0 : index
      %136 = vector.load %arg7[%c4_90, %c0_91, %c0_92] : memref<8x32x128xf32, #tpu.memory_space<vmem>>, vector<1x32x128xf32>
      %137 = vector.shape_cast %136 : vector<1x32x128xf32> to vector<32x128xf32>
      %cst_93 = arith.constant 0.000000e+00 : f32
      %138 = vector.broadcast %cst_93 : f32 to vector<32x128xf32>
      %139 = arith.maximumf %137, %138 : vector<32x128xf32>
      %c0_94 = arith.constant 0 : index
      %c0_95 = arith.constant 0 : index
      %140 = vector.load %arg9[%c0_94, %c0_95] : memref<32x128xf32, #tpu.memory_space<vmem>>, vector<32x128xf32>
      %c0_96 = arith.constant 0 : index
      %c0_97 = arith.constant 0 : index
      %141 = vector.load %arg10[%c0_96, %c0_97] : memref<32x128xf32, #tpu.memory_space<vmem>>, vector<32x128xf32>
      %c0_98 = arith.constant 0 : index
      %c0_99 = arith.constant 0 : index
      %142 = vector.load %arg11[%c0_98, %c0_99] : memref<32x128xf32, #tpu.memory_space<vmem>>, vector<32x128xf32>
      %c0_100 = arith.constant 0 : index
      %c0_101 = arith.constant 0 : index
      %143 = vector.load %arg12[%c0_100, %c0_101] : memref<32x128xf32, #tpu.memory_space<vmem>>, vector<32x128xf32>
      %144 = arith.addf %143, %135 : vector<32x128xf32>
      %145 = arith.mulf %135, %140 : vector<32x128xf32>
      %146 = arith.maximumf %141, %145 : vector<32x128xf32>
      %cst_102 = arith.constant 2.000000e+00 : f32
      %147 = arith.mulf %132, %cst_102 : f32
      %148 = vector.broadcast %147 : f32 to vector<32x128xf32>
      %149 = arith.subf %148, %139 : vector<32x128xf32>
      %150 = arith.mulf %135, %149 : vector<32x128xf32>
      %151 = arith.maximumf %140, %150 : vector<32x128xf32>
      %cst_103 = arith.constant 1.000000e+00 : f32
      %152 = vector.broadcast %cst_103 : f32 to vector<32x128xf32>
      %153 = arith.cmpf ogt, %144, %152 : vector<32x128xf32>
      %154 = arith.subf %151, %146 : vector<32x128xf32>
      %cst_104 = arith.constant 0.000000e+00 : f32
      %155 = vector.broadcast %cst_104 : f32 to vector<32x128xf32>
      %156 = arith.maximumf %154, %155 : vector<32x128xf32>
      %cst_105 = arith.constant 0.000000e+00 : f32
      %157 = vector.broadcast %cst_105 : f32 to vector<32x128xf32>
      %158 = arith.select %153, %156, %157 : vector<32x128xi1>, vector<32x128xf32>
      %cst_106 = arith.constant 0.000000e+00 : f32
      %159 = vector.broadcast %cst_106 : f32 to vector<32x128xf32>
      %160 = arith.cmpf ogt, %144, %159 : vector<32x128xf32>
      %cst_107 = arith.constant 0.000000e+00 : f32
      %161 = vector.broadcast %cst_107 : f32 to vector<32x128xf32>
      %162 = arith.cmpf oeq, %135, %161 : vector<32x128xf32>
      %cst_108 = arith.constant 2.000000e+00 : f32
      %163 = vector.broadcast %cst_108 : f32 to vector<32x128xf32>
      %164 = arith.addf %142, %163 : vector<32x128xf32>
      %165 = arith.select %162, %164, %139 : vector<32x128xi1>, vector<32x128xf32>
      %cst_109 = arith.constant 0.000000e+00 : f32
      %166 = vector.broadcast %cst_109 : f32 to vector<32x128xf32>
      %167 = arith.select %160, %165, %166 : vector<32x128xi1>, vector<32x128xf32>
      %cst_110 = arith.constant 0.000000e+00 : f32
      %168 = vector.broadcast %cst_110 : f32 to vector<32x128xf32>
      %169 = arith.cmpf ogt, %158, %168 : vector<32x128xf32>
      %cst_111 = arith.constant 2.000000e+00 : f32
      %170 = vector.broadcast %cst_111 : f32 to vector<32x128xf32>
      %171 = arith.addf %167, %170 : vector<32x128xf32>
      %172 = arith.cmpf oeq, %158, %171 : vector<32x128xf32>
      %173 = arith.andi %169, %172 : vector<32x128xi1>
      %174 = arith.extui %173 : vector<32x128xi1> to vector<32x128xi32>
      %175 = arith.sitofp %174 : vector<32x128xi32> to vector<32x128xf32>
      %c4_112 = arith.constant 4 : index
      %c0_113 = arith.constant 0 : index
      %c0_114 = arith.constant 0 : index
      %176 = vector.load %arg8[%c4_112, %c0_113, %c0_114] : memref<8x32x128xf32, #tpu.memory_space<vmem>>, vector<1x32x128xf32>
      %177 = vector.shape_cast %176 : vector<1x32x128xf32> to vector<32x128xf32>
      %178 = vector.shape_cast %175 : vector<32x128xf32> to vector<1x32x128xf32>
      tpu.vector_store %arg8[%c4_112, %c0_113, %c0_114], %178 {strides = array<i32>} : memref<8x32x128xf32, #tpu.memory_space<vmem>>, vector<1x32x128xf32>,
      %c0_115 = arith.constant 0 : index
      %c0_116 = arith.constant 0 : index
      %179 = vector.load %arg9[%c0_115, %c0_116] : memref<32x128xf32, #tpu.memory_space<vmem>>, vector<32x128xf32>
      tpu.vector_store %arg9[%c0_115, %c0_116], %151 {strides = array<i32>} : memref<32x128xf32, #tpu.memory_space<vmem>>, vector<32x128xf32>,
      %c0_117 = arith.constant 0 : index
      %c0_118 = arith.constant 0 : index
      %180 = vector.load %arg10[%c0_117, %c0_118] : memref<32x128xf32, #tpu.memory_space<vmem>>, vector<32x128xf32>
      tpu.vector_store %arg10[%c0_117, %c0_118], %146 {strides = array<i32>} : memref<32x128xf32, #tpu.memory_space<vmem>>, vector<32x128xf32>,
      %c0_119 = arith.constant 0 : index
      %c0_120 = arith.constant 0 : index
      %181 = vector.load %arg11[%c0_119, %c0_120] : memref<32x128xf32, #tpu.memory_space<vmem>>, vector<32x128xf32>
      tpu.vector_store %arg11[%c0_119, %c0_120], %167 {strides = array<i32>} : memref<32x128xf32, #tpu.memory_space<vmem>>, vector<32x128xf32>,
      %c0_121 = arith.constant 0 : index
      %c0_122 = arith.constant 0 : index
      %182 = vector.load %arg12[%c0_121, %c0_122] : memref<32x128xf32, #tpu.memory_space<vmem>>, vector<32x128xf32>
      tpu.vector_store %arg12[%c0_121, %c0_122], %144 {strides = array<i32>} : memref<32x128xf32, #tpu.memory_space<vmem>>, vector<32x128xf32>,
    } else {
    }
    %c1_i32_80 = arith.constant 1 : i32
    %120 = arith.cmpi slt, %arg1, %c1_i32_80 : i32
    %121 = arith.extui %120 : i1 to i32
    %c0_i32_81 = arith.constant 0 : i32
    %122 = arith.cmpi ne, %121, %c0_i32_81 : i32
    scf.if %122 {
      %c8_i32_86 = arith.constant 8 : i32
      %129 = arith.muli %arg1, %c8_i32_86 : i32
      %c5_i32 = arith.constant 5 : i32
      %130 = arith.addi %129, %c5_i32 : i32
      %131 = arith.sitofp %130 : i32 to f32
      %cst_87 = arith.constant 1.000000e+00 : f32
      %132 = arith.addf %cst_87, %131 : f32
      %c5 = arith.constant 5 : index
      %c0_88 = arith.constant 0 : index
      %c0_89 = arith.constant 0 : index
      %133 = vector.load %arg2[%c5, %c0_88, %c0_89] : memref<8x32x128xi8, #tpu.memory_space<vmem>>, vector<1x32x128xi8>
      %134 = vector.shape_cast %133 : vector<1x32x128xi8> to vector<32x128xi8>
      %135 = arith.sitofp %134 : vector<32x128xi8> to vector<32x128xf32>
      %c5_90 = arith.constant 5 : index
      %c0_91 = arith.constant 0 : index
      %c0_92 = arith.constant 0 : index
      %136 = vector.load %arg7[%c5_90, %c0_91, %c0_92] : memref<8x32x128xf32, #tpu.memory_space<vmem>>, vector<1x32x128xf32>
      %137 = vector.shape_cast %136 : vector<1x32x128xf32> to vector<32x128xf32>
      %cst_93 = arith.constant 0.000000e+00 : f32
      %138 = vector.broadcast %cst_93 : f32 to vector<32x128xf32>
      %139 = arith.maximumf %137, %138 : vector<32x128xf32>
      %c0_94 = arith.constant 0 : index
      %c0_95 = arith.constant 0 : index
      %140 = vector.load %arg9[%c0_94, %c0_95] : memref<32x128xf32, #tpu.memory_space<vmem>>, vector<32x128xf32>
      %c0_96 = arith.constant 0 : index
      %c0_97 = arith.constant 0 : index
      %141 = vector.load %arg10[%c0_96, %c0_97] : memref<32x128xf32, #tpu.memory_space<vmem>>, vector<32x128xf32>
      %c0_98 = arith.constant 0 : index
      %c0_99 = arith.constant 0 : index
      %142 = vector.load %arg11[%c0_98, %c0_99] : memref<32x128xf32, #tpu.memory_space<vmem>>, vector<32x128xf32>
      %c0_100 = arith.constant 0 : index
      %c0_101 = arith.constant 0 : index
      %143 = vector.load %arg12[%c0_100, %c0_101] : memref<32x128xf32, #tpu.memory_space<vmem>>, vector<32x128xf32>
      %144 = arith.addf %143, %135 : vector<32x128xf32>
      %145 = arith.mulf %135, %140 : vector<32x128xf32>
      %146 = arith.maximumf %141, %145 : vector<32x128xf32>
      %cst_102 = arith.constant 2.000000e+00 : f32
      %147 = arith.mulf %132, %cst_102 : f32
      %148 = vector.broadcast %147 : f32 to vector<32x128xf32>
      %149 = arith.subf %148, %139 : vector<32x128xf32>
      %150 = arith.mulf %135, %149 : vector<32x128xf32>
      %151 = arith.maximumf %140, %150 : vector<32x128xf32>
      %cst_103 = arith.constant 1.000000e+00 : f32
      %152 = vector.broadcast %cst_103 : f32 to vector<32x128xf32>
      %153 = arith.cmpf ogt, %144, %152 : vector<32x128xf32>
      %154 = arith.subf %151, %146 : vector<32x128xf32>
      %cst_104 = arith.constant 0.000000e+00 : f32
      %155 = vector.broadcast %cst_104 : f32 to vector<32x128xf32>
      %156 = arith.maximumf %154, %155 : vector<32x128xf32>
      %cst_105 = arith.constant 0.000000e+00 : f32
      %157 = vector.broadcast %cst_105 : f32 to vector<32x128xf32>
      %158 = arith.select %153, %156, %157 : vector<32x128xi1>, vector<32x128xf32>
      %cst_106 = arith.constant 0.000000e+00 : f32
      %159 = vector.broadcast %cst_106 : f32 to vector<32x128xf32>
      %160 = arith.cmpf ogt, %144, %159 : vector<32x128xf32>
      %cst_107 = arith.constant 0.000000e+00 : f32
      %161 = vector.broadcast %cst_107 : f32 to vector<32x128xf32>
      %162 = arith.cmpf oeq, %135, %161 : vector<32x128xf32>
      %cst_108 = arith.constant 2.000000e+00 : f32
      %163 = vector.broadcast %cst_108 : f32 to vector<32x128xf32>
      %164 = arith.addf %142, %163 : vector<32x128xf32>
      %165 = arith.select %162, %164, %139 : vector<32x128xi1>, vector<32x128xf32>
      %cst_109 = arith.constant 0.000000e+00 : f32
      %166 = vector.broadcast %cst_109 : f32 to vector<32x128xf32>
      %167 = arith.select %160, %165, %166 : vector<32x128xi1>, vector<32x128xf32>
      %cst_110 = arith.constant 0.000000e+00 : f32
      %168 = vector.broadcast %cst_110 : f32 to vector<32x128xf32>
      %169 = arith.cmpf ogt, %158, %168 : vector<32x128xf32>
      %cst_111 = arith.constant 2.000000e+00 : f32
      %170 = vector.broadcast %cst_111 : f32 to vector<32x128xf32>
      %171 = arith.addf %167, %170 : vector<32x128xf32>
      %172 = arith.cmpf oeq, %158, %171 : vector<32x128xf32>
      %173 = arith.andi %169, %172 : vector<32x128xi1>
      %174 = arith.extui %173 : vector<32x128xi1> to vector<32x128xi32>
      %175 = arith.sitofp %174 : vector<32x128xi32> to vector<32x128xf32>
      %c5_112 = arith.constant 5 : index
      %c0_113 = arith.constant 0 : index
      %c0_114 = arith.constant 0 : index
      %176 = vector.load %arg8[%c5_112, %c0_113, %c0_114] : memref<8x32x128xf32, #tpu.memory_space<vmem>>, vector<1x32x128xf32>
      %177 = vector.shape_cast %176 : vector<1x32x128xf32> to vector<32x128xf32>
      %178 = vector.shape_cast %175 : vector<32x128xf32> to vector<1x32x128xf32>
      tpu.vector_store %arg8[%c5_112, %c0_113, %c0_114], %178 {strides = array<i32>} : memref<8x32x128xf32, #tpu.memory_space<vmem>>, vector<1x32x128xf32>,
      %c0_115 = arith.constant 0 : index
      %c0_116 = arith.constant 0 : index
      %179 = vector.load %arg9[%c0_115, %c0_116] : memref<32x128xf32, #tpu.memory_space<vmem>>, vector<32x128xf32>
      tpu.vector_store %arg9[%c0_115, %c0_116], %151 {strides = array<i32>} : memref<32x128xf32, #tpu.memory_space<vmem>>, vector<32x128xf32>,
      %c0_117 = arith.constant 0 : index
      %c0_118 = arith.constant 0 : index
      %180 = vector.load %arg10[%c0_117, %c0_118] : memref<32x128xf32, #tpu.memory_space<vmem>>, vector<32x128xf32>
      tpu.vector_store %arg10[%c0_117, %c0_118], %146 {strides = array<i32>} : memref<32x128xf32, #tpu.memory_space<vmem>>, vector<32x128xf32>,
      %c0_119 = arith.constant 0 : index
      %c0_120 = arith.constant 0 : index
      %181 = vector.load %arg11[%c0_119, %c0_120] : memref<32x128xf32, #tpu.memory_space<vmem>>, vector<32x128xf32>
      tpu.vector_store %arg11[%c0_119, %c0_120], %167 {strides = array<i32>} : memref<32x128xf32, #tpu.memory_space<vmem>>, vector<32x128xf32>,
      %c0_121 = arith.constant 0 : index
      %c0_122 = arith.constant 0 : index
      %182 = vector.load %arg12[%c0_121, %c0_122] : memref<32x128xf32, #tpu.memory_space<vmem>>, vector<32x128xf32>
      tpu.vector_store %arg12[%c0_121, %c0_122], %144 {strides = array<i32>} : memref<32x128xf32, #tpu.memory_space<vmem>>, vector<32x128xf32>,
    } else {
    }
    %c1_i32_82 = arith.constant 1 : i32
    %123 = arith.cmpi slt, %arg1, %c1_i32_82 : i32
    %124 = arith.extui %123 : i1 to i32
    %c0_i32_83 = arith.constant 0 : i32
    %125 = arith.cmpi ne, %124, %c0_i32_83 : i32
    scf.if %125 {
      %c8_i32_86 = arith.constant 8 : i32
      %129 = arith.muli %arg1, %c8_i32_86 : i32
      %c6_i32 = arith.constant 6 : i32
      %130 = arith.addi %129, %c6_i32 : i32
      %131 = arith.sitofp %130 : i32 to f32
      %cst_87 = arith.constant 1.000000e+00 : f32
      %132 = arith.addf %cst_87, %131 : f32
      %c6 = arith.constant 6 : index
      %c0_88 = arith.constant 0 : index
      %c0_89 = arith.constant 0 : index
      %133 = vector.load %arg2[%c6, %c0_88, %c0_89] : memref<8x32x128xi8, #tpu.memory_space<vmem>>, vector<1x32x128xi8>
      %134 = vector.shape_cast %133 : vector<1x32x128xi8> to vector<32x128xi8>
      %135 = arith.sitofp %134 : vector<32x128xi8> to vector<32x128xf32>
      %c6_90 = arith.constant 6 : index
      %c0_91 = arith.constant 0 : index
      %c0_92 = arith.constant 0 : index
      %136 = vector.load %arg7[%c6_90, %c0_91, %c0_92] : memref<8x32x128xf32, #tpu.memory_space<vmem>>, vector<1x32x128xf32>
      %137 = vector.shape_cast %136 : vector<1x32x128xf32> to vector<32x128xf32>
      %cst_93 = arith.constant 0.000000e+00 : f32
      %138 = vector.broadcast %cst_93 : f32 to vector<32x128xf32>
      %139 = arith.maximumf %137, %138 : vector<32x128xf32>
      %c0_94 = arith.constant 0 : index
      %c0_95 = arith.constant 0 : index
      %140 = vector.load %arg9[%c0_94, %c0_95] : memref<32x128xf32, #tpu.memory_space<vmem>>, vector<32x128xf32>
      %c0_96 = arith.constant 0 : index
      %c0_97 = arith.constant 0 : index
      %141 = vector.load %arg10[%c0_96, %c0_97] : memref<32x128xf32, #tpu.memory_space<vmem>>, vector<32x128xf32>
      %c0_98 = arith.constant 0 : index
      %c0_99 = arith.constant 0 : index
      %142 = vector.load %arg11[%c0_98, %c0_99] : memref<32x128xf32, #tpu.memory_space<vmem>>, vector<32x128xf32>
      %c0_100 = arith.constant 0 : index
      %c0_101 = arith.constant 0 : index
      %143 = vector.load %arg12[%c0_100, %c0_101] : memref<32x128xf32, #tpu.memory_space<vmem>>, vector<32x128xf32>
      %144 = arith.addf %143, %135 : vector<32x128xf32>
      %145 = arith.mulf %135, %140 : vector<32x128xf32>
      %146 = arith.maximumf %141, %145 : vector<32x128xf32>
      %cst_102 = arith.constant 2.000000e+00 : f32
      %147 = arith.mulf %132, %cst_102 : f32
      %148 = vector.broadcast %147 : f32 to vector<32x128xf32>
      %149 = arith.subf %148, %139 : vector<32x128xf32>
      %150 = arith.mulf %135, %149 : vector<32x128xf32>
      %151 = arith.maximumf %140, %150 : vector<32x128xf32>
      %cst_103 = arith.constant 1.000000e+00 : f32
      %152 = vector.broadcast %cst_103 : f32 to vector<32x128xf32>
      %153 = arith.cmpf ogt, %144, %152 : vector<32x128xf32>
      %154 = arith.subf %151, %146 : vector<32x128xf32>
      %cst_104 = arith.constant 0.000000e+00 : f32
      %155 = vector.broadcast %cst_104 : f32 to vector<32x128xf32>
      %156 = arith.maximumf %154, %155 : vector<32x128xf32>
      %cst_105 = arith.constant 0.000000e+00 : f32
      %157 = vector.broadcast %cst_105 : f32 to vector<32x128xf32>
      %158 = arith.select %153, %156, %157 : vector<32x128xi1>, vector<32x128xf32>
      %cst_106 = arith.constant 0.000000e+00 : f32
      %159 = vector.broadcast %cst_106 : f32 to vector<32x128xf32>
      %160 = arith.cmpf ogt, %144, %159 : vector<32x128xf32>
      %cst_107 = arith.constant 0.000000e+00 : f32
      %161 = vector.broadcast %cst_107 : f32 to vector<32x128xf32>
      %162 = arith.cmpf oeq, %135, %161 : vector<32x128xf32>
      %cst_108 = arith.constant 2.000000e+00 : f32
      %163 = vector.broadcast %cst_108 : f32 to vector<32x128xf32>
      %164 = arith.addf %142, %163 : vector<32x128xf32>
      %165 = arith.select %162, %164, %139 : vector<32x128xi1>, vector<32x128xf32>
      %cst_109 = arith.constant 0.000000e+00 : f32
      %166 = vector.broadcast %cst_109 : f32 to vector<32x128xf32>
      %167 = arith.select %160, %165, %166 : vector<32x128xi1>, vector<32x128xf32>
      %cst_110 = arith.constant 0.000000e+00 : f32
      %168 = vector.broadcast %cst_110 : f32 to vector<32x128xf32>
      %169 = arith.cmpf ogt, %158, %168 : vector<32x128xf32>
      %cst_111 = arith.constant 2.000000e+00 : f32
      %170 = vector.broadcast %cst_111 : f32 to vector<32x128xf32>
      %171 = arith.addf %167, %170 : vector<32x128xf32>
      %172 = arith.cmpf oeq, %158, %171 : vector<32x128xf32>
      %173 = arith.andi %169, %172 : vector<32x128xi1>
      %174 = arith.extui %173 : vector<32x128xi1> to vector<32x128xi32>
      %175 = arith.sitofp %174 : vector<32x128xi32> to vector<32x128xf32>
      %c6_112 = arith.constant 6 : index
      %c0_113 = arith.constant 0 : index
      %c0_114 = arith.constant 0 : index
      %176 = vector.load %arg8[%c6_112, %c0_113, %c0_114] : memref<8x32x128xf32, #tpu.memory_space<vmem>>, vector<1x32x128xf32>
      %177 = vector.shape_cast %176 : vector<1x32x128xf32> to vector<32x128xf32>
      %178 = vector.shape_cast %175 : vector<32x128xf32> to vector<1x32x128xf32>
      tpu.vector_store %arg8[%c6_112, %c0_113, %c0_114], %178 {strides = array<i32>} : memref<8x32x128xf32, #tpu.memory_space<vmem>>, vector<1x32x128xf32>,
      %c0_115 = arith.constant 0 : index
      %c0_116 = arith.constant 0 : index
      %179 = vector.load %arg9[%c0_115, %c0_116] : memref<32x128xf32, #tpu.memory_space<vmem>>, vector<32x128xf32>
      tpu.vector_store %arg9[%c0_115, %c0_116], %151 {strides = array<i32>} : memref<32x128xf32, #tpu.memory_space<vmem>>, vector<32x128xf32>,
      %c0_117 = arith.constant 0 : index
      %c0_118 = arith.constant 0 : index
      %180 = vector.load %arg10[%c0_117, %c0_118] : memref<32x128xf32, #tpu.memory_space<vmem>>, vector<32x128xf32>
      tpu.vector_store %arg10[%c0_117, %c0_118], %146 {strides = array<i32>} : memref<32x128xf32, #tpu.memory_space<vmem>>, vector<32x128xf32>,
      %c0_119 = arith.constant 0 : index
      %c0_120 = arith.constant 0 : index
      %181 = vector.load %arg11[%c0_119, %c0_120] : memref<32x128xf32, #tpu.memory_space<vmem>>, vector<32x128xf32>
      tpu.vector_store %arg11[%c0_119, %c0_120], %167 {strides = array<i32>} : memref<32x128xf32, #tpu.memory_space<vmem>>, vector<32x128xf32>,
      %c0_121 = arith.constant 0 : index
      %c0_122 = arith.constant 0 : index
      %182 = vector.load %arg12[%c0_121, %c0_122] : memref<32x128xf32, #tpu.memory_space<vmem>>, vector<32x128xf32>
      tpu.vector_store %arg12[%c0_121, %c0_122], %144 {strides = array<i32>} : memref<32x128xf32, #tpu.memory_space<vmem>>, vector<32x128xf32>,
    } else {
    }
    %c1_i32_84 = arith.constant 1 : i32
    %126 = arith.cmpi slt, %arg1, %c1_i32_84 : i32
    %127 = arith.extui %126 : i1 to i32
    %c0_i32_85 = arith.constant 0 : i32
    %128 = arith.cmpi ne, %127, %c0_i32_85 : i32
    scf.if %128 {
      %c8_i32_86 = arith.constant 8 : i32
      %129 = arith.muli %arg1, %c8_i32_86 : i32
      %c7_i32 = arith.constant 7 : i32
      %130 = arith.addi %129, %c7_i32 : i32
      %131 = arith.sitofp %130 : i32 to f32
      %cst_87 = arith.constant 1.000000e+00 : f32
      %132 = arith.addf %cst_87, %131 : f32
      %c7 = arith.constant 7 : index
      %c0_88 = arith.constant 0 : index
      %c0_89 = arith.constant 0 : index
      %133 = vector.load %arg2[%c7, %c0_88, %c0_89] : memref<8x32x128xi8, #tpu.memory_space<vmem>>, vector<1x32x128xi8>
      %134 = vector.shape_cast %133 : vector<1x32x128xi8> to vector<32x128xi8>
      %135 = arith.sitofp %134 : vector<32x128xi8> to vector<32x128xf32>
      %c7_90 = arith.constant 7 : index
      %c0_91 = arith.constant 0 : index
      %c0_92 = arith.constant 0 : index
      %136 = vector.load %arg7[%c7_90, %c0_91, %c0_92] : memref<8x32x128xf32, #tpu.memory_space<vmem>>, vector<1x32x128xf32>
      %137 = vector.shape_cast %136 : vector<1x32x128xf32> to vector<32x128xf32>
      %cst_93 = arith.constant 0.000000e+00 : f32
      %138 = vector.broadcast %cst_93 : f32 to vector<32x128xf32>
      %139 = arith.maximumf %137, %138 : vector<32x128xf32>
      %c0_94 = arith.constant 0 : index
      %c0_95 = arith.constant 0 : index
      %140 = vector.load %arg9[%c0_94, %c0_95] : memref<32x128xf32, #tpu.memory_space<vmem>>, vector<32x128xf32>
      %c0_96 = arith.constant 0 : index
      %c0_97 = arith.constant 0 : index
      %141 = vector.load %arg10[%c0_96, %c0_97] : memref<32x128xf32, #tpu.memory_space<vmem>>, vector<32x128xf32>
      %c0_98 = arith.constant 0 : index
      %c0_99 = arith.constant 0 : index
      %142 = vector.load %arg11[%c0_98, %c0_99] : memref<32x128xf32, #tpu.memory_space<vmem>>, vector<32x128xf32>
      %c0_100 = arith.constant 0 : index
      %c0_101 = arith.constant 0 : index
      %143 = vector.load %arg12[%c0_100, %c0_101] : memref<32x128xf32, #tpu.memory_space<vmem>>, vector<32x128xf32>
      %144 = arith.addf %143, %135 : vector<32x128xf32>
      %145 = arith.mulf %135, %140 : vector<32x128xf32>
      %146 = arith.maximumf %141, %145 : vector<32x128xf32>
      %cst_102 = arith.constant 2.000000e+00 : f32
      %147 = arith.mulf %132, %cst_102 : f32
      %148 = vector.broadcast %147 : f32 to vector<32x128xf32>
      %149 = arith.subf %148, %139 : vector<32x128xf32>
      %150 = arith.mulf %135, %149 : vector<32x128xf32>
      %151 = arith.maximumf %140, %150 : vector<32x128xf32>
      %cst_103 = arith.constant 1.000000e+00 : f32
      %152 = vector.broadcast %cst_103 : f32 to vector<32x128xf32>
      %153 = arith.cmpf ogt, %144, %152 : vector<32x128xf32>
      %154 = arith.subf %151, %146 : vector<32x128xf32>
      %cst_104 = arith.constant 0.000000e+00 : f32
      %155 = vector.broadcast %cst_104 : f32 to vector<32x128xf32>
      %156 = arith.maximumf %154, %155 : vector<32x128xf32>
      %cst_105 = arith.constant 0.000000e+00 : f32
      %157 = vector.broadcast %cst_105 : f32 to vector<32x128xf32>
      %158 = arith.select %153, %156, %157 : vector<32x128xi1>, vector<32x128xf32>
      %cst_106 = arith.constant 0.000000e+00 : f32
      %159 = vector.broadcast %cst_106 : f32 to vector<32x128xf32>
      %160 = arith.cmpf ogt, %144, %159 : vector<32x128xf32>
      %cst_107 = arith.constant 0.000000e+00 : f32
      %161 = vector.broadcast %cst_107 : f32 to vector<32x128xf32>
      %162 = arith.cmpf oeq, %135, %161 : vector<32x128xf32>
      %cst_108 = arith.constant 2.000000e+00 : f32
      %163 = vector.broadcast %cst_108 : f32 to vector<32x128xf32>
      %164 = arith.addf %142, %163 : vector<32x128xf32>
      %165 = arith.select %162, %164, %139 : vector<32x128xi1>, vector<32x128xf32>
      %cst_109 = arith.constant 0.000000e+00 : f32
      %166 = vector.broadcast %cst_109 : f32 to vector<32x128xf32>
      %167 = arith.select %160, %165, %166 : vector<32x128xi1>, vector<32x128xf32>
      %cst_110 = arith.constant 0.000000e+00 : f32
      %168 = vector.broadcast %cst_110 : f32 to vector<32x128xf32>
      %169 = arith.cmpf ogt, %158, %168 : vector<32x128xf32>
      %cst_111 = arith.constant 2.000000e+00 : f32
      %170 = vector.broadcast %cst_111 : f32 to vector<32x128xf32>
      %171 = arith.addf %167, %170 : vector<32x128xf32>
      %172 = arith.cmpf oeq, %158, %171 : vector<32x128xf32>
      %173 = arith.andi %169, %172 : vector<32x128xi1>
      %174 = arith.extui %173 : vector<32x128xi1> to vector<32x128xi32>
      %175 = arith.sitofp %174 : vector<32x128xi32> to vector<32x128xf32>
      %c7_112 = arith.constant 7 : index
      %c0_113 = arith.constant 0 : index
      %c0_114 = arith.constant 0 : index
      %176 = vector.load %arg8[%c7_112, %c0_113, %c0_114] : memref<8x32x128xf32, #tpu.memory_space<vmem>>, vector<1x32x128xf32>
      %177 = vector.shape_cast %176 : vector<1x32x128xf32> to vector<32x128xf32>
      %178 = vector.shape_cast %175 : vector<32x128xf32> to vector<1x32x128xf32>
      tpu.vector_store %arg8[%c7_112, %c0_113, %c0_114], %178 {strides = array<i32>} : memref<8x32x128xf32, #tpu.memory_space<vmem>>, vector<1x32x128xf32>,
      %c0_115 = arith.constant 0 : index
      %c0_116 = arith.constant 0 : index
      %179 = vector.load %arg9[%c0_115, %c0_116] : memref<32x128xf32, #tpu.memory_space<vmem>>, vector<32x128xf32>
      tpu.vector_store %arg9[%c0_115, %c0_116], %151 {strides = array<i32>} : memref<32x128xf32, #tpu.memory_space<vmem>>, vector<32x128xf32>,
      %c0_117 = arith.constant 0 : index
      %c0_118 = arith.constant 0 : index
      %180 = vector.load %arg10[%c0_117, %c0_118] : memref<32x128xf32, #tpu.memory_space<vmem>>, vector<32x128xf32>
      tpu.vector_store %arg10[%c0_117, %c0_118], %146 {strides = array<i32>} : memref<32x128xf32, #tpu.memory_space<vmem>>, vector<32x128xf32>,
      %c0_119 = arith.constant 0 : index
      %c0_120 = arith.constant 0 : index
      %181 = vector.load %arg11[%c0_119, %c0_120] : memref<32x128xf32, #tpu.memory_space<vmem>>, vector<32x128xf32>
      tpu.vector_store %arg11[%c0_119, %c0_120], %167 {strides = array<i32>} : memref<32x128xf32, #tpu.memory_space<vmem>>, vector<32x128xf32>,
      %c0_121 = arith.constant 0 : index
      %c0_122 = arith.constant 0 : index
      %182 = vector.load %arg12[%c0_121, %c0_122] : memref<32x128xf32, #tpu.memory_space<vmem>>, vector<32x128xf32>
      tpu.vector_store %arg12[%c0_121, %c0_122], %144 {strides = array<i32>} : memref<32x128xf32, #tpu.memory_space<vmem>>, vector<32x128xf32>,
    } else {
    }
    return
  }
  func.func @transform_0(%arg0: i32, %arg1: i32) -> (i32, i32, i32) {
    %c0_i32 = arith.constant 0 : i32
    %c0_i32_0 = arith.constant 0 : i32
    return %arg1, %arg0, %c0_i32 : i32, i32, i32
  }
  func.func @transform_1(%arg0: i32, %arg1: i32) -> (i32, i32) {
    %c0_i32 = arith.constant 0 : i32
    %c0_i32_0 = arith.constant 0 : i32
    return %arg0, %c0_i32 : i32, i32
  }
  func.func @transform_2(%arg0: i32, %arg1: i32) -> (i32, i32) {
    %c0_i32 = arith.constant 0 : i32
    %c0_i32_0 = arith.constant 0 : i32
    return %arg0, %c0_i32 : i32, i32
  }
  func.func @transform_3(%arg0: i32, %arg1: i32) -> (i32, i32) {
    %c0_i32 = arith.constant 0 : i32
    %c0_i32_0 = arith.constant 0 : i32
    return %arg0, %c0_i32 : i32, i32
  }
  func.func @transform_4(%arg0: i32, %arg1: i32) -> (i32, i32) {
    %c0_i32 = arith.constant 0 : i32
    %c0_i32_0 = arith.constant 0 : i32
    return %arg0, %c0_i32 : i32, i32
  }
  func.func @transform_5(%arg0: i32, %arg1: i32) -> (i32, i32, i32) {
    %c0_i32 = arith.constant 0 : i32
    %c0_i32_0 = arith.constant 0 : i32
    return %arg1, %arg0, %c0_i32 : i32, i32, i32
  }
  func.func @transform_6(%arg0: i32, %arg1: i32) -> (i32, i32, i32) {
    %c0_i32 = arith.constant 0 : i32
    %c0_i32_0 = arith.constant 0 : i32
    return %arg1, %arg0, %c0_i32 : i32, i32, i32
  }
  func.func @transform_7(%arg0: i32, %arg1: i32) -> (i32, i32) {
    %c0_i32 = arith.constant 0 : i32
    %c0_i32_0 = arith.constant 0 : i32
    return %arg0, %c0_i32 : i32, i32
  }
  func.func @transform_8(%arg0: i32, %arg1: i32) -> (i32, i32) {
    %c0_i32 = arith.constant 0 : i32
    %c0_i32_0 = arith.constant 0 : i32
    return %arg0, %c0_i32 : i32, i32
  }
  func.func @transform_9(%arg0: i32, %arg1: i32) -> (i32, i32) {
    %c0_i32 = arith.constant 0 : i32
    %c0_i32_0 = arith.constant 0 : i32
    return %arg0, %c0_i32 : i32, i32
  }
  func.func @transform_10(%arg0: i32, %arg1: i32) -> (i32, i32) {
    %c0_i32 = arith.constant 0 : i32
    %c0_i32_0 = arith.constant 0 : i32
    return %arg0, %c0_i32 : i32, i32
  }
}

</mosaic_0001>

<bundles_post_ra>
// kernel: periodic_predictor_forward.1
= control target key start
LH: loop header
LB: loop body
LE: loop exit
PB: predicated region body
PF: predicated region fallthrough
CT: control target
= control target key end

     0   :  { %s5235_s0 = inlined_call_operand.vmem [shape: s8[10,64,128], index: 0, kind: input, shape index: {}]   ;;  %s5236_s1 = inlined_call_operand.vmem [shape: f32[64,128], index: 1, kind: input, shape index: {}]   ;;  %s5237_s2 = inlined_call_operand.vmem [shape: f32[64,128], index: 2, kind: input, shape index: {}]   ;;  %s5238_s3 = inlined_call_operand.vmem [shape: f32[64,128], index: 3, kind: input, shape index: {}]   ;;  %s5239_s4 = inlined_call_operand.vmem [shape: f32[64,128], index: 4, kind: input, shape index: {}]   ;;  %s5240_s5 = inlined_call_operand.vmem [shape: f32[10,64,128], index: 5, kind: input, shape index: {}]   ;;  %s5241_s6 = inlined_call_operand.vmem [shape: f32[10,64,128], index: 6, kind: output, shape index: {0}]   ;;  %s5242_s7 = inlined_call_operand.vmem [shape: f32[64,128], index: 7, kind: output, shape index: {1}]   ;;  %s5243_s8 = inlined_call_operand.vmem [shape: f32[64,128], index: 8, kind: output, shape index: {2}]   ;;  %s5244_s9 = inlined_call_operand.vmem [shape: f32[64,128], index: 9, kind: output, shape index: {3}]   ;;  %s5245_s10 = inlined_call_operand.vmem [shape: f32[64,128], index: 10, kind: output, shape index: {4}]  }
   0x1   :  { %5250 = sst [smem:[#allocation10_spill]] %s5235_s0 }
   0x2   :  { %5251 = sst [smem:[#allocation11_spill]] %s5236_s1 }
   0x3   :  { %5252 = sst [smem:[#allocation12_spill]] %s5237_s2 }
   0x4   :  { %5253 = sst [smem:[#allocation13_spill]] %s5238_s3 }
   0x5   :  { %5254 = sst [smem:[#allocation14_spill]] %s5239_s4 }
   0x6   :  { %5255 = sst [smem:[#allocation15_spill]] %s5241_s6 }
   0x7   :  { %s3560_s13 = smov 0   ;;  %s3562_s14 = smov 0  }
   0x8   :  { %s3564_s15 = smov 0   ;;  %s3566_s16 = smov 0  }
   0x9   :  { %s3568_s17 = smov 0   ;;  %s3570_s18 = smov 0  }
   0xa   :  { %s3572_s19 = smov 0  }
   0xb LB: > { %5256 = sst [smem:[#allocation5_spill]] %s3389_s15  ;;  %s30_s20 = sadd.s32 1, %s3397_s17  ;;  %s3405_s19 = sphi %s3572_s19, %s21_s19   ;;  %s3401_s18 = sphi %s3570_s18, %s5298_s18   ;;  %s3397_s17 = sphi %s3568_s17, %s5297_s17   ;;  %s3393_s16 = sphi %s3566_s16, %s5296_s16   ;;  %s3389_s15 = sphi %s3564_s15, %s5295_s15   ;;  %s3385_s14 = sphi %s3562_s14, %s5294_s14   ;;  %s3381_s13 = sphi %s3560_s13, %s5293_s13  }
   0xc   : > { %p31_p0 = scmp.ge.s32.totalorder %s30_s20, 2  ;;  %s33_s21 = sadd.s32 1, %s3401_s18 }
   0xd   : > { %s2818_s22 = sadd.s32 4294967295, %s3405_s19   ;;  %p49_p1 = scmp.ne.s32.totalorder %s3385_s14, %s3381_s13 }
   0xe   : > { %s5300_s20 = smov (%p31_p0, %s30_s20), 0  ;;  %s5302_s21 = smov (!%p31_p0, %s33_s21), %s3401_s18 }
   0xf   : > { %5257 = sst [smem:[#allocation6_spill]] %s5300_s20  ;;  %p50_p2 = scmp.eq.s32.totalorder %s3405_s19, 0 }
  0x10   : > { %p35_p3 = scmp.ge.s32.totalorder %s5302_s21, 2  ;;  %p213_p4 = scmp.eq.s32.totalorder %s2818_s22, 3 }
  0x11   : > { %s37_s23 = ssub.s32 %s3397_s17, %s5300_s20  ;;  %p3606_p5 = por %p50_p2, %p49_p1 }
  0x12   : > { %s5304_s21 = smov (%p35_p3, %s5302_s21), 0  ;;  %p3612_p6 = por %p213_p4, %p49_p1 }
  0x13   : > { %5259 = sst [smem:[#allocation7_spill]] %s5304_s21  ;;  %s38_s26 = ssub.s32 %s3401_s18, %s5304_s21 }
  0x14   : > { %s5260_s25 = scalar_select %p3612_p6, 1, 0 }
  0x15   : > { %s39_s27 = sor.u32 %s38_s26, %s37_s23  ;;  %s42_s28 = sadd.s32 1, %s3385_s14 }
  0x16   : > { %5261 = sst [smem:[#allocation8_spill]] %s5260_s25  ;;  %p40_p7 = scmp.eq.s32.totalorder %s39_s27, 0 }
  0x17   : > { %p2821_p8 = scmp.ge.s32.totalorder %s3405_s19, 4 }
  0x18   : > { %s3620_s29 = scalar_select %p40_p7, %s3385_s14, %s42_s28  }
  0x19   : > { %339 = sbr.rel (%p2821_p8) target bundleno = 127 (0x7f), region = 16 }
  0x1a   : > { %5262 = sst [smem:[#allocation9_spill]] %s3620_s29 }
  0x1e   : > { %342 = sbr.rel (!%p3606_p5) target bundleno = 74 (0x4a), region = 20  ;;  %s344_s30 = sand.u32 (%p3606_p5), 1, %s3385_s14  }
  0x1f   : > { %s2823_s11 = sshll.u32 (%p3606_p5), %s3397_s17, 3  ;;  %s2822_s12 = sshll.u32 (%p3606_p5), %s344_s30, 6 }
  0x20   : > { %s348_s22 = ssub.s32 (%p3606_p5), 10, %s2823_s11  ;;  %s2994_s23 = sshll.u32 (%p3606_p5), %s3397_s17, 4 }
  0x21   : > { %p349_p9 = scmp.lt.s32.totalorder (%p3606_p5), %s348_s22, 8  ;;  %s354_s26 = sadd.s32 (%p3606_p5), %s3401_s18, %s2994_s23 }
  0x22   : > { %s2827_s28 = sshll.u32 (%p3606_p5), %s354_s26, 3  ;;  %s5263_s0 = sld [smem:[#allocation10_spill]] (%p3606_p5) }
  0x23   : > { %s5306_s22 = smov (!%p349_p9, %s348_s22), 8  ;;  %s3637_s6 = scalar_lea.vmem [#allocation2], %s2822_s12  }
  0x24   : > { %s2824_s27 = sshll.u32 %s5306_s22, 7 }
  0x25   : > { %p2828_p10 = scmp.eq.s32.totalorder %s2824_s27, 0 }
  0x26   : > { %s3640_s30 = sshrl.u32 (!%p2828_p10), %s5306_s22, 3 }
  0x27   : > { %359 = sbr.rel (%p2828_p10) target bundleno = 74 (0x4a), region = 24  ;;  %p2829_p11 = scmp.le.s32.totalorder (!%p2828_p10), %s3640_s30, 0 }
  0x28   : > { %s3635_s29 = scalar_lea.vmem %s5263_s0, %s2827_s28  }
  0x2c   : > { %2641 = sbr.rel (%p2829_p11) target bundleno = 57 (0x39), region = 350  ;;  %s5264_s11 = smov (!%p2829_p11), %s3637_s6 }
  0x2d   : > { %s5265_s23 = smov (!%p2829_p11), %s3635_s29  ;;  %s3649_s26 = smov (!%p2829_p11), 0  }
  0x2e   : > { %s3651_s20 = smov (!%p2829_p11), 0  }
  0x31 LB: >> { %v436_v0 = vld [vmem:[%s3413_s23] sm:$0xff]  ;;  %v438_v1 = vld [vmem:[%s3413_s23 + $0x10] sm:$0xff]  ;;  %s452_s21 = sadd.s32 1, %s3417_s26  ;;  %s430_s20 = sadd.s32 1, %s3421_s20   ;;  %s3421_s20 = sphi %s3651_s20, %s430_s20   ;;  %s3417_s26 = sphi %s3649_s26, %s5266_s26   ;;  %s3413_s23 = sphi %s5265_s23, %s457_s23   ;;  %s3409_s11 = sphi %s5264_s11, %s458_s11  }
  0x32   : >> { %v440_v2 = vld [vmem:[%s3413_s23 + $0x20] sm:$0xff]  ;;  %437 = vst [vmem:[%s3409_s11] sm:$0xff] %v436_v0  ;;  %439 = vst [vmem:[%s3409_s11 + $0x8] sm:$0xff] %v438_v1  ;;  %v442_v3 = vld [vmem:[%s3413_s23 + $0x30] sm:$0xff]  ;;  %p453_p12 = scmp.ge.s32.totalorder %s452_s21, %s3640_s30  ;;  %p429_p13 = scmp.ge.s32.totalorder %s430_s20, %s3640_s30 }
  0x33   : >> { %441 = vst [vmem:[%s3409_s11 + $0x10] sm:$0xff] %v440_v2  ;;  %v444_v4 = vld [vmem:[%s3413_s23 + $0x40] sm:$0xff]  ;;  %v446_v5 = vld [vmem:[%s3413_s23 + $0x50] sm:$0xff]  ;;  %443 = vst [vmem:[%s3409_s11 + $0x18] sm:$0xff] %v442_v3 }
  0x34   : >> { %445 = vst [vmem:[%s3409_s11 + $0x20] sm:$0xff] %v444_v4  ;;  %447 = vst [vmem:[%s3409_s11 + $0x28] sm:$0xff] %v446_v5  ;;  %v448_v6 = vld [vmem:[%s3413_s23 + $0x60] sm:$0xff]  ;;  %v450_v7 = vld [vmem:[%s3413_s23 + $0x70] sm:$0xff]  ;;  %s5308_s21 = smov (%p453_p12, %s452_s21), 0  ;;  %432 = sbr.rel (!%p429_p13) target bundleno = 49 (0x31), region = 356 }
  0x35   : >> { %449 = vst [vmem:[%s3409_s11 + $0x30] sm:$0xff] %v448_v6  ;;  %451 = vst [vmem:[%s3409_s11 + $0x38] sm:$0xff] %v450_v7  ;;  %s2830_s12 = sshll.u32 %s5308_s21, 7  ;;  %s2831_s27 = sshll.u32 %s5308_s21, 6 }
  0x36   : >> { %s457_s23 = scalar_lea.vmem %s3635_s29, %s2830_s12   ;;  %s458_s11 = scalar_lea.vmem %s3637_s6, %s2831_s27 [#allocation2]  }
  0x37   : >> { %s5266_s26 = smov %s5308_s21 }
  0x39 PF: > { %s3673_s28 = sand.u32 7, %s5306_s22   ;;  %s2995_s12 = sshll.u32 %s3640_s30, 7 }
  0x3a   : > { %s3677_s27 = scalar_lea.vmem %s3635_s29, %s2995_s12   ;;  %s2996_s0 = sshll.u32 %s3640_s30, 6 }
  0x3b   : > { %s465_s25 = scalar_lea.vmem %s3637_s6, %s2996_s0 [#allocation2]   ;;  %p2835_p0 = scmp.le.s32.totalorder %s3673_s28, 0 }
  0x3c   : > { %s3423_s21 = smov (!%p2835_p0), %s465_s25   ;;  %s3427_s20 = smov (!%p2835_p0), %s3677_s27  }
  0x3d   : > { %2655 = sbr.rel (%p2835_p0) target bundleno = 74 (0x4a), region = 361  ;;  %s3431_s15 = smov (!%p2835_p0), 0  }
  0x3e   : > { %s3435_s11 = smov (!%p2835_p0), 0  }
  0x42 LB: >> { %v475_v8 = vld [vmem:[%s3429_s20] sm:$0xff]  ;;  %s477_s29 = sadd.s32 1, %s3433_s15  ;;  %s469_s11 = sadd.s32 1, %s3437_s11   ;;  %s3437_s11 = sphi %s3435_s11, %s469_s11   ;;  %s3433_s15 = sphi %s3431_s15, %s3432_s15   ;;  %s3429_s20 = sphi %s3427_s20, %s482_s20   ;;  %s3425_s21 = sphi %s3423_s21, %s483_s21  }
  0x43   : >> { %476 = vst [vmem:[%s3425_s21] sm:$0xff] %v475_v8  ;;  %p478_p1 = scmp.ge.s32.totalorder %s477_s29, %s3673_s28  ;;  %p468_p2 = scmp.ge.s32.totalorder %s469_s11, %s3673_s28 }
  0x45   : >> { %s5310_s29 = smov (%p478_p1, %s477_s29), 0  ;;  %471 = sbr.rel (!%p468_p2) target bundleno = 66 (0x42), region = 367 }
  0x46   : >> { %s2836_s0 = sshll.u32 %s5310_s29, 4  ;;  %s2837_s6 = sshll.u32 %s5310_s29, 3 }
  0x47   : >> { %s482_s20 = scalar_lea.vmem %s3677_s27, %s2836_s0   ;;  %s483_s21 = scalar_lea.vmem %s465_s25, %s2837_s6 [#allocation2]  }
  0x48   : >> { %s3432_s15 = smov %s5310_s29  }
  0x4a PF: > { %525 = sbr.rel (!%p3606_p5) target bundleno = 127 (0x7f), region = 88  ;;  %s527_s15 = sand.u32 (%p3606_p5), 1, %s3385_s14  }
  0x4b   : > { %s2839_s22 = sshll.u32 (%p3606_p5), %s3397_s17, 3  ;;  %s2838_s30 = sshll.u32 (%p3606_p5), %s527_s15, 8 }
  0x4c   : > { %s2840_s23 = sshll.u32 (%p3606_p5), %s3401_s18, 2  ;;  %s532_s26 = ssub.s32 (%p3606_p5), 10, %s2839_s22 }
  0x4d   : > { %p533_p3 = scmp.lt.s32.totalorder (%p3606_p5), %s532_s26, 8  ;;  %s2998_s12 = sshll.u32 (%p3606_p5), %s3397_s17, 6 }
  0x4e   : > { %s539_s21 = sadd.s32 (%p3606_p5), %s2998_s12, %s2840_s23  ;;  %s3700_s11 = scalar_lea.vmem (%p3606_p5), [#allocation3], %s2838_s30  }
  0x4f   : > { %s5312_s26 = smov (!%p533_p3, %s532_s26), 8  ;;  %s2845_s25 = sshll.u32 %s539_s21, 3 }
  0x50   : > { %s2997_s28 = sshll.u32 %s5312_s26, 9  ;;  %s3698_s20 = scalar_lea.vmem %s5240_s5, %s2845_s25  }
  0x51   : > { %p2846_p4 = scmp.eq.s32.totalorder %s2997_s28, 0 }
  0x52   : > { %s3703_s29 = sshrl.u32 (!%p2846_p4), %s5312_s26, 3 }
  0x53   : > { %544 = sbr.rel (%p2846_p4) target bundleno = 127 (0x7f), region = 92  ;;  %p2847_p5 = scmp.le.s32.totalorder (!%p2846_p4), %s3703_s29, 0 }
  0x58   : > { %2669 = sbr.rel (%p2847_p5) target bundleno = 110 (0x6e), region = 372  ;;  %s5267_s0 = smov (!%p2847_p5), %s3700_s11 }
  0x59   : > { %s5268_s6 = smov (!%p2847_p5), %s3698_s20  ;;  %s3712_s15 = smov (!%p2847_p5), 0  }
  0x5a   : > { %s3714_s22 = smov (!%p2847_p5), 0  }
  0x5d LB: >> { %v675_v9 = vld [vmem:[%s3445_s6] sm:$0xff]  ;;  %s739_s30 = sadd.s32 1, %s3449_s15  ;;  %v691_v17 = vld [vmem:[%s3445_s6 + $0x8] sm:$0xff]  ;;  %v707_v25 = vld [vmem:[%s3445_s6 + $0x10] sm:$0xff]  ;;  %s669_s22 = sadd.s32 1, %s3453_s22   ;;  %s3453_s22 = sphi %s3714_s22, %s669_s22   ;;  %s3449_s15 = sphi %s3712_s15, %s5271_s15   ;;  %s3445_s6 = sphi %s5268_s6, %s5270_s6   ;;  %s3441_s0 = sphi %s5267_s0, %s5269_s0  }
  0x5e   : >> { %v677_v10 = vld [vmem:[%s3445_s6 + $0x40] sm:$0xff]  ;;  %676 = vst [vmem:[%s3441_s0] sm:$0xff] %v675_v9  ;;  %p740_p7 = scmp.ge.s32.totalorder %s739_s30, %s3703_s29  ;;  %692 = vst [vmem:[%s3441_s0 + $0x8] sm:$0xff] %v691_v17  ;;  %v693_v18 = vld [vmem:[%s3445_s6 + $0x48] sm:$0xff]  ;;  %p668_p8 = scmp.ge.s32.totalorder %s669_s22, %s3703_s29 }
  0x5f   : >> { %v679_v11 = vld [vmem:[%s3445_s6 + $0x80] sm:$0xff]  ;;  %678 = vst [vmem:[%s3441_s0 + $0x20] sm:$0xff] %v677_v10  ;;  %v695_v19 = vld [vmem:[%s3445_s6 + $0x88] sm:$0xff]  ;;  %694 = vst [vmem:[%s3441_s0 + $0x28] sm:$0xff] %v693_v18 }
  0x60   : >> { %680 = vst [vmem:[%s3441_s0 + $0x40] sm:$0xff] %v679_v11  ;;  %v681_v12 = vld [vmem:[%s3445_s6 + $0xc0] sm:$0xff]  ;;  %v697_v20 = vld [vmem:[%s3445_s6 + $0xc8] sm:$0xff]  ;;  %s5314_s30 = smov (%p740_p7, %s739_s30), 0  ;;  %696 = vst [vmem:[%s3441_s0 + $0x48] sm:$0xff] %v695_v19 }
  0x61   : >> { %v683_v13 = vld [vmem:[%s3445_s6 + $0x100] sm:$0xff]  ;;  %682 = vst [vmem:[%s3441_s0 + $0x60] sm:$0xff] %v681_v12  ;;  %698 = vst [vmem:[%s3441_s0 + $0x68] sm:$0xff] %v697_v20  ;;  %v699_v21 = vld [vmem:[%s3445_s6 + $0x108] sm:$0xff]  ;;  %s2848_s23 = sshll.u32 %s5314_s30, 9  ;;  %s2849_s12 = sshll.u32 %s5314_s30, 8 }
  0x62   : >> { %v685_v14 = vld [vmem:[%s3445_s6 + $0x140] sm:$0xff]  ;;  %684 = vst [vmem:[%s3441_s0 + $0x80] sm:$0xff] %v683_v13  ;;  %v701_v22 = vld [vmem:[%s3445_s6 + $0x148] sm:$0xff]  ;;  %700 = vst [vmem:[%s3441_s0 + $0x88] sm:$0xff] %v699_v21  ;;  %s3771_s21 = scalar_lea.vmem %s3698_s20, %s2848_s23   ;;  %s745_s25 = scalar_lea.vmem %s3700_s11, %s2849_s12 [#allocation3]  }
  0x63   : >> { %686 = vst [vmem:[%s3441_s0 + $0xa0] sm:$0xff] %v685_v14  ;;  %v687_v15 = vld [vmem:[%s3445_s6 + $0x180] sm:$0xff]  ;;  %v703_v23 = vld [vmem:[%s3445_s6 + $0x188] sm:$0xff]  ;;  %702 = vst [vmem:[%s3441_s0 + $0xa8] sm:$0xff] %v701_v22  ;;  %s5271_s15 = smov %s5314_s30 }
  0x64   : >> { %v689_v16 = vld [vmem:[%s3445_s6 + $0x1c0] sm:$0xff]  ;;  %688 = vst [vmem:[%s3441_s0 + $0xc0] sm:$0xff] %v687_v15  ;;  %704 = vst [vmem:[%s3441_s0 + $0xc8] sm:$0xff] %v703_v23  ;;  %v705_v24 = vld [vmem:[%s3445_s6 + $0x1c8] sm:$0xff] }
  0x65   : >> { %690 = vst [vmem:[%s3441_s0 + $0xe0] sm:$0xff] %v689_v16  ;;  %v709_v26 = vld [vmem:[%s3445_s6 + $0x50] sm:$0xff]  ;;  %706 = vst [vmem:[%s3441_s0 + $0xe8] sm:$0xff] %v705_v24  ;;  %v723_v33 = vld [vmem:[%s3445_s6 + $0x18] sm:$0xff] }
  0x66   : >> { %708 = vst [vmem:[%s3441_s0 + $0x10] sm:$0xff] %v707_v25  ;;  %710 = vst [vmem:[%s3441_s0 + $0x30] sm:$0xff] %v709_v26  ;;  %v711_v27 = vld [vmem:[%s3445_s6 + $0x90] sm:$0xff]  ;;  %v725_v34 = vld [vmem:[%s3445_s6 + $0x58] sm:$0xff] }
  0x67   : >> { %v713_v28 = vld [vmem:[%s3445_s6 + $0xd0] sm:$0xff]  ;;  %712 = vst [vmem:[%s3441_s0 + $0x50] sm:$0xff] %v711_v27  ;;  %v727_v35 = vld [vmem:[%s3445_s6 + $0x98] sm:$0xff]  ;;  %724 = vst [vmem:[%s3441_s0 + $0x18] sm:$0xff] %v723_v33 }
  0x68   : >> { %v715_v29 = vld [vmem:[%s3445_s6 + $0x110] sm:$0xff]  ;;  %714 = vst [vmem:[%s3441_s0 + $0x70] sm:$0xff] %v713_v28  ;;  %726 = vst [vmem:[%s3441_s0 + $0x38] sm:$0xff] %v725_v34  ;;  %v729_v36 = vld [vmem:[%s3445_s6 + $0xd8] sm:$0xff] }
  0x69   : >> { %716 = vst [vmem:[%s3441_s0 + $0x90] sm:$0xff] %v715_v29  ;;  %v717_v30 = vld [vmem:[%s3445_s6 + $0x150] sm:$0xff]  ;;  %728 = vst [vmem:[%s3441_s0 + $0x58] sm:$0xff] %v727_v35  ;;  %v731_v37 = vld [vmem:[%s3445_s6 + $0x118] sm:$0xff]  ;;  %671 = sbr.rel (!%p668_p8) target bundleno = 93 (0x5d), region = 378 }
  0x6a   : >> { %v719_v31 = vld [vmem:[%s3445_s6 + $0x190] sm:$0xff]  ;;  %718 = vst [vmem:[%s3441_s0 + $0xb0] sm:$0xff] %v717_v30  ;;  %v733_v38 = vld [vmem:[%s3445_s6 + $0x158] sm:$0xff]  ;;  %730 = vst [vmem:[%s3441_s0 + $0x78] sm:$0xff] %v729_v36 }
  0x6b   : >> { %v721_v32 = vld [vmem:[%s3445_s6 + $0x1d0] sm:$0xff]  ;;  %720 = vst [vmem:[%s3441_s0 + $0xd0] sm:$0xff] %v719_v31  ;;  %732 = vst [vmem:[%s3441_s0 + $0x98] sm:$0xff] %v731_v37  ;;  %v735_v39 = vld [vmem:[%s3445_s6 + $0x198] sm:$0xff] }
  0x6c   : >> { %722 = vst [vmem:[%s3441_s0 + $0xf0] sm:$0xff] %v721_v32  ;;  %734 = vst [vmem:[%s3441_s0 + $0xb8] sm:$0xff] %v733_v38  ;;  %v737_v40 = vld [vmem:[%s3445_s6 + $0x1d8] sm:$0xff]  ;;  %s5270_s6 = smov %s3771_s21 }
  0x6d   : >> { %736 = vst [vmem:[%s3441_s0 + $0xd8] sm:$0xff] %v735_v39  ;;  %738 = vst [vmem:[%s3441_s0 + $0xf8] sm:$0xff] %v737_v40  ;;  %s5269_s0 = smov %s745_s25 }
  0x6e PF: > { %s3812_s28 = sand.u32 7, %s5312_s26   ;;  %s2999_s27 = sshll.u32 %s3703_s29, 9 }
  0x6f   : > { %s3816_s24 = scalar_lea.vmem %s3698_s20, %s2999_s27   ;;  %s3000_s23 = sshll.u32 %s3703_s29, 8 }
  0x70   : > { %s3820_s12 = scalar_lea.vmem %s3700_s11, %s3000_s23 [#allocation3]   ;;  %p2853_p9 = scmp.le.s32.totalorder %s3812_s28, 0 }
  0x71   : > { %s5272_s0 = smov (!%p2853_p9), %s3820_s12  ;;  %s5273_s6 = smov (!%p2853_p9), %s3816_s24 }
  0x72   : > { %2683 = sbr.rel (%p2853_p9) target bundleno = 127 (0x7f), region = 383  ;;  %s3463_s15 = smov (!%p2853_p9), 0  }
  0x73   : > { %s3467_s22 = smov (!%p2853_p9), 0  }
  0x77 LB: >> { %v762_v41 = vld [vmem:[%s3461_s6] sm:$0xff]  ;;  %v764_v42 = vld [vmem:[%s3461_s6 + $0x8] sm:$0xff]  ;;  %v766_v43 = vld [vmem:[%s3461_s6 + $0x10] sm:$0xff]  ;;  %s770_s26 = sadd.s32 1, %s3465_s15  ;;  %s756_s22 = sadd.s32 1, %s3469_s22   ;;  %s3469_s22 = sphi %s3467_s22, %s756_s22   ;;  %s3465_s15 = sphi %s3463_s15, %s3464_s15   ;;  %s3461_s6 = sphi %s5273_s6, %s775_s6   ;;  %s3457_s0 = sphi %s5272_s0, %s776_s0  }
  0x78   : >> { %763 = vst [vmem:[%s3457_s0] sm:$0xff] %v762_v41  ;;  %765 = vst [vmem:[%s3457_s0 + $0x8] sm:$0xff] %v764_v42  ;;  %v768_v44 = vld [vmem:[%s3461_s6 + $0x18] sm:$0xff]  ;;  %p771_p10 = scmp.ge.s32.totalorder %s770_s26, %s3812_s28  ;;  %p755_p11 = scmp.ge.s32.totalorder %s756_s22, %s3812_s28 }
  0x79   : >> { %767 = vst [vmem:[%s3457_s0 + $0x10] sm:$0xff] %v766_v43  ;;  %769 = vst [vmem:[%s3457_s0 + $0x18] sm:$0xff] %v768_v44 }
  0x7a   : >> { %s5316_s26 = smov (%p771_p10, %s770_s26), 0  ;;  %758 = sbr.rel (!%p755_p11) target bundleno = 119 (0x77), region = 389 }
  0x7b   : >> { %s2854_s20 = sshll.u32 %s5316_s26, 6  ;;  %s2855_s11 = sshll.u32 %s5316_s26, 5 }
  0x7c   : >> { %s775_s6 = scalar_lea.vmem %s3816_s24, %s2854_s20   ;;  %s776_s0 = scalar_lea.vmem %s3820_s12, %s2855_s11 [#allocation3]  }
  0x7d   : >> { %s3464_s15 = smov %s5316_s26  }
  0x7f PF: > { %p2856_p12 = scmp.ge.s32.totalorder %s3405_s19, 1  ;;  %p781_p13 = scmp.lt.s32.totalorder %s3405_s19, 5 }
  0x81   : > { %p782_p0 = pnand %p2856_p12, %p781_p13 }
  0x82   : > { %s788_s29 = sand.u32 (!%p782_p0), 1, %s3381_s13   ;;  %s3843_s30 = sshll.u32 (!%p782_p0), %s3393_s16, 2 }
  0x83   : > { %785 = sbr.rel (%p782_p0) target bundleno = 407 (0x197), region = 140  ;;  %s2857_s21 = sshll.u32 (!%p782_p0), %s788_s29, 6 }
  0x84   : > { %s2858_s25 = sshll.u32 (!%p782_p0), %s788_s29, 8  ;;  %p881_p1 = scmp.lt.s32.totalorder (!%p782_p0), %s3843_s30, 7 }
  0x85   : > { %s5274_s1 = sld [smem:[#allocation11_spill]] (!%p782_p0)  ;;  %s3887_s20 = scalar_lea.vmem (!%p782_p0), [#allocation2], %s2857_s21 }
  0x86   : > { %s5275_s2 = sld [smem:[#allocation12_spill]] (!%p782_p0)  ;;  %s3889_s29 = scalar_lea.vmem (!%p782_p0), [#allocation3], %s2858_s25 }
  0x87   : > { %s5276_s3 = sld [smem:[#allocation13_spill]] (!%p782_p0) }
  0x88   : > { %s882_s28 = scalar_select %p881_p1, %s3843_s30, 7 }
  0x89   : > { %s5277_s4 = sld [smem:[#allocation14_spill]] }
  0x8a   : > { %s2861_s27 = sshll.u32 %s882_s28, 3  ;;  %s3891_s28 = scalar_lea.vmem [#allocation4], %s2858_s25  }
  0x8b   : > { %s3850_s12 = scalar_lea.vmem %s5274_s1, %s2861_s27  ;;  %s3870_s24 = scalar_lea.vmem %s5242_s7, %s2861_s27 }
  0x8c   : > { %s3855_s15 = scalar_lea.vmem %s5275_s2, %s2861_s27  ;;  %s3875_s0 = scalar_lea.vmem %s5243_s8, %s2861_s27 }
  0x8d   : > { %s3860_s22 = scalar_lea.vmem %s5276_s3, %s2861_s27  ;;  %s3880_s13 = scalar_lea.vmem %s5244_s9, %s2861_s27 }
  0x8e   : > { %s3885_s26 = scalar_lea.vmem %s5245_s10, %s2861_s27 }
  0x8f   : > { %s3865_s11 = scalar_lea.vmem %s5277_s4, %s2861_s27  ;;  %s5278_s4 = sld [smem:[#allocation5_spill]] }
  0x95   : > { %p2876_p2 = scmp.ne.s32.totalorder %s5278_s4, 0 }
  0x97   : > { %945 = sbr.rel (%p2876_p2) target bundleno = 165 (0xa5), region = 152 }
  0x9c   : > { %v946_v45 = vld [vmem:[%s3850_s12] sm:$0xff]  ;;  %v947_v49 = vld [vmem:[%s3850_s12 + $0x8] sm:$0xff]  ;;  %v948_v53 = vld [vmem:[%s3850_s12 + $0x10] sm:$0xff] }
  0x9d   : > { %v954_v46 = vld [vmem:[%s3855_s15] sm:$0xff]  ;;  %950 = vst [vmem:[%s3870_s24] sm:$0xff] %v946_v45  ;;  %v955_v50 = vld [vmem:[%s3855_s15 + $0x8] sm:$0xff]  ;;  %951 = vst [vmem:[%s3870_s24 + $0x8] sm:$0xff] %v947_v49 }
  0x9e   : > { %v962_v47 = vld [vmem:[%s3860_s22] sm:$0xff]  ;;  %958 = vst [vmem:[%s3875_s0] sm:$0xff] %v954_v46  ;;  %959 = vst [vmem:[%s3875_s0 + $0x8] sm:$0xff] %v955_v50  ;;  %v963_v51 = vld [vmem:[%s3860_s22 + $0x8] sm:$0xff] }
  0x9f   : > { %966 = vst [vmem:[%s3880_s13] sm:$0xff] %v962_v47  ;;  %v970_v48 = vld [vmem:[%s3865_s11] sm:$0xff]  ;;  %v971_v52 = vld [vmem:[%s3865_s11 + $0x8] sm:$0xff]  ;;  %967 = vst [vmem:[%s3880_s13 + $0x8] sm:$0xff] %v963_v51 }
  0xa0   : > { %974 = vst [vmem:[%s3885_s26] sm:$0xff] %v970_v48  ;;  %975 = vst [vmem:[%s3885_s26 + $0x8] sm:$0xff] %v971_v52  ;;  %v956_v54 = vld [vmem:[%s3855_s15 + $0x10] sm:$0xff]  ;;  %v949_v57 = vld [vmem:[%s3850_s12 + $0x18] sm:$0xff] }
  0xa1   : > { %952 = vst [vmem:[%s3870_s24 + $0x10] sm:$0xff] %v948_v53  ;;  %v964_v55 = vld [vmem:[%s3860_s22 + $0x10] sm:$0xff]  ;;  %960 = vst [vmem:[%s3875_s0 + $0x10] sm:$0xff] %v956_v54  ;;  %v957_v58 = vld [vmem:[%s3855_s15 + $0x18] sm:$0xff] }
  0xa2   : > { %v972_v56 = vld [vmem:[%s3865_s11 + $0x10] sm:$0xff]  ;;  %968 = vst [vmem:[%s3880_s13 + $0x10] sm:$0xff] %v964_v55  ;;  %v965_v59 = vld [vmem:[%s3860_s22 + $0x18] sm:$0xff]  ;;  %953 = vst [vmem:[%s3870_s24 + $0x18] sm:$0xff] %v949_v57 }
  0xa3   : > { %976 = vst [vmem:[%s3885_s26 + $0x10] sm:$0xff] %v972_v56  ;;  %961 = vst [vmem:[%s3875_s0 + $0x18] sm:$0xff] %v957_v58  ;;  %v973_v60 = vld [vmem:[%s3865_s11 + $0x18] sm:$0xff] }
  0xa4   : > { %969 = vst [vmem:[%s3880_s13 + $0x18] sm:$0xff] %v965_v59  ;;  %977 = vst [vmem:[%s3885_s26 + $0x18] sm:$0xff] %v973_v60 }
  0xa5 PF: > { %s5279_s1 = sld [smem:[#allocation5_spill]]  ;;  %v981_v61 = vld [vmem:[%s3887_s20] sm:$0xff]  ;;  %v991_v4 = vld [vmem:[%s3889_s29 + $0x8] sm:$0xff]  ;;  %v992_v35 = vld [vmem:[%s3889_s29 + $0x10] sm:$0xff] }
  0xa6   : > { %v982_v62 = vunpack.c.0.s8 %v981_v61  ;;  %v3931_v63 = vld [vmem:[%s3870_s24] sm:$0xff]  ;;  %v983_v0 = vunpack.c.1.s8 %v981_v61  ;;  %v984_v1 = vunpack.c.2.s8 %v981_v61  ;;  %v985_v2 = vunpack.c.3.s8 %v981_v61  ;;  %v3938_v5 = vld [vmem:[%s3870_s24 + $0x8] sm:$0xff]  ;;  %v993_v44 = vld [vmem:[%s3889_s29 + $0x18] sm:$0xff] }
  0xa7   : > { %v990_v3 = vld [vmem:[%s3889_s29] sm:$0xff]  ;;  %v1003_v12 = vld [vmem:[%s3875_s0 + $0x8] sm:$0xff]  ;;  %v995_v13 = vmax.f32 %v991_v4, 0.0  ;;  %v996_v48 = vmax.f32 %v992_v35, 0.0  ;;  %v997_v55 = vmax.f32 %v993_v44, 0.0 }
  0xa8   : > { %v986_v6 = vcvt.s32.f32 %v982_v62  ;;  %v987_v7 = vcvt.s32.f32 %v983_v0  ;;  %v994_v8 = vmax.f32 %v990_v3, 0.0  ;;  %v3943_v9 = vld [vmem:[%s3870_s24 + $0x10] sm:$0xff]  ;;  %v1006_v10 = vld [vmem:[%s3880_s13] sm:$0xff]  ;;  %v1007_v14 = vld [vmem:[%s3880_s13 + $0x8] sm:$0xff]  ;;  %v3949_v16 = vcvt.s32.f32 %v984_v1 }
  0xa9   : > { %v1002_v11 = vld [vmem:[%s3875_s0] sm:$0xff]  ;;  %v1064_v15 = vadd.f32 2.0, %v1006_v10  ;;  %v3951_v17 = vcvt.s32.f32 %v985_v2  ;;  %v1065_v21 = vadd.f32 2.0, %v1007_v14  ;;  %v1011_v22 = vld [vmem:[%s3885_s26 + $0x8] sm:$0xff]  ;;  %v1004_v23 = vld [vmem:[%s3875_s0 + $0x10] sm:$0xff] }
  0xaa   : > { %v1018_v18 = vmul.f32 %v3931_v63, %v986_v6  ;;  %v1019_v19 = vmul.f32 %v3938_v5, %v987_v7  ;;  %v1010_v20 = vld [vmem:[%s3885_s26] sm:$0xff]  ;;  %vm1060_vm0 = vcmp.eq.f32.partialorder %v986_v6, 0.0  ;;  %v1005_v24 = vld [vmem:[%s3875_s0 + $0x18] sm:$0xff]  ;;  %v3963_v28 = vadd.f32 %v1011_v22, %v987_v7  ;;  %v1012_v34 = vld [vmem:[%s3885_s26 + $0x10] sm:$0xff] }
  0xab   : > { %s3928_s2 = sshll.u32 %s5279_s1, 3  ;;  %v3960_v25 = vadd.f32 %v1010_v20, %v986_v6  ;;  %v1068_v26 = vsel %vm1060_vm0, %v1064_v15, %v994_v8  ;;  %v1013_v27 = vld [vmem:[%s3885_s26 + $0x18] sm:$0xff]  ;;  %v1020_v29 = vmul.f32 %v3943_v9, %v3949_v16  ;;  %vm1061_vm1 = vcmp.eq.f32.partialorder %v987_v7, 0.0  ;;  %v1008_v40 = vld [vmem:[%s3880_s13 + $0x10] sm:$0xff]  ;;  %v2882_v56 = vld [vmem:[%s3887_s20 + $0x8] sm:$0xff]  ;;  %p2895_p3 = scmp.ge.s32.totalorder %s5279_s1, 1 }
  0xac   : > { %s979_s3 = scvt.s32.f32 %s3928_s2  ;;  %s1120_s4 = sadd.s32 1, %s3928_s2  ;;  %v3967_v30 = vmax.f32 %v1002_v11, %v1018_v18  ;;  %v3969_v31 = vmax.f32 %v1003_v12, %v1019_v19  ;;  %v1009_v33 = vld [vmem:[%s3880_s13 + $0x18] sm:$0xff]  ;;  %1117 = vst [vmem:[%s3885_s26 + $0x8] sm:$0xff] %v3963_v28  ;;  %vm1057_vm3 = vcmp.gt.f32.partialorder %v3963_v28, 0.0  ;;  %v1069_v43 = vsel %vm1061_vm1, %v1065_v21, %v995_v13  ;;  %v4014_v57 = vld [vmem:[%s3889_s29 + $0x20] sm:$0xff]  ;;  %v4025_v61 = vld [vmem:[%s3889_s29 + $0x28] sm:$0xff] }
  0xad   : > { %s1121_s21 = scvt.s32.f32 %s1120_s4  ;;  %v1001_v36 = vld [vmem:[%s3870_s24 + $0x18] sm:$0xff]  ;;  %vm1056_vm2 = vcmp.gt.f32.partialorder %v3960_v25, 0.0  ;;  %1116 = vst [vmem:[%s3885_s26] sm:$0xff] %v3960_v25  ;;  %v3987_v42 = vmax.f32 %v1004_v23, %v1020_v29  ;;  %v3995_v47 = vsel %vm1057_vm3, %v1069_v43, 0.0  ;;  %v4003_v50 = vadd.f32 %v1012_v34, %v3949_v16  ;;  %s1269_s22 = sadd.s32 (!%p2895_p3), 2, %s3928_s2 }
  0xae   : > { %s3940_s25 = sadd.f32 1.0, %s979_s3  ;;  %1108 = vst [vmem:[%s3875_s0] sm:$0xff] %v3967_v30  ;;  %v3983_v41 = vsel %vm1056_vm2, %v1068_v26, 0.0  ;;  %1109 = vst [vmem:[%s3875_s0 + $0x8] sm:$0xff] %v3969_v31  ;;  %v1021_v49 = vmul.f32 %v1001_v36, %v3951_v17  ;;  %vm1062_vm4 = vcmp.eq.f32.partialorder %v3949_v16, 0.0  ;;  %v1066_v51 = vadd.f32 2.0, %v1008_v40  ;;  %v2886_v14 = vld [vmem:[%s3889_s29 + $0x38] sm:$0xff]  ;;  %s1270_s11 = scvt.s32.f32 (!%p2895_p3), %s1269_s22 }
  0xaf   : > { %s1122_s27 = sadd.f32 1.0, %s1121_s21  ;;  %1112 = vst [vmem:[%s3880_s13] sm:$0xff] %v3983_v41  ;;  %1110 = vst [vmem:[%s3875_s0 + $0x10] sm:$0xff] %v3987_v42  ;;  %vm1058_vm5 = vcmp.gt.f32.partialorder %v4003_v50, 0.0  ;;  %v4022_v60 = vadd.f32 %v1013_v27, %v3951_v17  ;;  %vm1063_vm6 = vcmp.eq.f32.partialorder %v3951_v17, 0.0  ;;  %v1067_v1 = vadd.f32 2.0, %v1009_v33  ;;  %s1414_s23 = sadd.s32 (!%p2895_p3), 3, %s3928_s2 }
  0xb0   : > { %s1026_s12 = smul.f32 2.0, %s3940_s25  ;;  %1113 = vst [vmem:[%s3880_s13 + $0x8] sm:$0xff] %v3995_v47  ;;  %v4016_v58 = vmax.f32 %v1005_v24, %v1021_v49  ;;  %v1070_v59 = vsel %vm1062_vm4, %v1066_v51, %v996_v48  ;;  %1118 = vst [vmem:[%s3885_s26 + $0x10] sm:$0xff] %v4003_v50  ;;  %v1125_v2 = vunpack.c.0.s8 %v2882_v56  ;;  %v1138_v3 = vmax.f32 %v4014_v57, 0.0  ;;  %s1271_s6 = sadd.f32 (!%p2895_p3), 1.0, %s1270_s11 }
  0xb1   : > { %s1170_s15 = smul.f32 2.0, %s1122_s27  ;;  %vm1059_vm7 = vcmp.gt.f32.partialorder %v4022_v60, 0.0  ;;  %1119 = vst [vmem:[%s3885_s26 + $0x18] sm:$0xff] %v4022_v60  ;;  %v1071_v10 = vsel %vm1063_vm6, %v1067_v1, %v997_v55  ;;  %v1128_v23 = vunpack.c.3.s8 %v2882_v56  ;;  %v1141_v24 = vmax.f32 %v2886_v14, 0.0  ;;  %s4254_s1 = scvt.s32.f32 (!%p2895_p3), %s1414_s23 }
  0xb2   : > { %v1027_v32 = vstv %s1026_s12  ;;  %1111 = vst [vmem:[%s3875_s0 + $0x18] sm:$0xff] %v4016_v58  ;;  %v4051_v11 = vcvt.s32.f32 %v1125_v2  ;;  %v1075_v15 = vsel %vm1059_vm7, %v1071_v10, 0.0  ;;  %vm1040_vm11 = vcmp.gt.f32.partialorder %v3960_v25, 1.0  ;;  %s1319_s16 = smul.f32 (!%p2895_p3), 2.0, %s1271_s6  ;;  %s1559_s21 = sadd.s32 (!%p2895_p3), 4, %s3928_s2 }
  0xb3   : > { %v1028_v37 = vsub.f32 %v1027_v32, %v994_v8  ;;  %v1029_v38 = vsub.f32 %v1027_v32, %v995_v13  ;;  %v3975_v39 = vstv %s1170_s15  ;;  %v1030_v54 = vsub.f32 %v1027_v32, %v996_v48  ;;  %v4049_v8 = vld [vmem:[%s3889_s29 + $0x30] sm:$0xff]  ;;  %1115 = vst [vmem:[%s3880_s13 + $0x18] sm:$0xff] %v1075_v15  ;;  %v1155_v29 = vld [vmem:[%s3885_s26 + $0x8] sm:$0xff]  ;;  %s1416_s3 = sadd.f32 (!%p2895_p3), 1.0, %s4254_s1  ;;  %s4426_s25 = scvt.s32.f32 (!%p2895_p3), %s1559_s21 }
  0xb4   : > { %v1031_v0 = vsub.f32 %v1027_v32, %v997_v55  ;;  %v1172_v12 = vsub.f32 %v3975_v39, %v1138_v3  ;;  %v1127_v13 = vunpack.c.2.s8 %v2882_v56  ;;  %v4068_v18 = vadd.f32 2.0, %v1075_v15  ;;  %v1154_v27 = vld [vmem:[%s3885_s26] sm:$0xff]  ;;  %s1704_s15 = sadd.s32 (!%p2895_p3), 5, %s3928_s2  ;;  %s1849_s6 = sadd.s32 (!%p2895_p3), 6, %s3928_s2 }
  0xb5   : > { %v1032_v45 = vmul.f32 %v1028_v37, %v986_v6  ;;  %v1033_v46 = vmul.f32 %v1029_v38, %v987_v7  ;;  %v1034_v62 = vmul.f32 %v1030_v54, %v3949_v16  ;;  %v1126_v6 = vunpack.c.1.s8 %v2882_v56  ;;  %s1464_s4 = smul.f32 (!%p2895_p3), 2.0, %s1416_s3  ;;  %s1561_s27 = sadd.f32 (!%p2895_p3), 1.0, %s4426_s25 }
  0xb6   : > { %v1139_v7 = vmax.f32 %v4025_v61, 0.0  ;;  %v1176_v19 = vmul.f32 %v1172_v12, %v4051_v11  ;;  %v4072_v20 = vcvt.s32.f32 %v1127_v13  ;;  %v1140_v21 = vmax.f32 %v4049_v8, 0.0  ;;  %v1148_v12 = vld [vmem:[%s3875_s0 + $0x10] sm:$0xff]  ;;  %v1146_v13 = vld [vmem:[%s3875_s0] sm:$0xff]  ;;  %s4543_s22 = scvt.s32.f32 (!%p2895_p3), %s1704_s15 }
  0xb7   : > { %v4007_v52 = vmax.f32 %v3931_v63, %v1032_v45  ;;  %v4010_v53 = vmax.f32 %v3938_v5, %v1033_v46  ;;  %v4030_v63 = vsel %vm1058_vm5, %v1070_v59, 0.0  ;;  %v4044_v4 = vmax.f32 %v3943_v9, %v1034_v62  ;;  %v1156_v32 = vld [vmem:[%s3885_s26 + $0x10] sm:$0xff]  ;;  %v1150_v45 = vld [vmem:[%s3880_s13] sm:$0xff]  ;;  %v1151_v46 = vld [vmem:[%s3880_s13 + $0x8] sm:$0xff]  ;;  %s1609_s12 = smul.f32 (!%p2895_p3), 2.0, %s1561_s27 }
  0xb8   : > { %1114 = vst [vmem:[%s3880_s13 + $0x10] sm:$0xff] %v4030_v63  ;;  %v1035_v5 = vmul.f32 %v1031_v0, %v3951_v17  ;;  %v4063_v16 = vcvt.s32.f32 %v1126_v6  ;;  %v1173_v17 = vsub.f32 %v3975_v39, %v1139_v7  ;;  %vm1204_vm8 = vcmp.eq.f32.partialorder %v4051_v11, 0.0  ;;  %s1706_s11 = sadd.f32 (!%p2895_p3), 1.0, %s4543_s22 }
  0xb9   : > { %1104 = vst [vmem:[%s3870_s24] sm:$0xff] %v4007_v52  ;;  %1105 = vst [vmem:[%s3870_s24 + $0x8] sm:$0xff] %v4010_v53  ;;  %v1174_v26 = vsub.f32 %v3975_v39, %v1140_v21  ;;  %vm1206_vm10 = vcmp.eq.f32.partialorder %v4072_v20, 0.0  ;;  %v1132_v33 = vcvt.s32.f32 %v1128_v23  ;;  %v1175_v34 = vsub.f32 %v3975_v39, %v1141_v24 }
  0xba   : > { %1106 = vst [vmem:[%s3870_s24 + $0x10] sm:$0xff] %v4044_v4  ;;  %v4059_v9 = vmax.f32 %v1001_v36, %v1035_v5  ;;  %v1177_v22 = vmul.f32 %v1173_v17, %v4063_v16  ;;  %vm1205_vm9 = vcmp.eq.f32.partialorder %v4063_v16, 0.0  ;;  %v1044_v35 = vsub.f32 %v4007_v52, %v3967_v30  ;;  %v1147_v17 = vld [vmem:[%s3875_s0 + $0x8] sm:$0xff]  ;;  %s1754_s23 = smul.f32 (!%p2895_p3), 2.0, %s1706_s11 }
  0xbb   : > { %v4092_v36 = vadd.f32 2.0, %v3983_v41  ;;  %v4095_v37 = vadd.f32 %v1154_v27, %v4051_v11  ;;  %v4098_v38 = vadd.f32 %v1155_v29, %v4063_v16  ;;  %v1178_v40 = vmul.f32 %v1174_v26, %v4072_v20 }
  0xbc   : > { %1107 = vst [vmem:[%s3870_s24 + $0x18] sm:$0xff] %v4059_v9  ;;  %v4102_v39 = vadd.f32 %v1156_v32, %v4072_v20  ;;  %v1179_v43 = vmul.f32 %v1175_v34, %v1132_v33  ;;  %v4105_v30 = vadd.f32 %v1132_v33, %v4022_v60  ;;  %v1165_v41 = vmul.f32 %v1132_v33, %v4059_v9 }
  0xbd   : > { %vm1207_vm12 = vcmp.eq.f32.partialorder %v1132_v33, 0.0  ;;  %1261 = vst [vmem:[%s3885_s26] sm:$0xff] %v4095_v37  ;;  %vm1200_vm13 = vcmp.gt.f32.partialorder %v4095_v37, 0.0  ;;  %vm1201_vm14 = vcmp.gt.f32.partialorder %v4098_v38, 0.0  ;;  %1262 = vst [vmem:[%s3885_s26 + $0x8] sm:$0xff] %v4098_v38  ;;  %v1048_v52 = vmax.f32 %v1044_v35, 0.0 }
  0xbe   : > { %vm1202_vm15 = vcmp.gt.f32.partialorder %v4102_v39, 0.0  ;;  %v1215_v44 = vsel %vm1207_vm12, %v4068_v18, %v1141_v24  ;;  %v4120_v49 = vmax.f32 %v4059_v9, %v1179_v43  ;;  %v4123_v51 = vmax.f32 %v4016_v58, %v1165_v41  ;;  %1263 = vst [vmem:[%s3885_s26 + $0x10] sm:$0xff] %v4102_v39  ;;  %1264 = vst [vmem:[%s3885_s26 + $0x18] sm:$0xff] %v4105_v30 }
  0xbf   : > { %v1152_v48 = vld [vmem:[%s3880_s13 + $0x10] sm:$0xff]  ;;  %vm1203_vm0 = vcmp.gt.f32.partialorder %v4105_v30, 0.0  ;;  %v1208_v59 = vadd.f32 2.0, %v1150_v45  ;;  %v1209_v62 = vadd.f32 2.0, %v1151_v46  ;;  %v1045_v1 = vsub.f32 %v4010_v53, %v3969_v31 }
  0xc0   : > { %v1142_v54 = vld [vmem:[%s3870_s24] sm:$0xff]  ;;  %v1143_v55 = vld [vmem:[%s3870_s24 + $0x8] sm:$0xff]  ;;  %v1210_v0 = vadd.f32 2.0, %v1152_v48  ;;  %v1052_v8 = vsel %vm1040_vm11, %v1048_v52, 0.0  ;;  %vm1041_vm1 = vcmp.gt.f32.partialorder %v3963_v28, 1.0  ;;  %1252 = vst [vmem:[%s3870_s24 + $0x18] sm:$0xff] %v4120_v49  ;;  %v1046_v25 = vsub.f32 %v4044_v4, %v3987_v42 }
  0xc1   : > { %v1144_v56 = vld [vmem:[%s3870_s24 + $0x10] sm:$0xff]  ;;  %v1162_v2 = vmul.f32 %v1142_v54, %v4051_v11  ;;  %v1180_v5 = vmax.f32 %v1142_v54, %v1176_v19  ;;  %v4134_v6 = vmax.f32 %v1143_v55, %v1177_v22  ;;  %v1212_v14 = vsel %vm1204_vm8, %v1208_v59, %v1138_v3  ;;  %1256 = vst [vmem:[%s3875_s0 + $0x18] sm:$0xff] %v4123_v51 }
  0xc2   : > { %v4136_v10 = vmax.f32 %v1144_v56, %v1178_v40  ;;  %v1163_v31 = vmul.f32 %v1143_v55, %v4063_v16  ;;  %v1213_v53 = vsel %vm1205_vm9, %v1209_v62, %v1139_v7  ;;  %v1164_v15 = vmul.f32 %v1144_v56, %v4072_v20 }
  0xc3   : > { %1249 = vst [vmem:[%s3870_s24] sm:$0xff] %v1180_v5  ;;  %v1166_v19 = vmax.f32 %v1146_v13, %v1162_v2  ;;  %v1216_v57 = vsel %vm1200_vm13, %v1212_v14, 0.0  ;;  %v1217_v3 = vsel %vm1201_vm14, %v1213_v53, 0.0  ;;  %v1214_v61 = vsel %vm1206_vm10, %v1210_v0, %v1140_v21  ;;  %1250 = vst [vmem:[%s3870_s24 + $0x8] sm:$0xff] %v4134_v6 }
  0xc4   : > { %1257 = vst [vmem:[%s3880_s13] sm:$0xff] %v1216_v57  ;;  %v1167_v7 = vmax.f32 %v1147_v17, %v1163_v31  ;;  %v4165_v11 = vmax.f32 %v1148_v12, %v1164_v15  ;;  %v1218_v16 = vsel %vm1202_vm15, %v1214_v61, 0.0  ;;  %v4171_v22 = vsel %vm1203_vm0, %v1215_v44, 0.0  ;;  %1251 = vst [vmem:[%s3870_s24 + $0x10] sm:$0xff] %v4136_v10 }
  0xc5   : > { %1253 = vst [vmem:[%s3875_s0] sm:$0xff] %v1166_v19  ;;  %1258 = vst [vmem:[%s3880_s13 + $0x8] sm:$0xff] %v1217_v3  ;;  %v1049_v20 = vmax.f32 %v1045_v1, 0.0  ;;  %v1081_v21 = vadd.f32 2.0, %v3995_v47  ;;  %vm1076_vm2 = vcmp.gt.f32.partialorder %v1052_v8, 0.0  ;;  %vm1084_vm3 = vcmp.eq.f32.partialorder %v1052_v8, %v4092_v36 }
  0xc6   : > { %1254 = vst [vmem:[%s3875_s0 + $0x8] sm:$0xff] %v1167_v7  ;;  %1259 = vst [vmem:[%s3880_s13 + $0x10] sm:$0xff] %v1218_v16  ;;  %vm1042_vm4 = vcmp.gt.f32.partialorder %v4003_v50, 1.0  ;;  %v1082_v47 = vadd.f32 2.0, %v4030_v63  ;;  %vm1043_vm6 = vcmp.gt.f32.partialorder %v4022_v60, 1.0  ;;  %v1047_v23 = vsub.f32 %v4059_v9, %v4016_v58 }
  0xc7   : > { %1255 = vst [vmem:[%s3875_s0 + $0x10] sm:$0xff] %v4165_v11  ;;  %1260 = vst [vmem:[%s3880_s13 + $0x18] sm:$0xff] %v4171_v22  ;;  %v1053_v28 = vsel %vm1041_vm1, %v1049_v20, 0.0  ;;  %v3503_v24 = vmov 0.0   ;;  %v1050_v42 = vmax.f32 %v1046_v25, 0.0  ;;  %vm1184_vm10 = vcmp.gt.f32.partialorder %v4095_v37, 1.0 }
  0xc8   : > { %vm1088_vm5 = vmand %vm1076_vm2, %vm1084_vm3  ;;  %vm1077_vm7 = vcmp.gt.f32.partialorder %v1053_v28, 0.0  ;;  %vm1085_vm8 = vcmp.eq.f32.partialorder %v1053_v28, %v1081_v21  ;;  %v1051_v4 = vmax.f32 %v1047_v23, 0.0  ;;  %v1188_v27 = vsub.f32 %v1180_v5, %v1166_v19 }
  0xc9   : > { %v2878_v26 = vsel %vm1088_vm5, 1.0, %v3503_v24  ;;  %vm1089_vm9 = vmand %vm1077_vm7, %vm1085_vm8  ;;  %v1054_v29 = vsel %vm1042_vm4, %v1050_v42, 0.0  ;;  %v1224_v32 = vadd.f32 2.0, %v1216_v57  ;;  %v1189_v58 = vsub.f32 %v4134_v6, %v1167_v7 }
  0xca   : > { %1100 = vst [vmem:[%s3891_s28] sm:$0xff] %v2878_v26  ;;  %v2879_v63 = vsel %vm1089_vm9, 1.0, %v3503_v24  ;;  %vm1078_vm11 = vcmp.gt.f32.partialorder %v1054_v29, 0.0  ;;  %vm1086_vm12 = vcmp.eq.f32.partialorder %v1054_v29, %v1082_v47  ;;  %v1055_v9 = vsel %vm1043_vm6, %v1051_v4, 0.0 }
  0xcb   : > { %1101 = vst [vmem:[%s3891_s28 + $0x8] sm:$0xff] %v2879_v63  ;;  %v1192_v33 = vmax.f32 %v1188_v27, 0.0  ;;  %vm1090_vm13 = vmand %vm1078_vm11, %vm1086_vm12  ;;  %vm1079_vm14 = vcmp.gt.f32.partialorder %v1055_v9, 0.0  ;;  %vm1087_vm15 = vcmp.eq.f32.partialorder %v1055_v9, %v4068_v18  ;;  %vm1185_vm0 = vcmp.gt.f32.partialorder %v4098_v38, 1.0 }
  0xcc   : > { %v1193_v50 = vmax.f32 %v1189_v58, 0.0  ;;  %v2880_v34 = vsel %vm1090_vm13, 1.0, %v3503_v24  ;;  %vm1091_vm1 = vmand %vm1079_vm14, %vm1087_vm15  ;;  %v1225_v36 = vadd.f32 2.0, %v1217_v3  ;;  %v1190_v40 = vsub.f32 %v4136_v10, %v4165_v11 }
  0xcd   : > { %v1196_v35 = vsel %vm1184_vm10, %v1192_v33, 0.0  ;;  %1102 = vst [vmem:[%s3891_s28 + $0x10] sm:$0xff] %v2880_v34  ;;  %v2881_v60 = vsel %vm1091_vm1, 1.0, %v3503_v24  ;;  %v1226_v38 = vadd.f32 2.0, %v1218_v16  ;;  %vm1186_vm8 = vcmp.gt.f32.partialorder %v4102_v39, 1.0 }
  0xce   : > { %vm1220_vm2 = vcmp.gt.f32.partialorder %v1196_v35, 0.0  ;;  %vm1228_vm3 = vcmp.eq.f32.partialorder %v1196_v35, %v1224_v32  ;;  %v1197_v43 = vsel %vm1185_vm0, %v1193_v50, 0.0  ;;  %1103 = vst [vmem:[%s3891_s28 + $0x18] sm:$0xff] %v2881_v60  ;;  %v1194_v18 = vmax.f32 %v1190_v40, 0.0 }
  0xcf   : > { %vm1232_vm4 = vmand %vm1220_vm2, %vm1228_vm3  ;;  %vm1221_vm5 = vcmp.gt.f32.partialorder %v1197_v43, 0.0  ;;  %vm1229_vm6 = vcmp.eq.f32.partialorder %v1197_v43, %v1225_v36  ;;  %v1191_v37 = vsub.f32 %v4120_v49, %v4123_v51  ;;  %vm1187_vm9 = vcmp.gt.f32.partialorder %v4105_v30, 1.0 }
  0xd0   : > { %v2887_v41 = vsel %vm1232_vm4, 1.0, %v3503_v24  ;;  %vm1233_vm7 = vmand %vm1221_vm5, %vm1229_vm6  ;;  %v1198_v45 = vsel %vm1186_vm8, %v1194_v18, 0.0  ;;  %v1227_v46 = vadd.f32 2.0, %v4171_v22 }
  0xd1   : > { %2891 = vst [vmem:[%s3891_s28 + $0x20] sm:$0xff] %v2887_v41  ;;  %v2888_v44 = vsel %vm1233_vm7, 1.0, %v3503_v24  ;;  %vm1222_vm10 = vcmp.gt.f32.partialorder %v1198_v45, 0.0  ;;  %vm1230_vm11 = vcmp.eq.f32.partialorder %v1198_v45, %v1226_v38  ;;  %v1195_v48 = vmax.f32 %v1191_v37, 0.0 }
  0xd2   : > { %2892 = vst [vmem:[%s3891_s28 + $0x28] sm:$0xff] %v2888_v44  ;;  %vm1234_vm12 = vmand %vm1222_vm10, %vm1230_vm11 }
  0xd3   : > { %v2889_v52 = vsel %vm1234_vm12, 1.0, %v3503_v24  ;;  %v1199_v54 = vsel %vm1187_vm9, %v1195_v48, 0.0  ;;  %1268 = sbr.rel (%p2895_p3) target bundleno = 354 (0x162), region = 156 }
  0xd4   : > { %2893 = vst [vmem:[%s3891_s28 + $0x30] sm:$0xff] %v2889_v52  ;;  %vm1223_vm13 = vcmp.gt.f32.partialorder %v1199_v54, 0.0  ;;  %vm1231_vm14 = vcmp.eq.f32.partialorder %v1199_v54, %v1227_v46 }
  0xd5   : > { %vm1235_vm15 = vmand %vm1223_vm13, %vm1231_vm14 }
  0xd6   : > { %v2890_v39 = vsel %vm1235_vm15, 1.0, %v3503_v24 }
  0xd7   : > { %2894 = vst [vmem:[%s3891_s28 + $0x38] sm:$0xff] %v2890_v39 }
  0xd8   : > { %v2896_v30 = vld [vmem:[%s3887_s20 + $0x10] sm:$0xff]  ;;  %v1303_v55 = vld [vmem:[%s3885_s26] sm:$0xff]  ;;  %v1304_v56 = vld [vmem:[%s3885_s26 + $0x8] sm:$0xff]  ;;  %v1320_v28 = vstv %s1319_s16  ;;  %s4678_s16 = scvt.s32.f32 %s1849_s6 }
  0xd9   : > { %v1274_v49 = vunpack.c.0.s8 %v2896_v30  ;;  %v1275_v51 = vunpack.c.1.s8 %v2896_v30  ;;  %v2897_v59 = vld [vmem:[%s3889_s29 + $0x40] sm:$0xff]  ;;  %v1276_v62 = vunpack.c.2.s8 %v2896_v30  ;;  %v1277_v0 = vunpack.c.3.s8 %v2896_v30  ;;  %v1305_v1 = vld [vmem:[%s3885_s26 + $0x10] sm:$0xff]  ;;  %v1300_v6 = vld [vmem:[%s3880_s13 + $0x8] sm:$0xff] }
  0xda   : > { %v1287_v2 = vmax.f32 %v2897_v59, 0.0  ;;  %v1299_v5 = vld [vmem:[%s3880_s13] sm:$0xff]  ;;  %v1306_v13 = vld [vmem:[%s3885_s26 + $0x18] sm:$0xff]  ;;  %v1358_v31 = vadd.f32 2.0, %v1300_v6  ;;  %v2898_v53 = vld [vmem:[%s3889_s29 + $0x48] sm:$0xff]  ;;  %s1851_s1 = sadd.f32 1.0, %s4678_s16 }
  0xdb   : > { %v1278_v10 = vcvt.s32.f32 %v1274_v49  ;;  %v1279_v12 = vcvt.s32.f32 %v1275_v51  ;;  %v1357_v14 = vadd.f32 2.0, %v1299_v5  ;;  %v2899_v15 = vld [vmem:[%s3889_s29 + $0x50] sm:$0xff]  ;;  %v4237_v17 = vcvt.s32.f32 %v1276_v62  ;;  %v1302_v16 = vld [vmem:[%s3880_s13 + $0x18] sm:$0xff]  ;;  %v1291_v47 = vld [vmem:[%s3870_s24] sm:$0xff] }
  0xdc   : > { %v1288_v19 = vmax.f32 %v2898_v53, 0.0  ;;  %v4239_v57 = vcvt.s32.f32 %v1277_v0  ;;  %v1289_v3 = vmax.f32 %v2899_v15, 0.0  ;;  %v1301_v11 = vld [vmem:[%s3880_s13 + $0x10] sm:$0xff]  ;;  %v2900_v25 = vld [vmem:[%s3889_s29 + $0x58] sm:$0xff]  ;;  %v1321_v23 = vsub.f32 %v1320_v28, %v1287_v2  ;;  %v1292_v4 = vld [vmem:[%s3870_s24 + $0x8] sm:$0xff]  ;;  %s1899_s3 = smul.f32 2.0, %s1851_s1 }
  0xdd   : > { %v4241_v61 = vadd.f32 %v1303_v55, %v1278_v10  ;;  %v4243_v7 = vadd.f32 %v1304_v56, %v1279_v12  ;;  %vm1353_vm0 = vcmp.eq.f32.partialorder %v1278_v10, 0.0  ;;  %vm1354_vm1 = vcmp.eq.f32.partialorder %v1279_v12, 0.0  ;;  %v1295_v32 = vld [vmem:[%s3875_s0] sm:$0xff]  ;;  %v1293_v58 = vld [vmem:[%s3870_s24 + $0x10] sm:$0xff]  ;;  %v1296_v33 = vld [vmem:[%s3875_s0 + $0x8] sm:$0xff] }
  0xde   : > { %v1361_v22 = vsel %vm1353_vm0, %v1357_v14, %v1287_v2  ;;  %v4248_v8 = vadd.f32 %v1305_v1, %v4237_v17  ;;  %v1362_v20 = vsel %vm1354_vm1, %v1358_v31, %v1288_v19  ;;  %v4251_v21 = vadd.f32 %v1306_v13, %v4239_v57  ;;  %v1297_v35 = vld [vmem:[%s3875_s0 + $0x10] sm:$0xff]  ;;  %v1298_v36 = vld [vmem:[%s3875_s0 + $0x18] sm:$0xff]  ;;  %v4308_v39 = vld [vmem:[%s3889_s29 + $0x60] sm:$0xff] }
  0xdf   : > { %1410 = vst [vmem:[%s3885_s26] sm:$0xff] %v4241_v61  ;;  %vm1349_vm2 = vcmp.gt.f32.partialorder %v4241_v61, 0.0  ;;  %vm1350_vm3 = vcmp.gt.f32.partialorder %v4243_v7, 0.0  ;;  %vm1355_vm4 = vcmp.eq.f32.partialorder %v4237_v17, 0.0  ;;  %1411 = vst [vmem:[%s3885_s26 + $0x8] sm:$0xff] %v4243_v7  ;;  %v1322_v26 = vsub.f32 %v1320_v28, %v1288_v19  ;;  %v1294_v40 = vld [vmem:[%s3870_s24 + $0x18] sm:$0xff]  ;;  %v2911_v1 = vld [vmem:[%s3889_s29 + $0x68] sm:$0xff] }
  0xe0   : > { %v4264_v24 = vsel %vm1349_vm2, %v1361_v22, 0.0  ;;  %v4266_v42 = vsel %vm1350_vm3, %v1362_v20, 0.0  ;;  %1412 = vst [vmem:[%s3885_s26 + $0x10] sm:$0xff] %v4248_v8  ;;  %v1323_v27 = vsub.f32 %v1320_v28, %v1289_v3  ;;  %vm1351_vm5 = vcmp.gt.f32.partialorder %v4248_v8, 0.0  ;;  %1413 = vst [vmem:[%s3885_s26 + $0x18] sm:$0xff] %v4251_v21  ;;  %v2909_v45 = vld [vmem:[%s3887_s20 + $0x18] sm:$0xff] }
  0xe1   : > { %1406 = vst [vmem:[%s3880_s13] sm:$0xff] %v4264_v24  ;;  %v1359_v63 = vadd.f32 2.0, %v1301_v11  ;;  %v1290_v29 = vmax.f32 %v2900_v25, 0.0  ;;  %1407 = vst [vmem:[%s3880_s13 + $0x8] sm:$0xff] %v4266_v42  ;;  %vm1352_vm6 = vcmp.gt.f32.partialorder %v4251_v21, 0.0  ;;  %vm1356_vm7 = vcmp.eq.f32.partialorder %v4239_v57, 0.0  ;;  %v2912_v2 = vld [vmem:[%s3889_s29 + $0x70] sm:$0xff] }
  0xe2   : > { %v1360_v9 = vadd.f32 2.0, %v1302_v16  ;;  %v1311_v50 = vmul.f32 %v1291_v47, %v1278_v10  ;;  %v1312_v60 = vmul.f32 %v1292_v4, %v1279_v12  ;;  %v1325_v43 = vmul.f32 %v1321_v23, %v1278_v10 }
  0xe3   : > { %v1363_v34 = vsel %vm1355_vm4, %v1359_v63, %v1289_v3  ;;  %v1326_v18 = vmul.f32 %v1322_v26, %v1279_v12  ;;  %v1313_v44 = vmul.f32 %v1293_v58, %v4237_v17  ;;  %v1327_v51 = vmul.f32 %v1323_v27, %v4237_v17 }
  0xe4   : > { %v4291_v38 = vsel %vm1351_vm5, %v1363_v34, 0.0  ;;  %v1364_v41 = vsel %vm1356_vm7, %v1360_v9, %v1290_v29  ;;  %v4293_v37 = vmax.f32 %v1295_v32, %v1311_v50  ;;  %v4301_v48 = vmax.f32 %v1296_v33, %v1312_v60  ;;  %v2922_v60 = vld [vmem:[%s3887_s20 + $0x20] sm:$0xff] }
  0xe5   : > { %1408 = vst [vmem:[%s3880_s13 + $0x10] sm:$0xff] %v4291_v38  ;;  %v1368_v46 = vsel %vm1352_vm6, %v1364_v41, 0.0  ;;  %v4303_v52 = vmax.f32 %v1291_v47, %v1325_v43  ;;  %v4305_v54 = vmax.f32 %v1292_v4, %v1326_v18  ;;  %v4315_v49 = vmax.f32 %v1297_v35, %v1313_v44  ;;  %v2913_v4 = vld [vmem:[%s3889_s29 + $0x78] sm:$0xff] }
  0xe6   : > { %v4310_v30 = vadd.f32 2.0, %v1368_v46  ;;  %1409 = vst [vmem:[%s3880_s13 + $0x18] sm:$0xff] %v1368_v46  ;;  %1402 = vst [vmem:[%s3875_s0] sm:$0xff] %v4293_v37  ;;  %v1314_v55 = vmul.f32 %v1294_v40, %v4239_v57  ;;  %v1324_v56 = vsub.f32 %v1320_v28, %v1290_v29  ;;  %v1419_v59 = vunpack.c.0.s8 %v2909_v45  ;;  %v1448_v31 = vld [vmem:[%s3885_s26] sm:$0xff]  ;;  %v1449_v53 = vld [vmem:[%s3885_s26 + $0x8] sm:$0xff] }
  0xe7   : > { %1398 = vst [vmem:[%s3870_s24] sm:$0xff] %v4303_v52  ;;  %1403 = vst [vmem:[%s3875_s0 + $0x8] sm:$0xff] %v4301_v48  ;;  %v1420_v62 = vunpack.c.1.s8 %v2909_v45  ;;  %v1421_v0 = vunpack.c.2.s8 %v2909_v45  ;;  %v4329_v5 = vmax.f32 %v1293_v58, %v1327_v51  ;;  %v1422_v10 = vunpack.c.3.s8 %v2909_v45  ;;  %v1450_v15 = vld [vmem:[%s3885_s26 + $0x10] sm:$0xff] }
  0xe8   : > { %1399 = vst [vmem:[%s3870_s24 + $0x8] sm:$0xff] %v4305_v54  ;;  %1404 = vst [vmem:[%s3875_s0 + $0x10] sm:$0xff] %v4315_v49  ;;  %v4331_v6 = vmax.f32 %v1298_v36, %v1314_v55  ;;  %v1432_v12 = vmax.f32 %v4308_v39, 0.0  ;;  %v1328_v13 = vmul.f32 %v1324_v56, %v4239_v57  ;;  %v4335_v14 = vcvt.s32.f32 %v1419_v59  ;;  %v1444_v27 = vld [vmem:[%s3880_s13] sm:$0xff]  ;;  %v1445_v63 = vld [vmem:[%s3880_s13 + $0x8] sm:$0xff] }
  0xe9   : > { %v4340_v17 = vcvt.s32.f32 %v1420_v62  ;;  %v4342_v19 = vcvt.s32.f32 %v1421_v0  ;;  %1400 = vst [vmem:[%s3870_s24 + $0x10] sm:$0xff] %v4329_v5  ;;  %v1426_v3 = vcvt.s32.f32 %v1422_v10  ;;  %v1433_v57 = vmax.f32 %v2911_v1, 0.0 }
  0xea   : > { %1405 = vst [vmem:[%s3875_s0 + $0x18] sm:$0xff] %v4331_v6  ;;  %v1465_v11 = vstv %s1464_s4  ;;  %v1434_v16 = vmax.f32 %v2912_v2, 0.0  ;;  %v4348_v22 = vmax.f32 %v1294_v40, %v1328_v13  ;;  %v4351_v20 = vadd.f32 %v1448_v31, %v4335_v14  ;;  %s1994_s4 = sadd.s32 7, %s3928_s2 }
  0xeb   : > { %v4354_v25 = vadd.f32 %v1449_v53, %v4340_v17  ;;  %v4357_v28 = vadd.f32 %v1450_v15, %v4342_v19  ;;  %v4360_v47 = vadd.f32 %v1426_v3, %v4251_v21  ;;  %vm1498_vm8 = vcmp.eq.f32.partialorder %v4335_v14, 0.0  ;;  %s4834_s21 = scvt.s32.f32 %s1994_s4 }
  0xec   : > { %v1466_v23 = vsub.f32 %v1465_v11, %v1432_v12  ;;  %v1467_v26 = vsub.f32 %v1465_v11, %v1433_v57  ;;  %1401 = vst [vmem:[%s3870_s24 + $0x18] sm:$0xff] %v4348_v22  ;;  %1555 = vst [vmem:[%s3885_s26] sm:$0xff] %v4351_v20  ;;  %v1446_v29 = vld [vmem:[%s3880_s13 + $0x10] sm:$0xff]  ;;  %vm1494_vm9 = vcmp.gt.f32.partialorder %v4351_v20, 0.0  ;;  %vm1499_vm11 = vcmp.eq.f32.partialorder %v4340_v17, 0.0 }
  0xed   : > { %vm1495_vm10 = vcmp.gt.f32.partialorder %v4354_v25, 0.0  ;;  %v1468_v32 = vsub.f32 %v1465_v11, %v1434_v16  ;;  %1556 = vst [vmem:[%s3885_s26 + $0x8] sm:$0xff] %v4354_v25  ;;  %v1502_v58 = vadd.f32 2.0, %v1444_v27  ;;  %v1503_v33 = vadd.f32 2.0, %v1445_v63  ;;  %1557 = vst [vmem:[%s3885_s26 + $0x10] sm:$0xff] %v4357_v28 }
  0xee   : > { %v1471_v9 = vmul.f32 %v1467_v26, %v4340_v17  ;;  %vm1496_vm12 = vcmp.gt.f32.partialorder %v4357_v28, 0.0  ;;  %vm1500_vm13 = vcmp.eq.f32.partialorder %v4342_v19, 0.0  ;;  %v1504_v50 = vadd.f32 2.0, %v1446_v29  ;;  %1558 = vst [vmem:[%s3885_s26 + $0x18] sm:$0xff] %v4360_v47  ;;  %v1436_v0 = vld [vmem:[%s3870_s24] sm:$0xff] }
  0xef   : > { %v1470_v34 = vmul.f32 %v1466_v23, %v4335_v14  ;;  %v1435_v35 = vmax.f32 %v2913_v4, 0.0  ;;  %v1506_v36 = vsel %vm1498_vm8, %v1502_v58, %v1432_v12  ;;  %v1507_v40 = vsel %vm1499_vm11, %v1503_v33, %v1433_v57  ;;  %v1437_v1 = vld [vmem:[%s3870_s24 + $0x8] sm:$0xff]  ;;  %v1442_v57 = vld [vmem:[%s3875_s0 + $0x10] sm:$0xff] }
  0xf0   : > { %vm1497_vm14 = vcmp.gt.f32.partialorder %v4360_v47, 0.0  ;;  %vm1501_vm15 = vcmp.eq.f32.partialorder %v1426_v3, 0.0  ;;  %v1510_v43 = vsel %vm1494_vm9, %v1506_v36, 0.0  ;;  %v1511_v18 = vsel %vm1495_vm10, %v1507_v40, 0.0  ;;  %v1438_v2 = vld [vmem:[%s3870_s24 + $0x10] sm:$0xff] }
  0xf1   : > { %v1508_v41 = vsel %vm1500_vm13, %v1504_v50, %v1434_v16  ;;  %v1469_v44 = vsub.f32 %v1465_v11, %v1435_v35  ;;  %1551 = vst [vmem:[%s3880_s13] sm:$0xff] %v1510_v43  ;;  %v1509_v46 = vsel %vm1501_vm15, %v4310_v30, %v1435_v35  ;;  %v1472_v39 = vmul.f32 %v1468_v32, %v4342_v19  ;;  %v1440_v11 = vld [vmem:[%s3875_s0] sm:$0xff]  ;;  %v1441_v16 = vld [vmem:[%s3875_s0 + $0x8] sm:$0xff] }
  0xf2   : > { %v4395_v45 = vsel %vm1496_vm12, %v1508_v41, 0.0  ;;  %v1459_v51 = vmul.f32 %v1426_v3, %v4348_v22  ;;  %1552 = vst [vmem:[%s3880_s13 + $0x8] sm:$0xff] %v1511_v18  ;;  %v4401_v55 = vsel %vm1497_vm14, %v1509_v46, 0.0  ;;  %v1564_v59 = vunpack.c.0.s8 %v2922_v60  ;;  %v4455_v41 = vld [vmem:[%s3889_s29 + $0x80] sm:$0xff] }
  0xf3   : > { %v1473_v56 = vmul.f32 %v1469_v44, %v1426_v3  ;;  %v1565_v62 = vunpack.c.1.s8 %v2922_v60  ;;  %1553 = vst [vmem:[%s3880_s13 + $0x10] sm:$0xff] %v4395_v45  ;;  %v1566_v12 = vunpack.c.2.s8 %v2922_v60  ;;  %v1567_v13 = vunpack.c.3.s8 %v2922_v60  ;;  %1554 = vst [vmem:[%s3880_s13 + $0x18] sm:$0xff] %v4401_v55  ;;  %v1593_v63 = vld [vmem:[%s3885_s26] sm:$0xff] }
  0xf4   : > { %v4410_v10 = vmax.f32 %v4331_v6, %v1459_v51  ;;  %vm1478_vm0 = vcmp.gt.f32.partialorder %v4351_v20, 1.0  ;;  %v1456_v31 = vmul.f32 %v1436_v0, %v4335_v14  ;;  %v1474_v53 = vmax.f32 %v1436_v0, %v1470_v34  ;;  %v1594_v29 = vld [vmem:[%s3885_s26 + $0x8] sm:$0xff]  ;;  %v1595_v32 = vld [vmem:[%s3885_s26 + $0x10] sm:$0xff] }
  0xf5   : > { %v1475_v15 = vmax.f32 %v1437_v1, %v1471_v9  ;;  %v1476_v3 = vmax.f32 %v1438_v2, %v1472_v39  ;;  %v4420_v23 = vmax.f32 %v4348_v22, %v1473_v56  ;;  %v1457_v26 = vmul.f32 %v1437_v1, %v4340_v17 }
  0xf6   : > { %v1458_v4 = vmul.f32 %v1438_v2, %v4342_v19  ;;  %v4424_v14 = vcvt.s32.f32 %v1564_v59  ;;  %1543 = vst [vmem:[%s3870_s24] sm:$0xff] %v1474_v53  ;;  %v1460_v27 = vmax.f32 %v1440_v11, %v1456_v31  ;;  %v4432_v58 = vcvt.s32.f32 %v1565_v62  ;;  %1550 = vst [vmem:[%s3875_s0 + $0x18] sm:$0xff] %v4410_v10 }
  0xf7   : > { %v4434_v9 = vcvt.s32.f32 %v1566_v12  ;;  %v4436_v17 = vcvt.s32.f32 %v1567_v13  ;;  %1544 = vst [vmem:[%s3870_s24 + $0x8] sm:$0xff] %v1475_v15  ;;  %v1461_v19 = vmax.f32 %v1441_v16, %v1457_v26  ;;  %v1518_v34 = vadd.f32 2.0, %v1510_v43  ;;  %1545 = vst [vmem:[%s3870_s24 + $0x10] sm:$0xff] %v1476_v3 }
  0xf8   : > { %v1462_v33 = vmax.f32 %v1442_v57, %v1458_v4  ;;  %v4440_v50 = vadd.f32 %v1593_v63, %v4424_v14  ;;  %1547 = vst [vmem:[%s3875_s0] sm:$0xff] %v1460_v27  ;;  %v4445_v35 = vadd.f32 %v1594_v29, %v4432_v58  ;;  %v1482_v60 = vsub.f32 %v1474_v53, %v1460_v27  ;;  %v1589_v0 = vld [vmem:[%s3880_s13] sm:$0xff]  ;;  %v2924_v53 = vld [vmem:[%s3889_s29 + $0x88] sm:$0xff] }
  0xf9   : > { %v4448_v36 = vadd.f32 %v1595_v32, %v4434_v9  ;;  %v4452_v40 = vadd.f32 %v4436_v17, %v4360_v47  ;;  %1546 = vst [vmem:[%s3870_s24 + $0x18] sm:$0xff] %v4420_v23  ;;  %1548 = vst [vmem:[%s3875_s0 + $0x8] sm:$0xff] %v1461_v19  ;;  %vm1479_vm1 = vcmp.gt.f32.partialorder %v4354_v25, 1.0  ;;  %v1483_v43 = vsub.f32 %v1475_v15, %v1461_v19  ;;  %v2925_v15 = vld [vmem:[%s3889_s29 + $0x90] sm:$0xff] }
  0xfa   : > { %1700 = vst [vmem:[%s3885_s26] sm:$0xff] %v4440_v50  ;;  %v1519_v44 = vadd.f32 2.0, %v1511_v18  ;;  %vm1480_vm2 = vcmp.gt.f32.partialorder %v4357_v28, 1.0  ;;  %1549 = vst [vmem:[%s3875_s0 + $0x10] sm:$0xff] %v1462_v33  ;;  %v1486_v46 = vmax.f32 %v1482_v60, 0.0  ;;  %v1484_v39 = vsub.f32 %v1476_v3, %v1462_v33  ;;  %v1590_v3 = vld [vmem:[%s3880_s13 + $0x8] sm:$0xff]  ;;  %v1591_v16 = vld [vmem:[%s3880_s13 + $0x10] sm:$0xff] }
  0xfb   : > { %1701 = vst [vmem:[%s3885_s26 + $0x8] sm:$0xff] %v4445_v35  ;;  %v1520_v51 = vadd.f32 2.0, %v4395_v45  ;;  %vm1481_vm3 = vcmp.gt.f32.partialorder %v4360_v47, 1.0  ;;  %1702 = vst [vmem:[%s3885_s26 + $0x10] sm:$0xff] %v4448_v36  ;;  %v1487_v56 = vmax.f32 %v1483_v43, 0.0  ;;  %v1485_v18 = vsub.f32 %v4420_v23, %v4410_v10  ;;  %v2926_v33 = vld [vmem:[%s3889_s29 + $0x98] sm:$0xff] }
  0xfc   : > { %v4477_v59 = vadd.f32 2.0, %v4401_v55  ;;  %v1577_v62 = vmax.f32 %v4455_v41, 0.0  ;;  %1703 = vst [vmem:[%s3885_s26 + $0x18] sm:$0xff] %v4452_v40  ;;  %v1490_v45 = vsel %vm1478_vm0, %v1486_v46, 0.0  ;;  %v1488_v1 = vmax.f32 %v1484_v39, 0.0 }
  0xfd   : > { %vm1639_vm4 = vcmp.gt.f32.partialorder %v4440_v50, 0.0  ;;  %vm1643_vm5 = vcmp.eq.f32.partialorder %v4424_v14, 0.0  ;;  %vm1514_vm6 = vcmp.gt.f32.partialorder %v1490_v45, 0.0  ;;  %vm1522_vm7 = vcmp.eq.f32.partialorder %v1490_v45, %v1518_v34  ;;  %v1581_v11 = vld [vmem:[%s3870_s24] sm:$0xff] }
  0xfe   : > { %v1491_v55 = vsel %vm1479_vm1, %v1487_v56, 0.0  ;;  %v1489_v2 = vmax.f32 %v1485_v18, 0.0  ;;  %vm1526_vm8 = vmand %vm1514_vm6, %vm1522_vm7  ;;  %v1492_v20 = vsel %vm1480_vm2, %v1488_v1, 0.0  ;;  %v1647_v12 = vadd.f32 2.0, %v1589_v0  ;;  %v1582_v46 = vld [vmem:[%s3870_s24 + $0x8] sm:$0xff]  ;;  %v1583_v39 = vld [vmem:[%s3870_s24 + $0x10] sm:$0xff] }
  0xff   : > { %vm1515_vm9 = vcmp.gt.f32.partialorder %v1491_v55, 0.0  ;;  %vm1523_vm10 = vcmp.eq.f32.partialorder %v1491_v55, %v1519_v44  ;;  %v3504_v13 = vmov 0.0   ;;  %vm1516_vm12 = vcmp.gt.f32.partialorder %v1492_v20, 0.0  ;;  %v1585_v19 = vld [vmem:[%s3875_s0] sm:$0xff] }
 0x100   : > { %v2914_v31 = vsel %vm1526_vm8, 1.0, %v3504_v13  ;;  %vm1527_vm11 = vmand %vm1515_vm9, %vm1523_vm10  ;;  %vm1524_vm13 = vcmp.eq.f32.partialorder %v1492_v20, %v1520_v51  ;;  %v1493_v25 = vsel %vm1481_vm3, %v1489_v2, 0.0  ;;  %v1651_v57 = vsel %vm1643_vm5, %v1647_v12, %v1577_v62  ;;  %v1586_v55 = vld [vmem:[%s3875_s0 + $0x8] sm:$0xff] }
 0x101   : > { %2918 = vst [vmem:[%s3891_s28 + $0x60] sm:$0xff] %v2914_v31  ;;  %v2915_v28 = vsel %vm1527_vm11, 1.0, %v3504_v13  ;;  %vm1528_vm14 = vmand %vm1516_vm12, %vm1524_vm13  ;;  %vm1517_vm15 = vcmp.gt.f32.partialorder %v1493_v25, 0.0  ;;  %vm1525_vm0 = vcmp.eq.f32.partialorder %v1493_v25, %v4477_v59  ;;  %v4508_v26 = vsel %vm1639_vm4, %v1651_v57, 0.0  ;;  %v1587_v2 = vld [vmem:[%s3875_s0 + $0x10] sm:$0xff]  ;;  %v2935_v25 = vld [vmem:[%s3887_s20 + $0x28] sm:$0xff] }
 0x102   : > { %2919 = vst [vmem:[%s3891_s28 + $0x68] sm:$0xff] %v2915_v28  ;;  %v2916_v47 = vsel %vm1528_vm14, 1.0, %v3504_v13  ;;  %vm1529_vm1 = vmand %vm1517_vm15, %vm1525_vm0  ;;  %v1601_v4 = vmul.f32 %v1581_v11, %v4424_v14  ;;  %v1610_v27 = vstv %s1609_s12  ;;  %v1578_v32 = vmax.f32 %v2924_v53, 0.0 }
 0x103   : > { %2920 = vst [vmem:[%s3891_s28 + $0x70] sm:$0xff] %v2916_v47  ;;  %v2917_v63 = vsel %vm1529_vm1, 1.0, %v3504_v13  ;;  %1696 = vst [vmem:[%s3880_s13] sm:$0xff] %v4508_v26  ;;  %v1611_v29 = vsub.f32 %v1610_v27, %v1577_v62  ;;  %vm1640_vm2 = vcmp.gt.f32.partialorder %v4445_v35, 0.0  ;;  %vm1644_vm3 = vcmp.eq.f32.partialorder %v4432_v58, 0.0 }
 0x104   : > { %2921 = vst [vmem:[%s3891_s28 + $0x78] sm:$0xff] %v2917_v63  ;;  %v1648_v34 = vadd.f32 2.0, %v1590_v3  ;;  %v1579_v60 = vmax.f32 %v2925_v15, 0.0  ;;  %vm1641_vm4 = vcmp.gt.f32.partialorder %v4448_v36, 0.0  ;;  %v1612_v43 = vsub.f32 %v1610_v27, %v1578_v32  ;;  %v1738_v63 = vld [vmem:[%s3885_s26] sm:$0xff] }
 0x105   : > { %v1615_v41 = vmul.f32 %v1611_v29, %v4424_v14  ;;  %vm1645_vm5 = vcmp.eq.f32.partialorder %v4434_v9, 0.0  ;;  %v1649_v44 = vadd.f32 2.0, %v1591_v16  ;;  %v1605_v18 = vmax.f32 %v1585_v19, %v1601_v4  ;;  %v1739_v19 = vld [vmem:[%s3885_s26 + $0x8] sm:$0xff] }
 0x106   : > { %v1652_v51 = vsel %vm1644_vm3, %v1648_v34, %v1578_v32  ;;  %v1613_v56 = vsub.f32 %v1610_v27, %v1579_v60  ;;  %v1580_v62 = vmax.f32 %v2926_v33, 0.0  ;;  %v1616_v14 = vmul.f32 %v1612_v43, %v4432_v58  ;;  %v1740_v33 = vld [vmem:[%s3885_s26 + $0x10] sm:$0xff] }
 0x107   : > { %v1619_v0 = vmax.f32 %v1581_v11, %v1615_v41  ;;  %v1656_v45 = vsel %vm1640_vm2, %v1652_v51, 0.0  ;;  %v1653_v1 = vsel %vm1645_vm5, %v1649_v44, %v1579_v60  ;;  %1692 = vst [vmem:[%s3875_s0] sm:$0xff] %v1605_v18  ;;  %vm1642_vm6 = vcmp.gt.f32.partialorder %v4452_v40, 0.0 }
 0x108   : > { %1697 = vst [vmem:[%s3880_s13 + $0x8] sm:$0xff] %v1656_v45  ;;  %v1657_v20 = vsel %vm1641_vm4, %v1653_v1, 0.0  ;;  %v1617_v12 = vmul.f32 %v1613_v56, %v4434_v9  ;;  %v1614_v31 = vsub.f32 %v1610_v27, %v1580_v62  ;;  %v1620_v53 = vmax.f32 %v1582_v46, %v1616_v14  ;;  %v4598_v1 = vld [vmem:[%s3889_s29 + $0xa0] sm:$0xff] }
 0x109   : > { %1688 = vst [vmem:[%s3870_s24] sm:$0xff] %v1619_v0  ;;  %1698 = vst [vmem:[%s3880_s13 + $0x10] sm:$0xff] %v1657_v20  ;;  %vm1646_vm7 = vcmp.eq.f32.partialorder %v4436_v17, 0.0  ;;  %v1602_v15 = vmul.f32 %v1582_v46, %v4432_v58  ;;  %v1603_v28 = vmul.f32 %v1583_v39, %v4434_v9  ;;  %v1604_v47 = vmul.f32 %v4436_v17, %v4420_v23 }
 0x10a   : > { %v1621_v3 = vmax.f32 %v1583_v39, %v1617_v12  ;;  %v1654_v57 = vsel %vm1646_vm7, %v4477_v59, %v1580_v62  ;;  %v1618_v11 = vmul.f32 %v1614_v31, %v4436_v17  ;;  %1689 = vst [vmem:[%s3870_s24 + $0x8] sm:$0xff] %v1620_v53  ;;  %v1709_v27 = vunpack.c.0.s8 %v2935_v25 }
 0x10b   : > { %v1658_v16 = vsel %vm1642_vm6, %v1654_v57, 0.0  ;;  %v1606_v4 = vmax.f32 %v1586_v55, %v1602_v15  ;;  %v1607_v58 = vmax.f32 %v1587_v2, %v1603_v28  ;;  %v4556_v59 = vmax.f32 %v4410_v10, %v1604_v47  ;;  %v4604_v55 = vld [vmem:[%s3889_s29 + $0xa8] sm:$0xff]  ;;  %v1734_v47 = vld [vmem:[%s3880_s13] sm:$0xff] }
 0x10c   : > { %1690 = vst [vmem:[%s3870_s24 + $0x10] sm:$0xff] %v1621_v3  ;;  %1699 = vst [vmem:[%s3880_s13 + $0x18] sm:$0xff] %v1658_v16  ;;  %v4553_v9 = vmax.f32 %v4420_v23, %v1618_v11  ;;  %v1710_v29 = vunpack.c.1.s8 %v2935_v25  ;;  %v1711_v17 = vunpack.c.2.s8 %v2935_v25  ;;  %v4560_v32 = vcvt.s32.f32 %v1709_v27 }
 0x10d   : > { %1693 = vst [vmem:[%s3875_s0 + $0x8] sm:$0xff] %v1606_v4  ;;  %v1712_v34 = vunpack.c.3.s8 %v2935_v25  ;;  %vm1623_vm8 = vcmp.gt.f32.partialorder %v4440_v50, 1.0  ;;  %v1627_v60 = vsub.f32 %v1619_v0, %v1605_v18  ;;  %1694 = vst [vmem:[%s3875_s0 + $0x10] sm:$0xff] %v1607_v58  ;;  %v1663_v41 = vadd.f32 2.0, %v4508_v26 }
 0x10e   : > { %1691 = vst [vmem:[%s3870_s24 + $0x18] sm:$0xff] %v4553_v9  ;;  %v4569_v10 = vcvt.s32.f32 %v1710_v29  ;;  %v4571_v23 = vcvt.s32.f32 %v1711_v17  ;;  %vm1624_vm9 = vcmp.gt.f32.partialorder %v4445_v35, 1.0  ;;  %1695 = vst [vmem:[%s3875_s0 + $0x18] sm:$0xff] %v4556_v59  ;;  %v4578_v43 = vadd.f32 %v1738_v63, %v4560_v32  ;;  %v1730_v27 = vld [vmem:[%s3875_s0] sm:$0xff] }
 0x10f   : > { %v4580_v44 = vcvt.s32.f32 %v1712_v34  ;;  %v1631_v46 = vmax.f32 %v1627_v60, 0.0  ;;  %v1628_v39 = vsub.f32 %v1620_v53, %v1606_v4  ;;  %v1664_v26 = vadd.f32 2.0, %v1656_v45  ;;  %v2939_v60 = vld [vmem:[%s3889_s29 + $0xb8] sm:$0xff] }
 0x110   : > { %v4583_v51 = vadd.f32 %v1739_v19, %v4569_v10  ;;  %v4586_v56 = vadd.f32 %v1740_v33, %v4571_v23  ;;  %vm1625_vm10 = vcmp.gt.f32.partialorder %v4448_v36, 1.0  ;;  %1845 = vst [vmem:[%s3885_s26] sm:$0xff] %v4578_v43  ;;  %v1629_v14 = vsub.f32 %v1621_v3, %v1607_v58  ;;  %v1726_v15 = vld [vmem:[%s3870_s24] sm:$0xff]  ;;  %v1735_v19 = vld [vmem:[%s3880_s13 + $0x8] sm:$0xff] }
 0x111   : > { %v4593_v18 = vadd.f32 %v4580_v44, %v4452_v40  ;;  %v1635_v62 = vsel %vm1623_vm8, %v1631_v46, 0.0  ;;  %v1632_v0 = vmax.f32 %v1628_v39, 0.0  ;;  %v1665_v45 = vadd.f32 2.0, %v1657_v20  ;;  %v1727_v29 = vld [vmem:[%s3870_s24 + $0x8] sm:$0xff]  ;;  %v1736_v46 = vld [vmem:[%s3880_s13 + $0x10] sm:$0xff] }
 0x112   : > { %1846 = vst [vmem:[%s3885_s26 + $0x8] sm:$0xff] %v4583_v51  ;;  %vm1659_vm11 = vcmp.gt.f32.partialorder %v1635_v62, 0.0  ;;  %vm1667_vm12 = vcmp.eq.f32.partialorder %v1635_v62, %v1663_v41  ;;  %vm1626_vm13 = vcmp.gt.f32.partialorder %v4452_v40, 1.0  ;;  %1847 = vst [vmem:[%s3885_s26 + $0x10] sm:$0xff] %v4586_v56  ;;  %v1633_v2 = vmax.f32 %v1629_v14, 0.0 }
 0x113   : > { %vm1671_vm14 = vmand %vm1659_vm11, %vm1667_vm12  ;;  %v1636_v50 = vsel %vm1624_vm9, %v1632_v0, 0.0  ;;  %v1630_v12 = vsub.f32 %v4553_v9, %v4556_v59  ;;  %v4612_v31 = vadd.f32 2.0, %v1658_v16  ;;  %1848 = vst [vmem:[%s3885_s26 + $0x18] sm:$0xff] %v4593_v18  ;;  %v1722_v25 = vmax.f32 %v4598_v1, 0.0  ;;  %v2938_v16 = vld [vmem:[%s3889_s29 + $0xb0] sm:$0xff] }
 0x114   : > { %v2927_v20 = vsel %vm1671_vm14, 1.0, %v3504_v13  ;;  %vm1660_vm15 = vcmp.gt.f32.partialorder %v1636_v50, 0.0  ;;  %vm1668_vm0 = vcmp.eq.f32.partialorder %v1636_v50, %v1664_v26  ;;  %v1637_v35 = vsel %vm1625_vm10, %v1633_v2, 0.0  ;;  %v1728_v26 = vld [vmem:[%s3870_s24 + $0x10] sm:$0xff] }
 0x115   : > { %2931 = vst [vmem:[%s3891_s28 + $0x80] sm:$0xff] %v2927_v20  ;;  %vm1672_vm1 = vmand %vm1660_vm15, %vm1668_vm0  ;;  %v1634_v53 = vmax.f32 %v1630_v12, 0.0  ;;  %v1755_v28 = vstv %s1754_s23  ;;  %v1723_v3 = vmax.f32 %v4604_v55, 0.0  ;;  %vm1661_vm2 = vcmp.gt.f32.partialorder %v1637_v35, 0.0  ;;  %v1732_v55 = vld [vmem:[%s3875_s0 + $0x10] sm:$0xff] }
 0x116   : > { %v2928_v57 = vsel %vm1672_vm1, 1.0, %v3504_v13  ;;  %vm1669_vm3 = vcmp.eq.f32.partialorder %v1637_v35, %v1665_v45  ;;  %v1746_v11 = vmul.f32 %v1726_v15, %v4560_v32  ;;  %v1756_v4 = vsub.f32 %v1755_v28, %v1722_v25  ;;  %v1731_v45 = vld [vmem:[%s3875_s0 + $0x8] sm:$0xff] }
 0x117   : > { %2932 = vst [vmem:[%s3891_s28 + $0x88] sm:$0xff] %v2928_v57  ;;  %vm1673_vm4 = vmand %vm1661_vm2, %vm1669_vm3  ;;  %v1638_v36 = vsel %vm1626_vm13, %v1634_v53, 0.0  ;;  %v1757_v58 = vsub.f32 %v1755_v28, %v1723_v3  ;;  %vm1784_vm5 = vcmp.gt.f32.partialorder %v4578_v43, 0.0  ;;  %vm1788_vm8 = vcmp.eq.f32.partialorder %v4560_v32, 0.0 }
 0x118   : > { %v2929_v63 = vsel %vm1673_vm4, 1.0, %v3504_v13  ;;  %vm1662_vm6 = vcmp.gt.f32.partialorder %v1638_v36, 0.0  ;;  %vm1670_vm7 = vcmp.eq.f32.partialorder %v1638_v36, %v4612_v31  ;;  %v1760_v40 = vmul.f32 %v1756_v4, %v4560_v32 }
 0x119   : > { %2933 = vst [vmem:[%s3891_s28 + $0x90] sm:$0xff] %v2929_v63  ;;  %vm1674_vm9 = vmand %vm1662_vm6, %vm1670_vm7  ;;  %v1761_v17 = vmul.f32 %v1757_v58, %v4569_v10  ;;  %v1792_v33 = vadd.f32 2.0, %v1734_v47  ;;  %v1724_v34 = vmax.f32 %v2938_v16, 0.0  ;;  %v4643_v39 = vmax.f32 %v1730_v27, %v1746_v11  ;;  %v2948_v11 = vld [vmem:[%s3887_s20 + $0x30] sm:$0xff] }
 0x11a   : > { %v2930_v41 = vsel %vm1674_vm9, 1.0, %v3504_v13  ;;  %vm1785_vm10 = vcmp.gt.f32.partialorder %v4583_v51, 0.0  ;;  %vm1789_vm11 = vcmp.eq.f32.partialorder %v4569_v10, 0.0  ;;  %v4649_v62 = vmax.f32 %v1726_v15, %v1760_v40  ;;  %v1883_v40 = vld [vmem:[%s3885_s26] sm:$0xff] }
 0x11b   : > { %2934 = vst [vmem:[%s3891_s28 + $0x98] sm:$0xff] %v2930_v41  ;;  %v4651_v0 = vmax.f32 %v1727_v29, %v1761_v17  ;;  %v1796_v14 = vsel %vm1788_vm8, %v1792_v33, %v1722_v25  ;;  %v1758_v1 = vsub.f32 %v1755_v28, %v1724_v34  ;;  %1837 = vst [vmem:[%s3875_s0] sm:$0xff] %v4643_v39  ;;  %v1793_v2 = vadd.f32 2.0, %v1735_v19  ;;  %v1884_v17 = vld [vmem:[%s3885_s26 + $0x8] sm:$0xff] }
 0x11c   : > { %v1800_v50 = vsel %vm1784_vm5, %v1796_v14, 0.0  ;;  %v1725_v12 = vmax.f32 %v2939_v60, 0.0  ;;  %v1747_v20 = vmul.f32 %v1727_v29, %v4569_v10  ;;  %1833 = vst [vmem:[%s3870_s24] sm:$0xff] %v4649_v62  ;;  %vm1786_vm12 = vcmp.gt.f32.partialorder %v4586_v56, 0.0 }
 0x11d   : > { %1841 = vst [vmem:[%s3880_s13] sm:$0xff] %v1800_v50  ;;  %v1762_v32 = vmul.f32 %v1758_v1, %v4571_v23  ;;  %vm1790_vm13 = vcmp.eq.f32.partialorder %v4571_v23, 0.0  ;;  %v1794_v25 = vadd.f32 2.0, %v1736_v46  ;;  %1834 = vst [vmem:[%s3870_s24 + $0x8] sm:$0xff] %v4651_v0  ;;  %v1797_v35 = vsel %vm1789_vm11, %v1793_v2, %v1723_v3 }
 0x11e   : > { %v1759_v53 = vsub.f32 %v1755_v28, %v1725_v12  ;;  %v1751_v15 = vmax.f32 %v1731_v45, %v1747_v20  ;;  %v1748_v57 = vmul.f32 %v1728_v26, %v4571_v23  ;;  %v1801_v16 = vsel %vm1785_vm10, %v1797_v35, 0.0  ;;  %v4751_v35 = vld [vmem:[%s3889_s29 + $0xc8] sm:$0xff] }
 0x11f   : > { %v1766_v47 = vmax.f32 %v1728_v26, %v1762_v32  ;;  %v1798_v36 = vsel %vm1790_vm13, %v1794_v25, %v1724_v34  ;;  %vm1787_vm14 = vcmp.gt.f32.partialorder %v4593_v18, 0.0  ;;  %1842 = vst [vmem:[%s3880_s13 + $0x8] sm:$0xff] %v1801_v16  ;;  %vm1791_vm15 = vcmp.eq.f32.partialorder %v4580_v44, 0.0  ;;  %v1885_v34 = vld [vmem:[%s3885_s26 + $0x10] sm:$0xff] }
 0x120   : > { %v1763_v10 = vmul.f32 %v1759_v53, %v4580_v44  ;;  %1838 = vst [vmem:[%s3875_s0 + $0x8] sm:$0xff] %v1751_v15  ;;  %v1802_v23 = vsel %vm1786_vm12, %v1798_v36, 0.0  ;;  %v1752_v28 = vmax.f32 %v1732_v55, %v1748_v57  ;;  %v1799_v3 = vsel %vm1791_vm15, %v4612_v31, %v1725_v12 }
 0x121   : > { %1835 = vst [vmem:[%s3870_s24 + $0x10] sm:$0xff] %v1766_v47  ;;  %1843 = vst [vmem:[%s3880_s13 + $0x10] sm:$0xff] %v1802_v23  ;;  %v1749_v4 = vmul.f32 %v4580_v44, %v4553_v9  ;;  %v1854_v58 = vunpack.c.0.s8 %v2948_v11  ;;  %v1855_v27 = vunpack.c.1.s8 %v2948_v11  ;;  %v1803_v29 = vsel %vm1787_vm14, %v1799_v3, 0.0 }
 0x122   : > { %v4692_v63 = vmax.f32 %v4553_v9, %v1763_v10  ;;  %1839 = vst [vmem:[%s3875_s0 + $0x10] sm:$0xff] %v1752_v28  ;;  %v1856_v19 = vunpack.c.2.s8 %v2948_v11  ;;  %v1857_v33 = vunpack.c.3.s8 %v2948_v11  ;;  %1844 = vst [vmem:[%s3880_s13 + $0x18] sm:$0xff] %v1803_v29  ;;  %vm1768_vm0 = vcmp.gt.f32.partialorder %v4578_v43, 1.0  ;;  %v4761_v11 = vld [vmem:[%s3889_s29 + $0xd0] sm:$0xff] }
 0x123   : > { %v4701_v31 = vmax.f32 %v4556_v59, %v1749_v4  ;;  %v4703_v44 = vcvt.s32.f32 %v1854_v58  ;;  %v4706_v60 = vcvt.s32.f32 %v1855_v27  ;;  %v1772_v46 = vsub.f32 %v4649_v62, %v4643_v39 }
 0x124   : > { %1836 = vst [vmem:[%s3870_s24 + $0x18] sm:$0xff] %v4692_v63  ;;  %v4712_v9 = vcvt.s32.f32 %v1856_v19  ;;  %v4714_v41 = vcvt.s32.f32 %v1857_v33  ;;  %v1808_v59 = vadd.f32 2.0, %v1800_v50  ;;  %vm1769_vm1 = vcmp.gt.f32.partialorder %v4583_v51, 1.0  ;;  %v1872_v4 = vld [vmem:[%s3870_s24 + $0x8] sm:$0xff]  ;;  %v1879_v33 = vld [vmem:[%s3880_s13] sm:$0xff] }
 0x125   : > { %1840 = vst [vmem:[%s3875_s0 + $0x18] sm:$0xff] %v4701_v31  ;;  %v4721_v26 = vadd.f32 %v1883_v40, %v4703_v44  ;;  %v4724_v14 = vadd.f32 %v1884_v17, %v4706_v60  ;;  %v1773_v1 = vsub.f32 %v4651_v0, %v1751_v15  ;;  %v1776_v62 = vmax.f32 %v1772_v46, 0.0  ;;  %v4739_v0 = vld [vmem:[%s3889_s29 + $0xc0] sm:$0xff] }
 0x126   : > { %v4729_v45 = vadd.f32 %v1885_v34, %v4712_v9  ;;  %v4733_v39 = vadd.f32 %v4714_v41, %v4593_v18  ;;  %v1809_v55 = vadd.f32 2.0, %v1801_v16  ;;  %vm1770_vm2 = vcmp.gt.f32.partialorder %v4586_v56, 1.0  ;;  %v1871_v16 = vld [vmem:[%s3870_s24] sm:$0xff] }
 0x127   : > { %1990 = vst [vmem:[%s3885_s26] sm:$0xff] %v4721_v26  ;;  %v1777_v50 = vmax.f32 %v1773_v1, 0.0  ;;  %v1774_v2 = vsub.f32 %v1766_v47, %v1752_v28  ;;  %v1810_v12 = vadd.f32 2.0, %v1802_v23  ;;  %1991 = vst [vmem:[%s3885_s26 + $0x8] sm:$0xff] %v4724_v14  ;;  %v1780_v20 = vsel %vm1768_vm0, %v1776_v62, 0.0  ;;  %v4769_v23 = vld [vmem:[%s3889_s29 + $0xd8] sm:$0xff]  ;;  %v1875_v56 = vld [vmem:[%s3875_s0] sm:$0xff] }
 0x128   : > { %vm1771_vm3 = vcmp.gt.f32.partialorder %v4593_v18, 1.0  ;;  %v1775_v32 = vsub.f32 %v4692_v63, %v4701_v31  ;;  %v4748_v25 = vadd.f32 2.0, %v1803_v29  ;;  %1992 = vst [vmem:[%s3885_s26 + $0x10] sm:$0xff] %v4729_v45  ;;  %vm1804_vm4 = vcmp.gt.f32.partialorder %v1780_v20, 0.0  ;;  %1993 = vst [vmem:[%s3885_s26 + $0x18] sm:$0xff] %v4733_v39  ;;  %v1876_v17 = vld [vmem:[%s3875_s0 + $0x8] sm:$0xff] }
 0x129   : > { %vm1812_vm5 = vcmp.eq.f32.partialorder %v1780_v20, %v1808_v59  ;;  %v1781_v43 = vsel %vm1769_vm1, %v1777_v50, 0.0  ;;  %v1778_v53 = vmax.f32 %v1774_v2, 0.0  ;;  %v1867_v57 = vmax.f32 %v4739_v0, 0.0  ;;  %v1873_v46 = vld [vmem:[%s3870_s24 + $0x10] sm:$0xff]  ;;  %v1880_v0 = vld [vmem:[%s3880_s13 + $0x8] sm:$0xff] }
 0x12a   : > { %vm1816_vm6 = vmand %vm1804_vm4, %vm1812_vm5  ;;  %vm1805_vm7 = vcmp.gt.f32.partialorder %v1781_v43, 0.0  ;;  %vm1813_vm8 = vcmp.eq.f32.partialorder %v1781_v43, %v1809_v55  ;;  %v1779_v15 = vmax.f32 %v1775_v32, 0.0  ;;  %v1900_v36 = vstv %s1899_s3  ;;  %v1877_v2 = vld [vmem:[%s3875_s0 + $0x10] sm:$0xff] }
 0x12b   : > { %v2940_v47 = vsel %vm1816_vm6, 1.0, %v3504_v13  ;;  %vm1817_vm9 = vmand %vm1805_vm7, %vm1813_vm8  ;;  %v1782_v51 = vsel %vm1770_vm2, %v1778_v53, 0.0  ;;  %v1868_v10 = vmax.f32 %v4751_v35, 0.0  ;;  %v1891_v58 = vmul.f32 %v1871_v16, %v4703_v44 }
 0x12c   : > { %2944 = vst [vmem:[%s3891_s28 + $0xa0] sm:$0xff] %v2940_v47  ;;  %v2941_v28 = vsel %vm1817_vm9, 1.0, %v3504_v13  ;;  %vm1806_vm10 = vcmp.gt.f32.partialorder %v1782_v51, 0.0  ;;  %vm1814_vm11 = vcmp.eq.f32.partialorder %v1782_v51, %v1810_v12  ;;  %v1783_v3 = vsel %vm1771_vm3, %v1779_v15, 0.0  ;;  %v1881_v47 = vld [vmem:[%s3880_s13 + $0x10] sm:$0xff] }
 0x12d   : > { %2945 = vst [vmem:[%s3891_s28 + $0xa8] sm:$0xff] %v2941_v28  ;;  %vm1818_vm12 = vmand %vm1806_vm10, %vm1814_vm11  ;;  %vm1807_vm13 = vcmp.gt.f32.partialorder %v1783_v3, 0.0  ;;  %vm1815_vm14 = vcmp.eq.f32.partialorder %v1783_v3, %v4748_v25  ;;  %v1901_v27 = vsub.f32 %v1900_v36, %v1867_v57  ;;  %v1902_v18 = vsub.f32 %v1900_v36, %v1868_v10  ;;  %v2961_v28 = vld [vmem:[%s3887_s20 + $0x38] sm:$0xff]  ;;  %s1996_s20 = sadd.f32 1.0, %s4834_s21 }
 0x12e   : > { %v2942_v29 = vsel %vm1818_vm12, 1.0, %v3504_v13  ;;  %vm1819_vm15 = vmand %vm1807_vm13, %vm1815_vm14  ;;  %v1869_v40 = vmax.f32 %v4761_v11, 0.0  ;;  %v1870_v19 = vmax.f32 %v4769_v23, 0.0  ;;  %v4789_v1 = vmax.f32 %v1875_v56, %v1891_v58 }
 0x12f   : > { %2946 = vst [vmem:[%s3891_s28 + $0xb0] sm:$0xff] %v2942_v29  ;;  %v2943_v34 = vsel %vm1819_vm15, 1.0, %v3504_v13  ;;  %v1905_v59 = vmul.f32 %v1901_v27, %v4703_v44  ;;  %v1892_v62 = vmul.f32 %v1872_v4, %v4706_v60  ;;  %v1906_v55 = vmul.f32 %v1902_v18, %v4706_v60  ;;  %v2028_v18 = vld [vmem:[%s3885_s26] sm:$0xff]  ;;  %s2044_s25 = smul.f32 2.0, %s1996_s20 }
 0x130   : > { %2947 = vst [vmem:[%s3891_s28 + $0xb8] sm:$0xff] %v2943_v34  ;;  %v1903_v50 = vsub.f32 %v1900_v36, %v1869_v40  ;;  %v1904_v12 = vsub.f32 %v1900_v36, %v1870_v19  ;;  %vm1929_vm0 = vcmp.gt.f32.partialorder %v4721_v26, 0.0  ;;  %1982 = vst [vmem:[%s3875_s0] sm:$0xff] %v4789_v1  ;;  %vm1933_vm1 = vcmp.eq.f32.partialorder %v4703_v44, 0.0 }
 0x131   : > { %v4797_v20 = vmax.f32 %v1871_v16, %v1905_v59  ;;  %v4801_v32 = vmax.f32 %v1876_v17, %v1892_v62  ;;  %v1937_v35 = vadd.f32 2.0, %v1879_v33  ;;  %v4804_v43 = vmax.f32 %v1872_v4, %v1906_v55  ;;  %v2029_v17 = vld [vmem:[%s3885_s26 + $0x8] sm:$0xff] }
 0x132   : > { %v1907_v53 = vmul.f32 %v1903_v50, %v4712_v9  ;;  %v1908_v15 = vmul.f32 %v1904_v12, %v4714_v41  ;;  %v1893_v11 = vmul.f32 %v1873_v46, %v4712_v9  ;;  %vm1930_vm2 = vcmp.gt.f32.partialorder %v4724_v14, 0.0 }
 0x133   : > { %1978 = vst [vmem:[%s3870_s24] sm:$0xff] %v4797_v20  ;;  %1983 = vst [vmem:[%s3875_s0 + $0x8] sm:$0xff] %v4801_v32  ;;  %v1941_v51 = vsel %vm1933_vm1, %v1937_v35, %v1867_v57  ;;  %vm1934_vm3 = vcmp.eq.f32.partialorder %v4706_v60, 0.0  ;;  %v1938_v44 = vadd.f32 2.0, %v1880_v0  ;;  %v1894_v60 = vmul.f32 %v4714_v41, %v4692_v63 }
 0x134   : > { %1979 = vst [vmem:[%s3870_s24 + $0x8] sm:$0xff] %v4804_v43  ;;  %v4819_v16 = vmax.f32 %v1873_v46, %v1907_v53  ;;  %v4822_v36 = vmax.f32 %v4692_v63, %v1908_v15  ;;  %v1945_v23 = vsel %vm1929_vm0, %v1941_v51, 0.0  ;;  %v4826_v57 = vmax.f32 %v1877_v2, %v1893_v11  ;;  %v2030_v46 = vld [vmem:[%s3885_s26 + $0x10] sm:$0xff]  ;;  %v4894_v53 = vld [vmem:[%s3889_s29 + $0xe0] sm:$0xff] }
 0x135   : > { %1986 = vst [vmem:[%s3880_s13] sm:$0xff] %v1945_v23  ;;  %v1942_v3 = vsel %vm1934_vm3, %v1938_v44, %v1868_v10  ;;  %vm1931_vm4 = vcmp.gt.f32.partialorder %v4729_v45, 0.0  ;;  %vm1935_vm5 = vcmp.eq.f32.partialorder %v4712_v9, 0.0  ;;  %v1939_v10 = vadd.f32 2.0, %v1881_v47 }
 0x136   : > { %1980 = vst [vmem:[%s3870_s24 + $0x10] sm:$0xff] %v4819_v16  ;;  %1984 = vst [vmem:[%s3875_s0 + $0x10] sm:$0xff] %v4826_v57  ;;  %v1946_v4 = vsel %vm1930_vm2, %v1942_v3, 0.0  ;;  %vm1932_vm6 = vcmp.gt.f32.partialorder %v4733_v39, 0.0  ;;  %vm1936_vm7 = vcmp.eq.f32.partialorder %v4714_v41, 0.0  ;;  %v4848_v63 = vmax.f32 %v4701_v31, %v1894_v60 }
 0x137   : > { %1981 = vst [vmem:[%s3870_s24 + $0x18] sm:$0xff] %v4822_v36  ;;  %1987 = vst [vmem:[%s3880_s13 + $0x8] sm:$0xff] %v1946_v4  ;;  %v1944_v9 = vsel %vm1936_vm7, %v4748_v25, %v1870_v19  ;;  %v1999_v56 = vunpack.c.0.s8 %v2961_v28  ;;  %v2000_v58 = vunpack.c.1.s8 %v2961_v28  ;;  %v1943_v27 = vsel %vm1935_vm5, %v1939_v10, %v1869_v40  ;;  %v2020_v10 = vld [vmem:[%s3875_s0] sm:$0xff] }
 0x138   : > { %v1948_v29 = vsel %vm1932_vm6, %v1944_v9, 0.0  ;;  %v2001_v33 = vunpack.c.2.s8 %v2961_v28  ;;  %v2002_v41 = vunpack.c.3.s8 %v2961_v28  ;;  %1985 = vst [vmem:[%s3875_s0 + $0x18] sm:$0xff] %v4848_v63  ;;  %v1947_v34 = vsel %vm1931_vm4, %v1943_v27, 0.0  ;;  %v4917_v28 = vld [vmem:[%s3889_s29 + $0xf0] sm:$0xff]  ;;  %v4925_v9 = vld [vmem:[%s3889_s29 + $0xf8] sm:$0xff] }
 0x139   : > { %v4857_v31 = vcvt.s32.f32 %v1999_v56  ;;  %v4860_v59 = vcvt.s32.f32 %v2000_v58  ;;  %vm1913_vm8 = vcmp.gt.f32.partialorder %v4721_v26, 1.0  ;;  %1988 = vst [vmem:[%s3880_s13 + $0x10] sm:$0xff] %v1947_v34  ;;  %v1917_v19 = vsub.f32 %v4797_v20, %v4789_v1  ;;  %1989 = vst [vmem:[%s3880_s13 + $0x18] sm:$0xff] %v1948_v29 }
 0x13a   : > { %v4865_v25 = vcvt.s32.f32 %v2001_v33  ;;  %v4867_v40 = vcvt.s32.f32 %v2002_v41  ;;  %v1953_v62 = vadd.f32 2.0, %v1945_v23  ;;  %vm1914_vm9 = vcmp.gt.f32.partialorder %v4724_v14, 1.0  ;;  %v2016_v51 = vld [vmem:[%s3870_s24] sm:$0xff]  ;;  %v2021_v33 = vld [vmem:[%s3875_s0 + $0x8] sm:$0xff] }
 0x13b   : > { %v4873_v55 = vadd.f32 %v2028_v18, %v4857_v31  ;;  %v4876_v50 = vadd.f32 %v2029_v17, %v4860_v59  ;;  %v1918_v2 = vsub.f32 %v4804_v43, %v4801_v32  ;;  %v1921_v0 = vmax.f32 %v1917_v19, 0.0  ;;  %v2017_v27 = vld [vmem:[%s3870_s24 + $0x8] sm:$0xff] }
 0x13c   : > { %v4882_v12 = vadd.f32 %v2030_v46, %v4865_v25  ;;  %v4886_v1 = vadd.f32 %v4867_v40, %v4733_v39  ;;  %v1954_v20 = vadd.f32 2.0, %v1946_v4  ;;  %vm1915_vm10 = vcmp.gt.f32.partialorder %v4729_v45, 1.0 }
 0x13d   : > { %2135 = vst [vmem:[%s3885_s26] sm:$0xff] %v4873_v55  ;;  %v1922_v35 = vmax.f32 %v1918_v2, 0.0  ;;  %v1919_v32 = vsub.f32 %v4819_v16, %v4826_v57  ;;  %v1955_v43 = vadd.f32 2.0, %v1947_v34  ;;  %2136 = vst [vmem:[%s3885_s26 + $0x8] sm:$0xff] %v4876_v50  ;;  %v1925_v15 = vsel %vm1913_vm8, %v1921_v0, 0.0  ;;  %v4914_v57 = vld [vmem:[%s3889_s29 + $0xe8] sm:$0xff]  ;;  %v2018_v45 = vld [vmem:[%s3870_s24 + $0x10] sm:$0xff] }
 0x13e   : > { %vm1916_vm11 = vcmp.gt.f32.partialorder %v4733_v39, 1.0  ;;  %v1920_v11 = vsub.f32 %v4822_v36, %v4848_v63  ;;  %v4903_v47 = vadd.f32 2.0, %v1948_v29  ;;  %2137 = vst [vmem:[%s3885_s26 + $0x10] sm:$0xff] %v4882_v12  ;;  %vm1949_vm12 = vcmp.gt.f32.partialorder %v1925_v15, 0.0  ;;  %2138 = vst [vmem:[%s3885_s26 + $0x18] sm:$0xff] %v4886_v1  ;;  %v2022_v2 = vld [vmem:[%s3875_s0 + $0x10] sm:$0xff] }
 0x13f   : > { %vm1957_vm13 = vcmp.eq.f32.partialorder %v1925_v15, %v1953_v62  ;;  %v1926_v44 = vsel %vm1914_vm9, %v1922_v35, 0.0  ;;  %v1923_v26 = vmax.f32 %v1919_v32, 0.0  ;;  %v2012_v23 = vmax.f32 %v4894_v53, 0.0  ;;  %v2024_v15 = vld [vmem:[%s3880_s13] sm:$0xff] }
 0x140   : > { %vm1961_vm14 = vmand %vm1949_vm12, %vm1957_vm13  ;;  %vm1950_vm15 = vcmp.gt.f32.partialorder %v1926_v44, 0.0  ;;  %vm1958_vm0 = vcmp.eq.f32.partialorder %v1926_v44, %v1954_v20  ;;  %v1924_v16 = vmax.f32 %v1920_v11, 0.0  ;;  %v2036_v60 = vmul.f32 %v2016_v51, %v4857_v31 }
 0x141   : > { %v2953_v14 = vsel %vm1961_vm14, 1.0, %v3504_v13  ;;  %vm1962_vm1 = vmand %vm1950_vm15, %vm1958_vm0  ;;  %v1927_v3 = vsel %vm1915_vm10, %v1923_v26, 0.0  ;;  %v2045_v4 = vstv %s2044_s25  ;;  %v2013_v18 = vmax.f32 %v4914_v57, 0.0 }
 0x142   : > { %2957 = vst [vmem:[%s3891_s28 + $0xc0] sm:$0xff] %v2953_v14  ;;  %v2954_v56 = vsel %vm1962_vm1, 1.0, %v3504_v13  ;;  %vm1951_vm2 = vcmp.gt.f32.partialorder %v1927_v3, 0.0  ;;  %vm1959_vm3 = vcmp.eq.f32.partialorder %v1927_v3, %v1955_v43  ;;  %v1928_v58 = vsel %vm1916_vm11, %v1924_v16, 0.0  ;;  %v2025_v16 = vld [vmem:[%s3880_s13 + $0x8] sm:$0xff]  ;;  %v2026_v3 = vld [vmem:[%s3880_s13 + $0x10] sm:$0xff] }
 0x143   : > { %2958 = vst [vmem:[%s3891_s28 + $0xc8] sm:$0xff] %v2954_v56  ;;  %vm1963_vm4 = vmand %vm1951_vm2, %vm1959_vm3  ;;  %vm1952_vm5 = vcmp.gt.f32.partialorder %v1928_v58, 0.0  ;;  %vm1960_vm6 = vcmp.eq.f32.partialorder %v1928_v58, %v4903_v47  ;;  %v2046_v29 = vsub.f32 %v2045_v4, %v2012_v23  ;;  %v2014_v39 = vmax.f32 %v4917_v28, 0.0 }
 0x144   : > { %v2955_v17 = vsel %vm1963_vm4, 1.0, %v3504_v13  ;;  %vm1964_vm7 = vmand %vm1952_vm5, %vm1960_vm6  ;;  %v4941_v41 = vmax.f32 %v2020_v10, %v2036_v60  ;;  %v2015_v34 = vmax.f32 %v4925_v9, 0.0  ;;  %v2047_v62 = vsub.f32 %v2045_v4, %v2013_v18 }
 0x145   : > { %2959 = vst [vmem:[%s3891_s28 + $0xd0] sm:$0xff] %v2955_v17  ;;  %v2956_v46 = vsel %vm1964_vm7, 1.0, %v3504_v13  ;;  %v2050_v19 = vmul.f32 %v2046_v29, %v4857_v31  ;;  %v2037_v0 = vmul.f32 %v2017_v27, %v4860_v59  ;;  %v2048_v20 = vsub.f32 %v2045_v4, %v2014_v39 }
 0x146   : > { %2960 = vst [vmem:[%s3891_s28 + $0xd8] sm:$0xff] %v2956_v46  ;;  %2127 = vst [vmem:[%s3875_s0] sm:$0xff] %v4941_v41  ;;  %v2049_v35 = vsub.f32 %v2045_v4, %v2015_v34  ;;  %v2038_v32 = vmul.f32 %v2018_v45, %v4865_v25  ;;  %v2039_v43 = vmul.f32 %v4867_v40, %v4822_v36  ;;  %vm2074_vm8 = vcmp.gt.f32.partialorder %v4873_v55, 0.0 }
 0x147   : > { %v4956_v11 = vmax.f32 %v2016_v51, %v2050_v19  ;;  %v2051_v44 = vmul.f32 %v2047_v62, %v4860_v59  ;;  %v4959_v26 = vmax.f32 %v2021_v33, %v2037_v0  ;;  %v2052_v57 = vmul.f32 %v2048_v20, %v4865_v25 }
 0x148   : > { %v2053_v28 = vmul.f32 %v2049_v35, %v4867_v40  ;;  %v4964_v14 = vmax.f32 %v2022_v2, %v2038_v32  ;;  %v4975_v60 = vmax.f32 %v4848_v63, %v2039_v43  ;;  %vm2078_vm9 = vcmp.eq.f32.partialorder %v4857_v31, 0.0 }
 0x149   : > { %2123 = vst [vmem:[%s3870_s24] sm:$0xff] %v4956_v11  ;;  %v4970_v51 = vmax.f32 %v2017_v27, %v2051_v44  ;;  %2128 = vst [vmem:[%s3875_s0 + $0x8] sm:$0xff] %v4959_v26  ;;  %v2082_v4 = vadd.f32 2.0, %v2024_v15  ;;  %v4978_v10 = vmax.f32 %v2018_v45, %v2052_v57  ;;  %vm2075_vm10 = vcmp.gt.f32.partialorder %v4876_v50, 0.0 }
 0x14a   : > { %2129 = vst [vmem:[%s3875_s0 + $0x10] sm:$0xff] %v4964_v14  ;;  %vm2079_vm11 = vcmp.eq.f32.partialorder %v4860_v59, 0.0  ;;  %v2083_v9 = vadd.f32 2.0, %v2025_v16  ;;  %v4987_v56 = vmax.f32 %v4822_v36, %v2053_v28  ;;  %2130 = vst [vmem:[%s3875_s0 + $0x18] sm:$0xff] %v4975_v60  ;;  %vm2080_vm12 = vcmp.eq.f32.partialorder %v4865_v25, 0.0 }
 0x14b   : > { %2124 = vst [vmem:[%s3870_s24 + $0x8] sm:$0xff] %v4970_v51  ;;  %v2086_v63 = vsel %vm2078_vm9, %v2082_v4, %v2012_v23  ;;  %v2084_v31 = vadd.f32 2.0, %v2026_v3  ;;  %2125 = vst [vmem:[%s3870_s24 + $0x10] sm:$0xff] %v4978_v10  ;;  %vm2077_vm13 = vcmp.gt.f32.partialorder %v4886_v1, 0.0  ;;  %vm2081_vm14 = vcmp.eq.f32.partialorder %v4867_v40, 0.0 }
 0x14c   : > { %v2090_v59 = vsel %vm2074_vm8, %v2086_v63, 0.0  ;;  %v2087_v58 = vsel %vm2079_vm11, %v2083_v9, %v2013_v18  ;;  %2126 = vst [vmem:[%s3870_s24 + $0x18] sm:$0xff] %v4987_v56  ;;  %vm2076_vm15 = vcmp.gt.f32.partialorder %v4882_v12, 0.0  ;;  %v2089_v53 = vsel %vm2081_vm14, %v4903_v47, %v2015_v34 }
 0x14d   : > { %2131 = vst [vmem:[%s3880_s13] sm:$0xff] %v2090_v59  ;;  %v2091_v36 = vsel %vm2075_vm10, %v2087_v58, 0.0  ;;  %v2088_v25 = vsel %vm2080_vm12, %v2084_v31, %v2014_v39  ;;  %v2093_v27 = vsel %vm2077_vm13, %v2089_v53, 0.0  ;;  %vm1333_vm0 = vcmp.gt.f32.partialorder %v4241_v61, 1.0 }
 0x14e   : > { %2132 = vst [vmem:[%s3880_s13 + $0x8] sm:$0xff] %v2091_v36  ;;  %v2092_v23 = vsel %vm2076_vm15, %v2088_v25, 0.0  ;;  %v1337_v40 = vsub.f32 %v4303_v52, %v4293_v37  ;;  %v1373_v45 = vadd.f32 2.0, %v4264_v24  ;;  %vm1334_vm1 = vcmp.gt.f32.partialorder %v4243_v7, 1.0  ;;  %2134 = vst [vmem:[%s3880_s13 + $0x18] sm:$0xff] %v2093_v27 }
 0x14f   : > { %2133 = vst [vmem:[%s3880_s13 + $0x10] sm:$0xff] %v2092_v23  ;;  %v1338_v29 = vsub.f32 %v4305_v54, %v4301_v48  ;;  %v1374_v18 = vadd.f32 2.0, %v4266_v42  ;;  %vm1335_vm2 = vcmp.gt.f32.partialorder %v4248_v8, 1.0  ;;  %v1339_v17 = vsub.f32 %v4329_v5, %v4315_v49 }
 0x150   : > { %v1341_v47 = vmax.f32 %v1337_v40, 0.0  ;;  %v1375_v39 = vadd.f32 2.0, %v4291_v38  ;;  %vm1336_vm3 = vcmp.gt.f32.partialorder %v4251_v21, 1.0  ;;  %v1340_v24 = vsub.f32 %v4348_v22, %v4331_v6 }
 0x151   : > { %v1342_v37 = vmax.f32 %v1338_v29, 0.0  ;;  %v2062_v48 = vsub.f32 %v4956_v11, %v4941_v41  ;;  %v1343_v52 = vmax.f32 %v1339_v17, 0.0  ;;  %vm2058_vm4 = vcmp.gt.f32.partialorder %v4873_v55, 1.0 }
 0x152   : > { %v1345_v42 = vsel %vm1333_vm0, %v1341_v47, 0.0  ;;  %v2098_v54 = vadd.f32 2.0, %v2090_v59  ;;  %v1344_v49 = vmax.f32 %v1340_v24, 0.0  ;;  %v2063_v21 = vsub.f32 %v4970_v51, %v4959_v26 }
 0x153   : > { %vm1369_vm5 = vcmp.gt.f32.partialorder %v1345_v42, 0.0  ;;  %vm1377_vm6 = vcmp.eq.f32.partialorder %v1345_v42, %v1373_v45  ;;  %v1346_v38 = vsel %vm1334_vm1, %v1342_v37, 0.0  ;;  %v1347_v5 = vsel %vm1335_vm2, %v1343_v52, 0.0 }
 0x154   : > { %vm1381_vm7 = vmand %vm1369_vm5, %vm1377_vm6  ;;  %vm1370_vm8 = vcmp.gt.f32.partialorder %v1346_v38, 0.0  ;;  %vm1378_vm9 = vcmp.eq.f32.partialorder %v1346_v38, %v1374_v18  ;;  %v2066_v61 = vmax.f32 %v2062_v48, 0.0  ;;  %vm1371_vm11 = vcmp.gt.f32.partialorder %v1347_v5, 0.0 }
 0x155   : > { %v2901_v6 = vsel %vm1381_vm7, 1.0, %v3504_v13  ;;  %vm1382_vm10 = vmand %vm1370_vm8, %vm1378_vm9  ;;  %vm1379_vm12 = vcmp.eq.f32.partialorder %v1347_v5, %v1375_v39  ;;  %v1348_v22 = vsel %vm1336_vm3, %v1344_v49, 0.0  ;;  %v2099_v34 = vadd.f32 2.0, %v2091_v36 }
 0x156   : > { %2905 = vst [vmem:[%s3891_s28 + $0x40] sm:$0xff] %v2901_v6  ;;  %v2902_v7 = vsel %vm1382_vm10, 1.0, %v3504_v13  ;;  %vm1383_vm13 = vmand %vm1371_vm11, %vm1379_vm12  ;;  %vm1372_vm14 = vcmp.gt.f32.partialorder %v1348_v22, 0.0  ;;  %vm1380_vm15 = vcmp.eq.f32.partialorder %v1348_v22, %v4310_v30  ;;  %v2070_v8 = vsel %vm2058_vm4, %v2066_v61, 0.0 }
 0x157   : > { %2906 = vst [vmem:[%s3891_s28 + $0x48] sm:$0xff] %v2902_v7  ;;  %v2903_v33 = vsel %vm1383_vm13, 1.0, %v3504_v13  ;;  %vm1384_vm0 = vmand %vm1372_vm14, %vm1380_vm15  ;;  %vm2094_vm1 = vcmp.gt.f32.partialorder %v2070_v8, 0.0  ;;  %vm2102_vm2 = vcmp.eq.f32.partialorder %v2070_v8, %v2098_v54  ;;  %v2064_v30 = vsub.f32 %v4978_v10, %v4964_v14 }
 0x158   : > { %2907 = vst [vmem:[%s3891_s28 + $0x50] sm:$0xff] %v2903_v33  ;;  %v2904_v41 = vsel %vm1384_vm0, 1.0, %v3504_v13  ;;  %vm2106_vm3 = vmand %vm2094_vm1, %vm2102_vm2  ;;  %v2067_v46 = vmax.f32 %v2063_v21, 0.0  ;;  %v2100_v19 = vadd.f32 2.0, %v2092_v23  ;;  %vm2059_vm4 = vcmp.gt.f32.partialorder %v4876_v50, 1.0 }
 0x159   : > { %2908 = vst [vmem:[%s3891_s28 + $0x58] sm:$0xff] %v2904_v41  ;;  %v2966_v55 = vsel %vm2106_vm3, 1.0, %v3504_v13  ;;  %v2068_v62 = vmax.f32 %v2064_v30, 0.0  ;;  %v2065_v2 = vsub.f32 %v4987_v56, %v4975_v60  ;;  %vm2060_vm5 = vcmp.gt.f32.partialorder %v4882_v12, 1.0 }
 0x15a   : > { %2970 = vst [vmem:[%s3891_s28 + $0xe0] sm:$0xff] %v2966_v55  ;;  %v2071_v0 = vsel %vm2059_vm4, %v2067_v46, 0.0  ;;  %vm2061_vm6 = vcmp.gt.f32.partialorder %v4886_v1, 1.0  ;;  %v2101_v20 = vadd.f32 2.0, %v2093_v27 }
 0x15b   : > { %vm2095_vm7 = vcmp.gt.f32.partialorder %v2071_v0, 0.0  ;;  %vm2103_vm8 = vcmp.eq.f32.partialorder %v2071_v0, %v2099_v34  ;;  %v2072_v35 = vsel %vm2060_vm5, %v2068_v62, 0.0  ;;  %v2069_v32 = vmax.f32 %v2065_v2, 0.0 }
 0x15c   : > { %vm2107_vm9 = vmand %vm2095_vm7, %vm2103_vm8  ;;  %vm2096_vm10 = vcmp.gt.f32.partialorder %v2072_v35, 0.0  ;;  %vm2104_vm11 = vcmp.eq.f32.partialorder %v2072_v35, %v2100_v19 }
 0x15d   : > { %v2967_v50 = vsel %vm2107_vm9, 1.0, %v3504_v13  ;;  %vm2108_vm12 = vmand %vm2096_vm10, %vm2104_vm11  ;;  %v2073_v43 = vsel %vm2061_vm6, %v2069_v32, 0.0 }
 0x15e   : > { %2971 = vst [vmem:[%s3891_s28 + $0xe8] sm:$0xff] %v2967_v50  ;;  %v2968_v15 = vsel %vm2108_vm12, 1.0, %v3504_v13  ;;  %vm2097_vm13 = vcmp.gt.f32.partialorder %v2073_v43, 0.0  ;;  %vm2105_vm14 = vcmp.eq.f32.partialorder %v2073_v43, %v2101_v20 }
 0x15f   : > { %2972 = vst [vmem:[%s3891_s28 + $0xf0] sm:$0xff] %v2968_v15  ;;  %vm2109_vm15 = vmand %vm2097_vm13, %vm2105_vm14 }
 0x160   : > { %v2969_v12 = vsel %vm2109_vm15, 1.0, %v3504_v13 }
 0x161   : > { %2973 = vst [vmem:[%s3891_s28 + $0xf8] sm:$0xff] %v2969_v12 }
 0x162 PF: > { %2165 = sbr.rel (!%p3612_p6) target bundleno = 407 (0x197), region = 160  ;;  %s5281_s0 = sld [smem:[#allocation5_spill]] (%p3612_p6) }
 0x163   : > { %s2168_s13 = ssub.s32 (%p3612_p6), 10, %s3928_s2  ;;  %s5282_s22 = sld [smem:[#allocation15_spill]] (%p3612_p6) }
 0x164   : > { %p2169_p4 = scmp.lt.s32.totalorder (%p3612_p6), %s2168_s13, 8 }
 0x167   : > { %s5318_s13 = smov (!%p2169_p4, %s2168_s13), 8 }
 0x168   : > { %s3002_s26 = sshll.u32 %s5281_s0, 6  ;;  %s3001_s23 = sshll.u32 %s5318_s13, 9 }
 0x169   : > { %s2175_s29 = sadd.s32 %s3002_s26, %s3843_s30  ;;  %p2982_p5 = scmp.eq.s32.totalorder %s3001_s23, 0 }
 0x16a   : > { %s2981_s27 = sshll.u32 %s2175_s29, 3  ;;  %s5078_s6 = sshrl.u32 (!%p2982_p5), %s5318_s13, 3 }
 0x16b   : > { %s5074_s11 = scalar_lea.vmem %s5282_s22, %s2981_s27   ;;  %2180 = sbr.rel (%p2982_p5) target bundleno = 407 (0x197), region = 164 }
 0x16c   : > { %p2983_p6 = scmp.le.s32.totalorder (!%p2982_p5), %s5078_s6, 0 }
 0x170   : > { %2697 = sbr.rel (%p2983_p6) target bundleno = 390 (0x186), region = 394  ;;  %s5283_s30 = smov (!%p2983_p6), %s5074_s11 }
 0x171   : > { %s5284_s2 = smov (!%p2983_p6), %s3891_s28  ;;  %s5087_s16 = smov (!%p2983_p6), 0  }
 0x172   : > { %s5089_s1 = smov (!%p2983_p6), 0  }
 0x175 LB: >> { %v2311_v13 = vld [vmem:[%s3477_s2] sm:$0xff]  ;;  %s2375_s3 = sadd.s32 1, %s3481_s16  ;;  %v2327_v14 = vld [vmem:[%s3477_s2 + $0x8] sm:$0xff]  ;;  %v2343_v63 = vld [vmem:[%s3477_s2 + $0x10] sm:$0xff]  ;;  %s2305_s1 = sadd.s32 1, %s3485_s1   ;;  %s3485_s1 = sphi %s5089_s1, %s2305_s1   ;;  %s3481_s16 = sphi %s5087_s16, %s5287_s16   ;;  %s3477_s2 = sphi %s5284_s2, %s5286_s2   ;;  %s3473_s30 = sphi %s5283_s30, %s5285_s30  }
 0x176   : >> { %v2313_v1 = vld [vmem:[%s3477_s2 + $0x20] sm:$0xff]  ;;  %2312 = vst [vmem:[%s3473_s30] sm:$0xff] %v2311_v13  ;;  %p2376_p7 = scmp.ge.s32.totalorder %s2375_s3, %s5078_s6  ;;  %2328 = vst [vmem:[%s3473_s30 + $0x8] sm:$0xff] %v2327_v14  ;;  %v2329_v3 = vld [vmem:[%s3477_s2 + $0x28] sm:$0xff]  ;;  %p2304_p8 = scmp.ge.s32.totalorder %s2305_s1, %s5078_s6 }
 0x177   : >> { %v2315_v11 = vld [vmem:[%s3477_s2 + $0x40] sm:$0xff]  ;;  %2314 = vst [vmem:[%s3473_s30 + $0x40] sm:$0xff] %v2313_v1  ;;  %v2331_v51 = vld [vmem:[%s3477_s2 + $0x48] sm:$0xff]  ;;  %2330 = vst [vmem:[%s3473_s30 + $0x48] sm:$0xff] %v2329_v3 }
 0x178   : >> { %2316 = vst [vmem:[%s3473_s30 + $0x80] sm:$0xff] %v2315_v11  ;;  %v2317_v44 = vld [vmem:[%s3477_s2 + $0x60] sm:$0xff]  ;;  %v2333_v60 = vld [vmem:[%s3477_s2 + $0x68] sm:$0xff]  ;;  %s5320_s3 = smov (%p2376_p7, %s2375_s3), 0  ;;  %2332 = vst [vmem:[%s3473_s30 + $0x88] sm:$0xff] %v2331_v51 }
 0x179   : >> { %v2319_v26 = vld [vmem:[%s3477_s2 + $0x80] sm:$0xff]  ;;  %2318 = vst [vmem:[%s3473_s30 + $0xc0] sm:$0xff] %v2317_v44  ;;  %2334 = vst [vmem:[%s3473_s30 + $0xc8] sm:$0xff] %v2333_v60  ;;  %v2335_v4 = vld [vmem:[%s3477_s2 + $0x88] sm:$0xff]  ;;  %s2984_s4 = sshll.u32 %s5320_s3, 8  ;;  %s2985_s21 = sshll.u32 %s5320_s3, 9 }
 0x17a   : >> { %v2321_v16 = vld [vmem:[%s3477_s2 + $0xa0] sm:$0xff]  ;;  %2320 = vst [vmem:[%s3473_s30 + $0x100] sm:$0xff] %v2319_v26  ;;  %v2337_v10 = vld [vmem:[%s3477_s2 + $0xa8] sm:$0xff]  ;;  %2336 = vst [vmem:[%s3473_s30 + $0x108] sm:$0xff] %v2335_v4  ;;  %s5146_s20 = scalar_lea.vmem %s3891_s28, %s2984_s4 [#allocation4]   ;;  %s2381_s25 = scalar_lea.vmem %s5074_s11, %s2985_s21  }
 0x17b   : >> { %2322 = vst [vmem:[%s3473_s30 + $0x140] sm:$0xff] %v2321_v16  ;;  %v2323_v57 = vld [vmem:[%s3477_s2 + $0xc0] sm:$0xff]  ;;  %v2339_v9 = vld [vmem:[%s3477_s2 + $0xc8] sm:$0xff]  ;;  %2338 = vst [vmem:[%s3473_s30 + $0x148] sm:$0xff] %v2337_v10  ;;  %s5287_s16 = smov %s5320_s3 }
 0x17c   : >> { %v2325_v28 = vld [vmem:[%s3477_s2 + $0xe0] sm:$0xff]  ;;  %2324 = vst [vmem:[%s3473_s30 + $0x180] sm:$0xff] %v2323_v57  ;;  %2340 = vst [vmem:[%s3473_s30 + $0x188] sm:$0xff] %v2339_v9  ;;  %v2341_v56 = vld [vmem:[%s3477_s2 + $0xe8] sm:$0xff] }
 0x17d   : >> { %2326 = vst [vmem:[%s3473_s30 + $0x1c0] sm:$0xff] %v2325_v28  ;;  %v2345_v31 = vld [vmem:[%s3477_s2 + $0x30] sm:$0xff]  ;;  %2342 = vst [vmem:[%s3473_s30 + $0x1c8] sm:$0xff] %v2341_v56  ;;  %v2359_v27 = vld [vmem:[%s3477_s2 + $0x18] sm:$0xff] }
 0x17e   : >> { %2344 = vst [vmem:[%s3473_s30 + $0x10] sm:$0xff] %v2343_v63  ;;  %2346 = vst [vmem:[%s3473_s30 + $0x50] sm:$0xff] %v2345_v31  ;;  %v2347_v59 = vld [vmem:[%s3477_s2 + $0x50] sm:$0xff]  ;;  %v2361_v40 = vld [vmem:[%s3477_s2 + $0x38] sm:$0xff] }
 0x17f   : >> { %v2349_v58 = vld [vmem:[%s3477_s2 + $0x70] sm:$0xff]  ;;  %2348 = vst [vmem:[%s3473_s30 + $0x90] sm:$0xff] %v2347_v59  ;;  %v2363_v45 = vld [vmem:[%s3477_s2 + $0x58] sm:$0xff]  ;;  %2360 = vst [vmem:[%s3473_s30 + $0x18] sm:$0xff] %v2359_v27 }
 0x180   : >> { %v2351_v36 = vld [vmem:[%s3477_s2 + $0x90] sm:$0xff]  ;;  %2350 = vst [vmem:[%s3473_s30 + $0xd0] sm:$0xff] %v2349_v58  ;;  %2362 = vst [vmem:[%s3473_s30 + $0x58] sm:$0xff] %v2361_v40  ;;  %v2365_v29 = vld [vmem:[%s3477_s2 + $0x78] sm:$0xff] }
 0x181   : >> { %2352 = vst [vmem:[%s3473_s30 + $0x110] sm:$0xff] %v2351_v36  ;;  %v2353_v25 = vld [vmem:[%s3477_s2 + $0xb0] sm:$0xff]  ;;  %2364 = vst [vmem:[%s3473_s30 + $0x98] sm:$0xff] %v2363_v45  ;;  %v2367_v18 = vld [vmem:[%s3477_s2 + $0x98] sm:$0xff]  ;;  %2307 = sbr.rel (!%p2304_p8) target bundleno = 373 (0x175), region = 400 }
 0x182   : >> { %v2355_v53 = vld [vmem:[%s3477_s2 + $0xd0] sm:$0xff]  ;;  %2354 = vst [vmem:[%s3473_s30 + $0x150] sm:$0xff] %v2353_v25  ;;  %v2369_v47 = vld [vmem:[%s3477_s2 + $0xb8] sm:$0xff]  ;;  %2366 = vst [vmem:[%s3473_s30 + $0xd8] sm:$0xff] %v2365_v29 }
 0x183   : >> { %v2357_v23 = vld [vmem:[%s3477_s2 + $0xf0] sm:$0xff]  ;;  %2356 = vst [vmem:[%s3473_s30 + $0x190] sm:$0xff] %v2355_v53  ;;  %2368 = vst [vmem:[%s3473_s30 + $0x118] sm:$0xff] %v2367_v18  ;;  %v2371_v17 = vld [vmem:[%s3477_s2 + $0xd8] sm:$0xff] }
 0x184   : >> { %2358 = vst [vmem:[%s3473_s30 + $0x1d0] sm:$0xff] %v2357_v23  ;;  %2370 = vst [vmem:[%s3473_s30 + $0x158] sm:$0xff] %v2369_v47  ;;  %v2373_v39 = vld [vmem:[%s3477_s2 + $0xf8] sm:$0xff]  ;;  %s5286_s2 = smov %s5146_s20 }
 0x185   : >> { %2372 = vst [vmem:[%s3473_s30 + $0x198] sm:$0xff] %v2371_v17  ;;  %2374 = vst [vmem:[%s3473_s30 + $0x1d8] sm:$0xff] %v2373_v39  ;;  %s5285_s30 = smov %s2381_s25 }
 0x186 PF: > { %s5187_s24 = sand.u32 7, %s5318_s13   ;;  %s3003_s0 = sshll.u32 %s5078_s6, 8 }
 0x187   : > { %s5191_s26 = scalar_lea.vmem %s3891_s28, %s3003_s0 [#allocation4]   ;;  %s3004_s29 = sshll.u32 %s5078_s6, 9 }
 0x188   : > { %s5195_s27 = scalar_lea.vmem %s5074_s11, %s3004_s29   ;;  %p2989_p9 = scmp.le.s32.totalorder %s5187_s24, 0 }
 0x189   : > { %s5288_s12 = smov (!%p2989_p9), %s5195_s27  ;;  %s5289_s15 = smov (!%p2989_p9), %s5191_s26 }
 0x18a   : > { %2711 = sbr.rel (%p2989_p9) target bundleno = 407 (0x197), region = 405  ;;  %s3495_s22 = smov (!%p2989_p9), 0  }
 0x18b   : > { %s3499_s23 = smov (!%p2989_p9), 0  }
 0x18f LB: >> { %v2398_v37 = vld [vmem:[%s3493_s15] sm:$0xff]  ;;  %v2400_v24 = vld [vmem:[%s3493_s15 + $0x8] sm:$0xff]  ;;  %v2402_v48 = vld [vmem:[%s3493_s15 + $0x10] sm:$0xff]  ;;  %s2406_s28 = sadd.s32 1, %s3497_s22  ;;  %s2392_s23 = sadd.s32 1, %s3501_s23   ;;  %s3501_s23 = sphi %s3499_s23, %s2392_s23   ;;  %s3497_s22 = sphi %s3495_s22, %s3496_s22   ;;  %s3493_s15 = sphi %s5289_s15, %s2411_s15   ;;  %s3489_s12 = sphi %s5288_s12, %s2412_s12  }
 0x190   : >> { %2399 = vst [vmem:[%s3489_s12] sm:$0xff] %v2398_v37  ;;  %2401 = vst [vmem:[%s3489_s12 + $0x8] sm:$0xff] %v2400_v24  ;;  %v2404_v42 = vld [vmem:[%s3493_s15 + $0x18] sm:$0xff]  ;;  %p2407_p10 = scmp.ge.s32.totalorder %s2406_s28, %s5187_s24  ;;  %p2391_p11 = scmp.ge.s32.totalorder %s2392_s23, %s5187_s24 }
 0x191   : >> { %2403 = vst [vmem:[%s3489_s12 + $0x10] sm:$0xff] %v2402_v48  ;;  %2405 = vst [vmem:[%s3489_s12 + $0x18] sm:$0xff] %v2404_v42 }
 0x192   : >> { %s5322_s28 = smov (%p2407_p10, %s2406_s28), 0  ;;  %2394 = sbr.rel (!%p2391_p11) target bundleno = 399 (0x18f), region = 411 }
 0x193   : >> { %s2990_s13 = sshll.u32 %s5322_s28, 5  ;;  %s2991_s11 = sshll.u32 %s5322_s28, 6 }
 0x194   : >> { %s2411_s15 = scalar_lea.vmem %s5191_s26, %s2990_s13 [#allocation4]   ;;  %s2412_s12 = scalar_lea.vmem %s5195_s27, %s2991_s11  }
 0x195   : >> { %s3496_s22 = smov %s5322_s28  }
 0x197 PF: > { %s21_s19 = sadd.s32 1, %s3405_s19   ;;  %s5290_s6 = sld [smem:[#allocation9_spill]] }
 0x198   : > { %p18_p12 = scmp.ge.s32.totalorder %s21_s19, 6   ;;  %s5291_s30 = sld [smem:[#allocation6_spill]] }
 0x199   : > { %s5292_s2 = sld [smem:[#allocation7_spill]]  ;;  %s5293_s13 = smov %s3385_s14 }
 0x19a   : > { %s5295_s15 = smov %s3397_s17  ;;  %s5296_s16 = smov %s3401_s18 }
 0x19b   :  { %20 = sbr.rel (!%p18_p12) target bundleno = 11 (0xb), region = 422 }
 0x19d   : > { %s5294_s14 = smov %s5290_s6 }
 0x19e   : > { %s5297_s17 = smov %s5291_s30 }
 0x19f   : > { %s5298_s18 = smov %s5292_s2 }

</bundles_post_ra>
